<compile_context>
chip_gen: v7x
topology: tpu7x:2x2x1
jax: 0.10.0
libtpu: 0.0.40
codegen_flags: <defaults>
</compile_context>

<pallas_src>
import functools

import numpy as np
import jax
import jax.numpy as jnp
from jax.experimental import pallas as pl
from jax.experimental.pallas import tpu as pltpu

# ----------------------------- static shapes -----------------------------
TB = 8                      # batch tile (images per grid step)
C1, C2 = 6, 16              # conv output channels
K = 5                       # conv kernel size
H0 = 28                     # input spatial
H1 = H0 - K + 1             # 24  (conv1 out)
P1 = H1 // 2                # 12  (pool1 out)
H2 = P1 - K + 1             # 8   (conv2 out)
P2 = H2 // 2                # 4   (pool2 out)
F1, F2, F3 = 120, 84, 10    # fc sizes
OUT_PAD = 128               # lane-dense padded logits width


# ----------------------------- fused kernel -----------------------------
def _fused_forward_kernel(x_ref,
                          s1_ref, w1_ref, b1_ref, p1l_ref,
                          s2_ref, w2_ref, b2_ref, p2l_ref,
                          sel_ref, w3_ref, b3_ref,
                          w4_ref, b4_ref, w5_ref, b5_ref,
                          o_ref):
    dot = functools.partial(jnp.dot, preferred_element_type=jnp.float32)

    x2 = x_ref[...]                                            # (tb*28, 28)

    # ---- conv1 (pool1 column-average + 0.25 folded into w1) ----
    # rows = (n, oh); cols = (pw, c)
    acc1 = dot(dot(s1_ref[0], x2), w1_ref[0])
    for kh in range(1, K):
        acc1 = acc1 + dot(dot(s1_ref[kh], x2), w1_ref[kh])     # (tb*24, 72)

    # ---- pool1 row-average + bias, then square ----
    p1 = dot(p1l_ref[...], acc1) + b1_ref[...]                 # (tb*12, 72)
    p1 = p1 * p1

    # ---- conv2 (pool2 column-average folded into w2) ----
    acc2 = dot(dot(s2_ref[0], p1), w2_ref[0])
    for kh in range(1, K):
        acc2 = acc2 + dot(dot(s2_ref[kh], p1), w2_ref[kh])     # (tb*8, 64)

    # ---- pool2 row-average + bias, then square ----
    p2 = dot(p2l_ref[...], acc2) + b2_ref[...]                 # (tb*4, 64)
    p2 = p2 * p2

    # ---- fc1: torch (c,h,w) flatten folded into (row-select, weight) pairs ----
    h1 = dot(dot(sel_ref[0], p2), w3_ref[0])                   # (tb, 120)
    for ph in range(1, P2):
        h1 = h1 + dot(dot(sel_ref[ph], p2), w3_ref[ph])
    h1 = jnp.maximum(h1 + b3_ref[...], 0.0)

    # ---- fc2 / fc3 (output padded to 128 lanes) ----
    h2 = jnp.maximum(dot(h1, w4_ref[...]) + b4_ref[...], 0.0)  # (tb, 84)
    out = dot(h2, w5_ref[...]) + b5_ref[...]                   # (tb, 128)
    o_ref[...] = out.astype(o_ref.dtype)


# ------------------ one-time host-side parameter folding ------------------
def prepare_params(params, tb=TB):
    """Fold conv kernels, pooling (incl. 0.25 scale), row shifts and the torch
    flatten order into matmul-ready constant matrices (built once)."""
    f32 = np.float32
    w1 = np.asarray(params["conv1_w"], f32)   # (6, 1, 5, 5)
    b1 = np.asarray(params["conv1_b"], f32)
    w2 = np.asarray(params["conv2_w"], f32)   # (16, 6, 5, 5)
    b2 = np.asarray(params["conv2_b"], f32)
    fw1 = np.asarray(params["fc1_w"], f32)    # (120, 256)
    fb1 = np.asarray(params["fc1_b"], f32)
    fw2 = np.asarray(params["fc2_w"], f32)    # (84, 120)
    fb2 = np.asarray(params["fc2_b"], f32)
    fw3 = np.asarray(params["fc3_w"], f32)    # (10, 84)
    fb3 = np.asarray(params["fc3_b"], f32)

    # conv1 row-shift selectors: row (t, oh) <- input row (t, oh + kh)
    S1 = np.zeros((K, tb * H1, tb * H0), f32)
    for kh in range(K):
        for t in range(tb):
            for oh in range(H1):
                S1[kh, t * H1 + oh, t * H0 + oh + kh] = 1.0

    # conv1 structured weight: (W=28) -> (ow=24, cout=6)
    W1 = np.zeros((K, H0, H1 * C1), f32)
    for kh in range(K):
        for kw in range(K):
            for ow in range(H1):
                W1[kh, ow + kw, ow * C1:(ow + 1) * C1] = w1[:, 0, kh, kw]
    # fold pool1 column-average (and half the 0.25 scale) into W1
    P1R = np.zeros((H1 * C1, P1 * C1), f32)
    for ow in range(H1):
        for c in range(C1):
            P1R[ow * C1 + c, (ow // 2) * C1 + c] = 0.5
    W1P = W1 @ P1R                                             # (K, 28, 72)
    B1 = np.tile(b1, P1)[None, :]                              # (1, 72)

    # pool1 row-average (other half of the 0.25 scale)
    P1L = np.zeros((tb * P1, tb * H1), f32)
    for t in range(tb):
        for ph in range(P1):
            P1L[t * P1 + ph, t * H1 + 2 * ph] = 0.5
            P1L[t * P1 + ph, t * H1 + 2 * ph + 1] = 0.5

    # conv2 row-shift selectors
    S2 = np.zeros((K, tb * H2, tb * P1), f32)
    for kh in range(K):
        for t in range(tb):
            for oh in range(H2):
                S2[kh, t * H2 + oh, t * P1 + oh + kh] = 1.0

    # conv2 structured weight: (pw, cin) -> (ow, cout)
    W2 = np.zeros((K, P1 * C1, H2 * C2), f32)
    for kh in range(K):
        for kw in range(K):
            for ow in range(H2):
                pw = ow + kw
                W2[kh, pw * C1:(pw + 1) * C1, ow * C2:(ow + 1) * C2] = \
                    w2[:, :, kh, kw].T                         # (cin, cout)
    P2R = np.zeros((H2 * C2, P2 * C2), f32)
    for ow in range(H2):
        for c in range(C2):
            P2R[ow * C2 + c, (ow // 2) * C2 + c] = 0.5
    W2P = W2 @ P2R                                             # (K, 72, 64)
    B2 = np.tile(b2, P2)[None, :]                              # (1, 64)

    P2L = np.zeros((tb * P2, tb * H2), f32)
    for t in range(tb):
        for ph in range(P2):
            P2L[t * P2 + ph, t * H2 + 2 * ph] = 0.5
            P2L[t * P2 + ph, t * H2 + 2 * ph + 1] = 0.5

    # fc1: torch flattens (c, h, w); kernel layout is rows=(n, h), cols=(w, c)
    SEL = np.zeros((P2, tb, tb * P2), f32)
    for ph in range(P2):
        for t in range(tb):
            SEL[ph, t, t * P2 + ph] = 1.0
    W3 = np.zeros((P2, P2 * C2, F1), f32)
    for ph in range(P2):
        for pw in range(P2):
            for c in range(C2):
                W3[ph, pw * C2 + c, :] = fw1[:, c * (P2 * P2) + ph * P2 + pw]
    B3 = fb1[None, :]

    W4 = fw2.T.copy()                                          # (120, 84)
    B4 = fb2[None, :]

    # fc3 padded to 128 output lanes (zero columns beyond 10)
    W5 = np.zeros((F2, OUT_PAD), f32)
    W5[:, :F3] = fw3.T
    B5 = np.zeros((1, OUT_PAD), f32)
    B5[0, :F3] = fb3

    consts = (S1, W1P, B1, P1L,
              S2, W2P, B2, P2L,
              SEL, W3, B3, W4, B4, W5, B5)
    return tuple(jnp.asarray(c) for c in consts)


def _const_spec(arr):
    nd = arr.ndim
    return pl.BlockSpec(arr.shape, lambda i, _n=nd: (0,) * _n)


def make_forward(params, tb=TB):
    consts = prepare_params(params, tb)

    def forward(x):
        """x: (N, 1, 28, 28) float32 -> logits (N, 10)."""
        n = x.shape[0]
        npad = ((n + tb - 1) // tb) * tb
        x2 = x.reshape(n, H0 * H0).astype(jnp.float32)
        if npad != n:
            x2 = jnp.pad(x2, ((0, npad - n), (0, 0)))
        x2 = x2.reshape(npad * H0, H0)                         # 2-D, lane=28
        out = pl.pallas_call(
            _fused_forward_kernel,
            out_shape=jax.ShapeDtypeStruct((npad, OUT_PAD), jnp.float32),
            grid=(npad // tb,),
            in_specs=[pl.BlockSpec((tb * H0, H0), lambda i: (i, 0))]
                     + [_const_spec(c) for c in consts],
            out_specs=pl.BlockSpec((tb, OUT_PAD), lambda i: (i, 0)),
            compiler_params=pltpu.CompilerParams(
                dimension_semantics=("parallel",)),
        )(x2, *consts)
        return out[:n, :F3]

    return forward


# ----------------------------- reference / params -----------------------------
def init_params(key):
    """Deterministic synthetic parameters with the SplitMNISTNet shapes."""
    ks = jax.random.split(key, 10)

    def u(k, shape, fan_in):
        bound = 1.0 / jnp.sqrt(fan_in)
        return jax.random.uniform(k, shape, jnp.float32, -bound, bound)

    return {
        "conv1_w": u(ks[0], (6, 1, 5, 5), 1 * 5 * 5),
        "conv1_b": u(ks[1], (6,), 1 * 5 * 5),
        "conv2_w": u(ks[2], (16, 6, 5, 5), 6 * 5 * 5),
        "conv2_b": u(ks[3], (16,), 6 * 5 * 5),
        "fc1_w": u(ks[4], (120, 256), 256),
        "fc1_b": u(ks[5], (120,), 256),
        "fc2_w": u(ks[6], (84, 120), 120),
        "fc2_b": u(ks[7], (84,), 120),
        "fc3_w": u(ks[8], (10, 84), 84),
        "fc3_b": u(ks[9], (10,), 84),
    }


def _reference_forward(params, x):
    """Pure-JAX reference mirroring the PyTorch forward (normal work mode)."""
    def conv(y, w, b):
        y = jax.lax.conv_general_dilated(
            y, w, window_strides=(1, 1), padding="VALID",
            dimension_numbers=("NCHW", "OIHW", "NCHW"))
        return y + b[None, :, None, None]

    def pool_sq(y):
        n, c, h, w = y.shape
        y = y.reshape(n, c, h // 2, 2, w // 2, 2).mean(axis=(3, 5))
        return jnp.square(y)

    y = pool_sq(conv(x, params["conv1_w"], params["conv1_b"]))
    y = pool_sq(conv(y, params["conv2_w"], params["conv2_b"]))
    y = y.reshape(y.shape[0], -1)
    y = jax.nn.relu(y @ params["fc1_w"].T + params["fc1_b"])
    y = jax.nn.relu(y @ params["fc2_w"].T + params["fc2_b"])
    return y @ params["fc3_w"].T + params["fc3_b"]


if __name__ == "__main__":
    key = jax.random.PRNGKey(0)
    k_param, k_input = jax.random.split(key)
    params = init_params(k_param)
    x = jax.random.normal(k_input, (2, 1, 28, 28), dtype=jnp.float32)

    fwd = jax.jit(make_forward(params))
    logits = fwd(x)
    jax.block_until_ready(logits)
    assert logits.shape == (2, 10), logits.shape

    ref = _reference_forward(params, x)
    assert jnp.allclose(logits, ref, rtol=2e-2, atol=2e-2), \
        float(jnp.max(jnp.abs(logits - ref)))

    print("KERNEL_OK")
</pallas_src>

<mosaic_0001>
module attributes {stable_mosaic.version = 11 : i64} {
  func.func @_fused_forward_kernel(%arg0: i32, %arg1: memref<224x28xf32, #tpu.memory_space<vmem>>, %arg2: memref<5x192x224xf32, #tpu.memory_space<vmem>>, %arg3: memref<5x28x72xf32, #tpu.memory_space<vmem>>, %arg4: memref<1x72xf32, #tpu.memory_space<vmem>>, %arg5: memref<96x192xf32, #tpu.memory_space<vmem>>, %arg6: memref<5x64x96xf32, #tpu.memory_space<vmem>>, %arg7: memref<5x72x64xf32, #tpu.memory_space<vmem>>, %arg8: memref<1x64xf32, #tpu.memory_space<vmem>>, %arg9: memref<32x64xf32, #tpu.memory_space<vmem>>, %arg10: memref<4x8x32xf32, #tpu.memory_space<vmem>>, %arg11: memref<4x64x120xf32, #tpu.memory_space<vmem>>, %arg12: memref<1x120xf32, #tpu.memory_space<vmem>>, %arg13: memref<120x84xf32, #tpu.memory_space<vmem>>, %arg14: memref<1x84xf32, #tpu.memory_space<vmem>>, %arg15: memref<84x128xf32, #tpu.memory_space<vmem>>, %arg16: memref<1x128xf32, #tpu.memory_space<vmem>>, %arg17: memref<8x128xf32, #tpu.memory_space<vmem>>) attributes {dimension_semantics = [#tpu.dimension_semantics<parallel>], iteration_bounds = array<i64: 1>, scalar_prefetch = 0 : i64, scratch_operands = 0 : i64, tpu.core_type = #tpu.core_type<tc>, window_params = [{transform_indices = @transform_0, window_bounds = array<i64: 224, 28>}, {pipeline_mode = #tpu.pipeline_mode<synchronous>, transform_indices = @transform_1, window_bounds = array<i64: 5, 192, 224>}, {pipeline_mode = #tpu.pipeline_mode<synchronous>, transform_indices = @transform_2, window_bounds = array<i64: 5, 28, 72>}, {pipeline_mode = #tpu.pipeline_mode<synchronous>, transform_indices = @transform_3, window_bounds = array<i64: 1, 72>}, {pipeline_mode = #tpu.pipeline_mode<synchronous>, transform_indices = @transform_4, window_bounds = array<i64: 96, 192>}, {pipeline_mode = #tpu.pipeline_mode<synchronous>, transform_indices = @transform_5, window_bounds = array<i64: 5, 64, 96>}, {pipeline_mode = #tpu.pipeline_mode<synchronous>, transform_indices = @transform_6, window_bounds = array<i64: 5, 72, 64>}, {pipeline_mode = #tpu.pipeline_mode<synchronous>, transform_indices = @transform_7, window_bounds = array<i64: 1, 64>}, {pipeline_mode = #tpu.pipeline_mode<synchronous>, transform_indices = @transform_8, window_bounds = array<i64: 32, 64>}, {pipeline_mode = #tpu.pipeline_mode<synchronous>, transform_indices = @transform_9, window_bounds = array<i64: 4, 8, 32>}, {pipeline_mode = #tpu.pipeline_mode<synchronous>, transform_indices = @transform_10, window_bounds = array<i64: 4, 64, 120>}, {pipeline_mode = #tpu.pipeline_mode<synchronous>, transform_indices = @transform_11, window_bounds = array<i64: 1, 120>}, {pipeline_mode = #tpu.pipeline_mode<synchronous>, transform_indices = @transform_12, window_bounds = array<i64: 120, 84>}, {pipeline_mode = #tpu.pipeline_mode<synchronous>, transform_indices = @transform_13, window_bounds = array<i64: 1, 84>}, {pipeline_mode = #tpu.pipeline_mode<synchronous>, transform_indices = @transform_14, window_bounds = array<i64: 84, 128>}, {pipeline_mode = #tpu.pipeline_mode<synchronous>, transform_indices = @transform_15, window_bounds = array<i64: 1, 128>}, {transform_indices = @transform_16, window_bounds = array<i64: 8, 128>}]} {
    %c0 = arith.constant 0 : index
    %c0_0 = arith.constant 0 : index
    %0 = vector.load %arg1[%c0, %c0_0] : memref<224x28xf32, #tpu.memory_space<vmem>>, vector<224x28xf32>
    %c0_1 = arith.constant 0 : index
    %c0_2 = arith.constant 0 : index
    %c0_3 = arith.constant 0 : index
    %1 = vector.load %arg2[%c0_1, %c0_2, %c0_3] : memref<5x192x224xf32, #tpu.memory_space<vmem>>, vector<1x192x224xf32>
    %2 = vector.shape_cast %1 : vector<1x192x224xf32> to vector<192x224xf32>
    %cst = arith.constant dense<0.000000e+00> : vector<192x28xf32>
    %3 = tpu.matmul %2, %0, %cst {dimension_numbers = #tpu.dot_dimension_numbers<[1], [0], [0], [1], [0, 0, 1, 1], [], []>} : vector<192x224xf32>, vector<224x28xf32>, vector<192x28xf32> -> vector<192x28xf32>
    %c0_4 = arith.constant 0 : index
    %c0_5 = arith.constant 0 : index
    %c0_6 = arith.constant 0 : index
    %4 = vector.load %arg3[%c0_4, %c0_5, %c0_6] : memref<5x28x72xf32, #tpu.memory_space<vmem>>, vector<1x28x72xf32>
    %5 = vector.shape_cast %4 : vector<1x28x72xf32> to vector<28x72xf32>
    %cst_7 = arith.constant dense<0.000000e+00> : vector<192x72xf32>
    %6 = tpu.matmul %3, %5, %cst_7 {dimension_numbers = #tpu.dot_dimension_numbers<[1], [0], [0], [1], [0, 0, 1, 1], [], []>} : vector<192x28xf32>, vector<28x72xf32>, vector<192x72xf32> -> vector<192x72xf32>
    %c1 = arith.constant 1 : index
    %c0_8 = arith.constant 0 : index
    %c0_9 = arith.constant 0 : index
    %7 = vector.load %arg2[%c1, %c0_8, %c0_9] : memref<5x192x224xf32, #tpu.memory_space<vmem>>, vector<1x192x224xf32>
    %8 = vector.shape_cast %7 : vector<1x192x224xf32> to vector<192x224xf32>
    %cst_10 = arith.constant dense<0.000000e+00> : vector<192x28xf32>
    %9 = tpu.matmul %8, %0, %cst_10 {dimension_numbers = #tpu.dot_dimension_numbers<[1], [0], [0], [1], [0, 0, 1, 1], [], []>} : vector<192x224xf32>, vector<224x28xf32>, vector<192x28xf32> -> vector<192x28xf32>
    %c1_11 = arith.constant 1 : index
    %c0_12 = arith.constant 0 : index
    %c0_13 = arith.constant 0 : index
    %10 = vector.load %arg3[%c1_11, %c0_12, %c0_13] : memref<5x28x72xf32, #tpu.memory_space<vmem>>, vector<1x28x72xf32>
    %11 = vector.shape_cast %10 : vector<1x28x72xf32> to vector<28x72xf32>
    %cst_14 = arith.constant dense<0.000000e+00> : vector<192x72xf32>
    %12 = tpu.matmul %9, %11, %cst_14 {dimension_numbers = #tpu.dot_dimension_numbers<[1], [0], [0], [1], [0, 0, 1, 1], [], []>} : vector<192x28xf32>, vector<28x72xf32>, vector<192x72xf32> -> vector<192x72xf32>
    %13 = arith.addf %6, %12 : vector<192x72xf32>
    %c2 = arith.constant 2 : index
    %c0_15 = arith.constant 0 : index
    %c0_16 = arith.constant 0 : index
    %14 = vector.load %arg2[%c2, %c0_15, %c0_16] : memref<5x192x224xf32, #tpu.memory_space<vmem>>, vector<1x192x224xf32>
    %15 = vector.shape_cast %14 : vector<1x192x224xf32> to vector<192x224xf32>
    %cst_17 = arith.constant dense<0.000000e+00> : vector<192x28xf32>
    %16 = tpu.matmul %15, %0, %cst_17 {dimension_numbers = #tpu.dot_dimension_numbers<[1], [0], [0], [1], [0, 0, 1, 1], [], []>} : vector<192x224xf32>, vector<224x28xf32>, vector<192x28xf32> -> vector<192x28xf32>
    %c2_18 = arith.constant 2 : index
    %c0_19 = arith.constant 0 : index
    %c0_20 = arith.constant 0 : index
    %17 = vector.load %arg3[%c2_18, %c0_19, %c0_20] : memref<5x28x72xf32, #tpu.memory_space<vmem>>, vector<1x28x72xf32>
    %18 = vector.shape_cast %17 : vector<1x28x72xf32> to vector<28x72xf32>
    %cst_21 = arith.constant dense<0.000000e+00> : vector<192x72xf32>
    %19 = tpu.matmul %16, %18, %cst_21 {dimension_numbers = #tpu.dot_dimension_numbers<[1], [0], [0], [1], [0, 0, 1, 1], [], []>} : vector<192x28xf32>, vector<28x72xf32>, vector<192x72xf32> -> vector<192x72xf32>
    %20 = arith.addf %13, %19 : vector<192x72xf32>
    %c3 = arith.constant 3 : index
    %c0_22 = arith.constant 0 : index
    %c0_23 = arith.constant 0 : index
    %21 = vector.load %arg2[%c3, %c0_22, %c0_23] : memref<5x192x224xf32, #tpu.memory_space<vmem>>, vector<1x192x224xf32>
    %22 = vector.shape_cast %21 : vector<1x192x224xf32> to vector<192x224xf32>
    %cst_24 = arith.constant dense<0.000000e+00> : vector<192x28xf32>
    %23 = tpu.matmul %22, %0, %cst_24 {dimension_numbers = #tpu.dot_dimension_numbers<[1], [0], [0], [1], [0, 0, 1, 1], [], []>} : vector<192x224xf32>, vector<224x28xf32>, vector<192x28xf32> -> vector<192x28xf32>
    %c3_25 = arith.constant 3 : index
    %c0_26 = arith.constant 0 : index
    %c0_27 = arith.constant 0 : index
    %24 = vector.load %arg3[%c3_25, %c0_26, %c0_27] : memref<5x28x72xf32, #tpu.memory_space<vmem>>, vector<1x28x72xf32>
    %25 = vector.shape_cast %24 : vector<1x28x72xf32> to vector<28x72xf32>
    %cst_28 = arith.constant dense<0.000000e+00> : vector<192x72xf32>
    %26 = tpu.matmul %23, %25, %cst_28 {dimension_numbers = #tpu.dot_dimension_numbers<[1], [0], [0], [1], [0, 0, 1, 1], [], []>} : vector<192x28xf32>, vector<28x72xf32>, vector<192x72xf32> -> vector<192x72xf32>
    %27 = arith.addf %20, %26 : vector<192x72xf32>
    %c4 = arith.constant 4 : index
    %c0_29 = arith.constant 0 : index
    %c0_30 = arith.constant 0 : index
    %28 = vector.load %arg2[%c4, %c0_29, %c0_30] : memref<5x192x224xf32, #tpu.memory_space<vmem>>, vector<1x192x224xf32>
    %29 = vector.shape_cast %28 : vector<1x192x224xf32> to vector<192x224xf32>
    %cst_31 = arith.constant dense<0.000000e+00> : vector<192x28xf32>
    %30 = tpu.matmul %29, %0, %cst_31 {dimension_numbers = #tpu.dot_dimension_numbers<[1], [0], [0], [1], [0, 0, 1, 1], [], []>} : vector<192x224xf32>, vector<224x28xf32>, vector<192x28xf32> -> vector<192x28xf32>
    %c4_32 = arith.constant 4 : index
    %c0_33 = arith.constant 0 : index
    %c0_34 = arith.constant 0 : index
    %31 = vector.load %arg3[%c4_32, %c0_33, %c0_34] : memref<5x28x72xf32, #tpu.memory_space<vmem>>, vector<1x28x72xf32>
    %32 = vector.shape_cast %31 : vector<1x28x72xf32> to vector<28x72xf32>
    %cst_35 = arith.constant dense<0.000000e+00> : vector<192x72xf32>
    %33 = tpu.matmul %30, %32, %cst_35 {dimension_numbers = #tpu.dot_dimension_numbers<[1], [0], [0], [1], [0, 0, 1, 1], [], []>} : vector<192x28xf32>, vector<28x72xf32>, vector<192x72xf32> -> vector<192x72xf32>
    %34 = arith.addf %27, %33 : vector<192x72xf32>
    %c0_36 = arith.constant 0 : index
    %c0_37 = arith.constant 0 : index
    %35 = vector.load %arg5[%c0_36, %c0_37] : memref<96x192xf32, #tpu.memory_space<vmem>>, vector<96x192xf32>
    %cst_38 = arith.constant dense<0.000000e+00> : vector<96x72xf32>
    %36 = tpu.matmul %35, %34, %cst_38 {dimension_numbers = #tpu.dot_dimension_numbers<[1], [0], [0], [1], [0, 0, 1, 1], [], []>} : vector<96x192xf32>, vector<192x72xf32>, vector<96x72xf32> -> vector<96x72xf32>
    %c0_39 = arith.constant 0 : index
    %c0_40 = arith.constant 0 : index
    %37 = vector.load %arg4[%c0_39, %c0_40] : memref<1x72xf32, #tpu.memory_space<vmem>>, vector<1x72xf32>
    %38 = vector.broadcast %37 : vector<1x72xf32> to vector<96x72xf32>
    %39 = arith.addf %36, %38 : vector<96x72xf32>
    %40 = arith.mulf %39, %39 : vector<96x72xf32>
    %c0_41 = arith.constant 0 : index
    %c0_42 = arith.constant 0 : index
    %c0_43 = arith.constant 0 : index
    %41 = vector.load %arg6[%c0_41, %c0_42, %c0_43] : memref<5x64x96xf32, #tpu.memory_space<vmem>>, vector<1x64x96xf32>
    %42 = vector.shape_cast %41 : vector<1x64x96xf32> to vector<64x96xf32>
    %cst_44 = arith.constant dense<0.000000e+00> : vector<64x72xf32>
    %43 = tpu.matmul %42, %40, %cst_44 {dimension_numbers = #tpu.dot_dimension_numbers<[1], [0], [0], [1], [0, 0, 1, 1], [], []>} : vector<64x96xf32>, vector<96x72xf32>, vector<64x72xf32> -> vector<64x72xf32>
    %c0_45 = arith.constant 0 : index
    %c0_46 = arith.constant 0 : index
    %c0_47 = arith.constant 0 : index
    %44 = vector.load %arg7[%c0_45, %c0_46, %c0_47] : memref<5x72x64xf32, #tpu.memory_space<vmem>>, vector<1x72x64xf32>
    %45 = vector.shape_cast %44 : vector<1x72x64xf32> to vector<72x64xf32>
    %cst_48 = arith.constant dense<0.000000e+00> : vector<64x64xf32>
    %46 = tpu.matmul %43, %45, %cst_48 {dimension_numbers = #tpu.dot_dimension_numbers<[1], [0], [0], [1], [0, 0, 1, 1], [], []>} : vector<64x72xf32>, vector<72x64xf32>, vector<64x64xf32> -> vector<64x64xf32>
    %c1_49 = arith.constant 1 : index
    %c0_50 = arith.constant 0 : index
    %c0_51 = arith.constant 0 : index
    %47 = vector.load %arg6[%c1_49, %c0_50, %c0_51] : memref<5x64x96xf32, #tpu.memory_space<vmem>>, vector<1x64x96xf32>
    %48 = vector.shape_cast %47 : vector<1x64x96xf32> to vector<64x96xf32>
    %cst_52 = arith.constant dense<0.000000e+00> : vector<64x72xf32>
    %49 = tpu.matmul %48, %40, %cst_52 {dimension_numbers = #tpu.dot_dimension_numbers<[1], [0], [0], [1], [0, 0, 1, 1], [], []>} : vector<64x96xf32>, vector<96x72xf32>, vector<64x72xf32> -> vector<64x72xf32>
    %c1_53 = arith.constant 1 : index
    %c0_54 = arith.constant 0 : index
    %c0_55 = arith.constant 0 : index
    %50 = vector.load %arg7[%c1_53, %c0_54, %c0_55] : memref<5x72x64xf32, #tpu.memory_space<vmem>>, vector<1x72x64xf32>
    %51 = vector.shape_cast %50 : vector<1x72x64xf32> to vector<72x64xf32>
    %cst_56 = arith.constant dense<0.000000e+00> : vector<64x64xf32>
    %52 = tpu.matmul %49, %51, %cst_56 {dimension_numbers = #tpu.dot_dimension_numbers<[1], [0], [0], [1], [0, 0, 1, 1], [], []>} : vector<64x72xf32>, vector<72x64xf32>, vector<64x64xf32> -> vector<64x64xf32>
    %53 = arith.addf %46, %52 : vector<64x64xf32>
    %c2_57 = arith.constant 2 : index
    %c0_58 = arith.constant 0 : index
    %c0_59 = arith.constant 0 : index
    %54 = vector.load %arg6[%c2_57, %c0_58, %c0_59] : memref<5x64x96xf32, #tpu.memory_space<vmem>>, vector<1x64x96xf32>
    %55 = vector.shape_cast %54 : vector<1x64x96xf32> to vector<64x96xf32>
    %cst_60 = arith.constant dense<0.000000e+00> : vector<64x72xf32>
    %56 = tpu.matmul %55, %40, %cst_60 {dimension_numbers = #tpu.dot_dimension_numbers<[1], [0], [0], [1], [0, 0, 1, 1], [], []>} : vector<64x96xf32>, vector<96x72xf32>, vector<64x72xf32> -> vector<64x72xf32>
    %c2_61 = arith.constant 2 : index
    %c0_62 = arith.constant 0 : index
    %c0_63 = arith.constant 0 : index
    %57 = vector.load %arg7[%c2_61, %c0_62, %c0_63] : memref<5x72x64xf32, #tpu.memory_space<vmem>>, vector<1x72x64xf32>
    %58 = vector.shape_cast %57 : vector<1x72x64xf32> to vector<72x64xf32>
    %cst_64 = arith.constant dense<0.000000e+00> : vector<64x64xf32>
    %59 = tpu.matmul %56, %58, %cst_64 {dimension_numbers = #tpu.dot_dimension_numbers<[1], [0], [0], [1], [0, 0, 1, 1], [], []>} : vector<64x72xf32>, vector<72x64xf32>, vector<64x64xf32> -> vector<64x64xf32>
    %60 = arith.addf %53, %59 : vector<64x64xf32>
    %c3_65 = arith.constant 3 : index
    %c0_66 = arith.constant 0 : index
    %c0_67 = arith.constant 0 : index
    %61 = vector.load %arg6[%c3_65, %c0_66, %c0_67] : memref<5x64x96xf32, #tpu.memory_space<vmem>>, vector<1x64x96xf32>
    %62 = vector.shape_cast %61 : vector<1x64x96xf32> to vector<64x96xf32>
    %cst_68 = arith.constant dense<0.000000e+00> : vector<64x72xf32>
    %63 = tpu.matmul %62, %40, %cst_68 {dimension_numbers = #tpu.dot_dimension_numbers<[1], [0], [0], [1], [0, 0, 1, 1], [], []>} : vector<64x96xf32>, vector<96x72xf32>, vector<64x72xf32> -> vector<64x72xf32>
    %c3_69 = arith.constant 3 : index
    %c0_70 = arith.constant 0 : index
    %c0_71 = arith.constant 0 : index
    %64 = vector.load %arg7[%c3_69, %c0_70, %c0_71] : memref<5x72x64xf32, #tpu.memory_space<vmem>>, vector<1x72x64xf32>
    %65 = vector.shape_cast %64 : vector<1x72x64xf32> to vector<72x64xf32>
    %cst_72 = arith.constant dense<0.000000e+00> : vector<64x64xf32>
    %66 = tpu.matmul %63, %65, %cst_72 {dimension_numbers = #tpu.dot_dimension_numbers<[1], [0], [0], [1], [0, 0, 1, 1], [], []>} : vector<64x72xf32>, vector<72x64xf32>, vector<64x64xf32> -> vector<64x64xf32>
    %67 = arith.addf %60, %66 : vector<64x64xf32>
    %c4_73 = arith.constant 4 : index
    %c0_74 = arith.constant 0 : index
    %c0_75 = arith.constant 0 : index
    %68 = vector.load %arg6[%c4_73, %c0_74, %c0_75] : memref<5x64x96xf32, #tpu.memory_space<vmem>>, vector<1x64x96xf32>
    %69 = vector.shape_cast %68 : vector<1x64x96xf32> to vector<64x96xf32>
    %cst_76 = arith.constant dense<0.000000e+00> : vector<64x72xf32>
    %70 = tpu.matmul %69, %40, %cst_76 {dimension_numbers = #tpu.dot_dimension_numbers<[1], [0], [0], [1], [0, 0, 1, 1], [], []>} : vector<64x96xf32>, vector<96x72xf32>, vector<64x72xf32> -> vector<64x72xf32>
    %c4_77 = arith.constant 4 : index
    %c0_78 = arith.constant 0 : index
    %c0_79 = arith.constant 0 : index
    %71 = vector.load %arg7[%c4_77, %c0_78, %c0_79] : memref<5x72x64xf32, #tpu.memory_space<vmem>>, vector<1x72x64xf32>
    %72 = vector.shape_cast %71 : vector<1x72x64xf32> to vector<72x64xf32>
    %cst_80 = arith.constant dense<0.000000e+00> : vector<64x64xf32>
    %73 = tpu.matmul %70, %72, %cst_80 {dimension_numbers = #tpu.dot_dimension_numbers<[1], [0], [0], [1], [0, 0, 1, 1], [], []>} : vector<64x72xf32>, vector<72x64xf32>, vector<64x64xf32> -> vector<64x64xf32>
    %74 = arith.addf %67, %73 : vector<64x64xf32>
    %c0_81 = arith.constant 0 : index
    %c0_82 = arith.constant 0 : index
    %75 = vector.load %arg9[%c0_81, %c0_82] : memref<32x64xf32, #tpu.memory_space<vmem>>, vector<32x64xf32>
    %cst_83 = arith.constant dense<0.000000e+00> : vector<32x64xf32>
    %76 = tpu.matmul %75, %74, %cst_83 {dimension_numbers = #tpu.dot_dimension_numbers<[1], [0], [0], [1], [0, 0, 1, 1], [], []>} : vector<32x64xf32>, vector<64x64xf32>, vector<32x64xf32> -> vector<32x64xf32>
    %c0_84 = arith.constant 0 : index
    %c0_85 = arith.constant 0 : index
    %77 = vector.load %arg8[%c0_84, %c0_85] : memref<1x64xf32, #tpu.memory_space<vmem>>, vector<1x64xf32>
    %78 = vector.broadcast %77 : vector<1x64xf32> to vector<32x64xf32>
    %79 = arith.addf %76, %78 : vector<32x64xf32>
    %80 = arith.mulf %79, %79 : vector<32x64xf32>
    %c0_86 = arith.constant 0 : index
    %c0_87 = arith.constant 0 : index
    %c0_88 = arith.constant 0 : index
    %81 = vector.load %arg10[%c0_86, %c0_87, %c0_88] : memref<4x8x32xf32, #tpu.memory_space<vmem>>, vector<1x8x32xf32>
    %82 = vector.shape_cast %81 : vector<1x8x32xf32> to vector<8x32xf32>
    %cst_89 = arith.constant dense<0.000000e+00> : vector<8x64xf32>
    %83 = tpu.matmul %82, %80, %cst_89 {dimension_numbers = #tpu.dot_dimension_numbers<[1], [0], [0], [1], [0, 0, 1, 1], [], []>} : vector<8x32xf32>, vector<32x64xf32>, vector<8x64xf32> -> vector<8x64xf32>
    %c0_90 = arith.constant 0 : index
    %c0_91 = arith.constant 0 : index
    %c0_92 = arith.constant 0 : index
    %84 = vector.load %arg11[%c0_90, %c0_91, %c0_92] : memref<4x64x120xf32, #tpu.memory_space<vmem>>, vector<1x64x120xf32>
    %85 = vector.shape_cast %84 : vector<1x64x120xf32> to vector<64x120xf32>
    %cst_93 = arith.constant dense<0.000000e+00> : vector<8x120xf32>
    %86 = tpu.matmul %83, %85, %cst_93 {dimension_numbers = #tpu.dot_dimension_numbers<[1], [0], [0], [1], [0, 0, 1, 1], [], []>} : vector<8x64xf32>, vector<64x120xf32>, vector<8x120xf32> -> vector<8x120xf32>
    %c1_94 = arith.constant 1 : index
    %c0_95 = arith.constant 0 : index
    %c0_96 = arith.constant 0 : index
    %87 = vector.load %arg10[%c1_94, %c0_95, %c0_96] : memref<4x8x32xf32, #tpu.memory_space<vmem>>, vector<1x8x32xf32>
    %88 = vector.shape_cast %87 : vector<1x8x32xf32> to vector<8x32xf32>
    %cst_97 = arith.constant dense<0.000000e+00> : vector<8x64xf32>
    %89 = tpu.matmul %88, %80, %cst_97 {dimension_numbers = #tpu.dot_dimension_numbers<[1], [0], [0], [1], [0, 0, 1, 1], [], []>} : vector<8x32xf32>, vector<32x64xf32>, vector<8x64xf32> -> vector<8x64xf32>
    %c1_98 = arith.constant 1 : index
    %c0_99 = arith.constant 0 : index
    %c0_100 = arith.constant 0 : index
    %90 = vector.load %arg11[%c1_98, %c0_99, %c0_100] : memref<4x64x120xf32, #tpu.memory_space<vmem>>, vector<1x64x120xf32>
    %91 = vector.shape_cast %90 : vector<1x64x120xf32> to vector<64x120xf32>
    %cst_101 = arith.constant dense<0.000000e+00> : vector<8x120xf32>
    %92 = tpu.matmul %89, %91, %cst_101 {dimension_numbers = #tpu.dot_dimension_numbers<[1], [0], [0], [1], [0, 0, 1, 1], [], []>} : vector<8x64xf32>, vector<64x120xf32>, vector<8x120xf32> -> vector<8x120xf32>
    %93 = arith.addf %86, %92 : vector<8x120xf32>
    %c2_102 = arith.constant 2 : index
    %c0_103 = arith.constant 0 : index
    %c0_104 = arith.constant 0 : index
    %94 = vector.load %arg10[%c2_102, %c0_103, %c0_104] : memref<4x8x32xf32, #tpu.memory_space<vmem>>, vector<1x8x32xf32>
    %95 = vector.shape_cast %94 : vector<1x8x32xf32> to vector<8x32xf32>
    %cst_105 = arith.constant dense<0.000000e+00> : vector<8x64xf32>
    %96 = tpu.matmul %95, %80, %cst_105 {dimension_numbers = #tpu.dot_dimension_numbers<[1], [0], [0], [1], [0, 0, 1, 1], [], []>} : vector<8x32xf32>, vector<32x64xf32>, vector<8x64xf32> -> vector<8x64xf32>
    %c2_106 = arith.constant 2 : index
    %c0_107 = arith.constant 0 : index
    %c0_108 = arith.constant 0 : index
    %97 = vector.load %arg11[%c2_106, %c0_107, %c0_108] : memref<4x64x120xf32, #tpu.memory_space<vmem>>, vector<1x64x120xf32>
    %98 = vector.shape_cast %97 : vector<1x64x120xf32> to vector<64x120xf32>
    %cst_109 = arith.constant dense<0.000000e+00> : vector<8x120xf32>
    %99 = tpu.matmul %96, %98, %cst_109 {dimension_numbers = #tpu.dot_dimension_numbers<[1], [0], [0], [1], [0, 0, 1, 1], [], []>} : vector<8x64xf32>, vector<64x120xf32>, vector<8x120xf32> -> vector<8x120xf32>
    %100 = arith.addf %93, %99 : vector<8x120xf32>
    %c3_110 = arith.constant 3 : index
    %c0_111 = arith.constant 0 : index
    %c0_112 = arith.constant 0 : index
    %101 = vector.load %arg10[%c3_110, %c0_111, %c0_112] : memref<4x8x32xf32, #tpu.memory_space<vmem>>, vector<1x8x32xf32>
    %102 = vector.shape_cast %101 : vector<1x8x32xf32> to vector<8x32xf32>
    %cst_113 = arith.constant dense<0.000000e+00> : vector<8x64xf32>
    %103 = tpu.matmul %102, %80, %cst_113 {dimension_numbers = #tpu.dot_dimension_numbers<[1], [0], [0], [1], [0, 0, 1, 1], [], []>} : vector<8x32xf32>, vector<32x64xf32>, vector<8x64xf32> -> vector<8x64xf32>
    %c3_114 = arith.constant 3 : index
    %c0_115 = arith.constant 0 : index
    %c0_116 = arith.constant 0 : index
    %104 = vector.load %arg11[%c3_114, %c0_115, %c0_116] : memref<4x64x120xf32, #tpu.memory_space<vmem>>, vector<1x64x120xf32>
    %105 = vector.shape_cast %104 : vector<1x64x120xf32> to vector<64x120xf32>
    %cst_117 = arith.constant dense<0.000000e+00> : vector<8x120xf32>
    %106 = tpu.matmul %103, %105, %cst_117 {dimension_numbers = #tpu.dot_dimension_numbers<[1], [0], [0], [1], [0, 0, 1, 1], [], []>} : vector<8x64xf32>, vector<64x120xf32>, vector<8x120xf32> -> vector<8x120xf32>
    %107 = arith.addf %100, %106 : vector<8x120xf32>
    %c0_118 = arith.constant 0 : index
    %c0_119 = arith.constant 0 : index
    %108 = vector.load %arg12[%c0_118, %c0_119] : memref<1x120xf32, #tpu.memory_space<vmem>>, vector<1x120xf32>
    %109 = vector.broadcast %108 : vector<1x120xf32> to vector<8x120xf32>
    %110 = arith.addf %107, %109 : vector<8x120xf32>
    %cst_120 = arith.constant 0.000000e+00 : f32
    %111 = vector.broadcast %cst_120 : f32 to vector<8x120xf32>
    %112 = arith.maximumf %110, %111 : vector<8x120xf32>
    %c0_121 = arith.constant 0 : index
    %c0_122 = arith.constant 0 : index
    %113 = vector.load %arg13[%c0_121, %c0_122] : memref<120x84xf32, #tpu.memory_space<vmem>>, vector<120x84xf32>
    %cst_123 = arith.constant dense<0.000000e+00> : vector<8x84xf32>
    %114 = tpu.matmul %112, %113, %cst_123 {dimension_numbers = #tpu.dot_dimension_numbers<[1], [0], [0], [1], [0, 0, 1, 1], [], []>} : vector<8x120xf32>, vector<120x84xf32>, vector<8x84xf32> -> vector<8x84xf32>
    %c0_124 = arith.constant 0 : index
    %c0_125 = arith.constant 0 : index
    %115 = vector.load %arg14[%c0_124, %c0_125] : memref<1x84xf32, #tpu.memory_space<vmem>>, vector<1x84xf32>
    %116 = vector.broadcast %115 : vector<1x84xf32> to vector<8x84xf32>
    %117 = arith.addf %114, %116 : vector<8x84xf32>
    %cst_126 = arith.constant 0.000000e+00 : f32
    %118 = vector.broadcast %cst_126 : f32 to vector<8x84xf32>
    %119 = arith.maximumf %117, %118 : vector<8x84xf32>
    %c0_127 = arith.constant 0 : index
    %c0_128 = arith.constant 0 : index
    %120 = vector.load %arg15[%c0_127, %c0_128] : memref<84x128xf32, #tpu.memory_space<vmem>>, vector<84x128xf32>
    %cst_129 = arith.constant dense<0.000000e+00> : vector<8x128xf32>
    %121 = tpu.matmul %119, %120, %cst_129 {dimension_numbers = #tpu.dot_dimension_numbers<[1], [0], [0], [1], [0, 0, 1, 1], [], []>} : vector<8x84xf32>, vector<84x128xf32>, vector<8x128xf32> -> vector<8x128xf32>
    %c0_130 = arith.constant 0 : index
    %c0_131 = arith.constant 0 : index
    %122 = vector.load %arg16[%c0_130, %c0_131] : memref<1x128xf32, #tpu.memory_space<vmem>>, vector<1x128xf32>
    %123 = vector.broadcast %122 : vector<1x128xf32> to vector<8x128xf32>
    %124 = arith.addf %121, %123 : vector<8x128xf32>
    %c0_132 = arith.constant 0 : index
    %c0_133 = arith.constant 0 : index
    %125 = vector.load %arg17[%c0_132, %c0_133] : memref<8x128xf32, #tpu.memory_space<vmem>>, vector<8x128xf32>
    tpu.vector_store %arg17[%c0_132, %c0_133], %124 {strides = array<i32>} : memref<8x128xf32, #tpu.memory_space<vmem>>, vector<8x128xf32>,
    return
  }
  func.func @transform_0(%arg0: i32) -> (i32, i32) {
    %c0_i32 = arith.constant 0 : i32
    %c0_i32_0 = arith.constant 0 : i32
    return %arg0, %c0_i32 : i32, i32
  }
  func.func @transform_1(%arg0: i32) -> (i32, i32, i32) {
    %c0_i32 = arith.constant 0 : i32
    %c0_i32_0 = arith.constant 0 : i32
    %c0_i32_1 = arith.constant 0 : i32
    %c0_i32_2 = arith.constant 0 : i32
    return %c0_i32, %c0_i32_0, %c0_i32_1 : i32, i32, i32
  }
  func.func @transform_2(%arg0: i32) -> (i32, i32, i32) {
    %c0_i32 = arith.constant 0 : i32
    %c0_i32_0 = arith.constant 0 : i32
    %c0_i32_1 = arith.constant 0 : i32
    %c0_i32_2 = arith.constant 0 : i32
    return %c0_i32, %c0_i32_0, %c0_i32_1 : i32, i32, i32
  }
  func.func @transform_3(%arg0: i32) -> (i32, i32) {
    %c0_i32 = arith.constant 0 : i32
    %c0_i32_0 = arith.constant 0 : i32
    %c0_i32_1 = arith.constant 0 : i32
    return %c0_i32, %c0_i32_0 : i32, i32
  }
  func.func @transform_4(%arg0: i32) -> (i32, i32) {
    %c0_i32 = arith.constant 0 : i32
    %c0_i32_0 = arith.constant 0 : i32
    %c0_i32_1 = arith.constant 0 : i32
    return %c0_i32, %c0_i32_0 : i32, i32
  }
  func.func @transform_5(%arg0: i32) -> (i32, i32, i32) {
    %c0_i32 = arith.constant 0 : i32
    %c0_i32_0 = arith.constant 0 : i32
    %c0_i32_1 = arith.constant 0 : i32
    %c0_i32_2 = arith.constant 0 : i32
    return %c0_i32, %c0_i32_0, %c0_i32_1 : i32, i32, i32
  }
  func.func @transform_6(%arg0: i32) -> (i32, i32, i32) {
    %c0_i32 = arith.constant 0 : i32
    %c0_i32_0 = arith.constant 0 : i32
    %c0_i32_1 = arith.constant 0 : i32
    %c0_i32_2 = arith.constant 0 : i32
    return %c0_i32, %c0_i32_0, %c0_i32_1 : i32, i32, i32
  }
  func.func @transform_7(%arg0: i32) -> (i32, i32) {
    %c0_i32 = arith.constant 0 : i32
    %c0_i32_0 = arith.constant 0 : i32
    %c0_i32_1 = arith.constant 0 : i32
    return %c0_i32, %c0_i32_0 : i32, i32
  }
  func.func @transform_8(%arg0: i32) -> (i32, i32) {
    %c0_i32 = arith.constant 0 : i32
    %c0_i32_0 = arith.constant 0 : i32
    %c0_i32_1 = arith.constant 0 : i32
    return %c0_i32, %c0_i32_0 : i32, i32
  }
  func.func @transform_9(%arg0: i32) -> (i32, i32, i32) {
    %c0_i32 = arith.constant 0 : i32
    %c0_i32_0 = arith.constant 0 : i32
    %c0_i32_1 = arith.constant 0 : i32
    %c0_i32_2 = arith.constant 0 : i32
    return %c0_i32, %c0_i32_0, %c0_i32_1 : i32, i32, i32
  }
  func.func @transform_10(%arg0: i32) -> (i32, i32, i32) {
    %c0_i32 = arith.constant 0 : i32
    %c0_i32_0 = arith.constant 0 : i32
    %c0_i32_1 = arith.constant 0 : i32
    %c0_i32_2 = arith.constant 0 : i32
    return %c0_i32, %c0_i32_0, %c0_i32_1 : i32, i32, i32
  }
  func.func @transform_11(%arg0: i32) -> (i32, i32) {
    %c0_i32 = arith.constant 0 : i32
    %c0_i32_0 = arith.constant 0 : i32
    %c0_i32_1 = arith.constant 0 : i32
    return %c0_i32, %c0_i32_0 : i32, i32
  }
  func.func @transform_12(%arg0: i32) -> (i32, i32) {
    %c0_i32 = arith.constant 0 : i32
    %c0_i32_0 = arith.constant 0 : i32
    %c0_i32_1 = arith.constant 0 : i32
    return %c0_i32, %c0_i32_0 : i32, i32
  }
  func.func @transform_13(%arg0: i32) -> (i32, i32) {
    %c0_i32 = arith.constant 0 : i32
    %c0_i32_0 = arith.constant 0 : i32
    %c0_i32_1 = arith.constant 0 : i32
    return %c0_i32, %c0_i32_0 : i32, i32
  }
  func.func @transform_14(%arg0: i32) -> (i32, i32) {
    %c0_i32 = arith.constant 0 : i32
    %c0_i32_0 = arith.constant 0 : i32
    %c0_i32_1 = arith.constant 0 : i32
    return %c0_i32, %c0_i32_0 : i32, i32
  }
  func.func @transform_15(%arg0: i32) -> (i32, i32) {
    %c0_i32 = arith.constant 0 : i32
    %c0_i32_0 = arith.constant 0 : i32
    %c0_i32_1 = arith.constant 0 : i32
    return %c0_i32, %c0_i32_0 : i32, i32
  }
  func.func @transform_16(%arg0: i32) -> (i32, i32) {
    %c0_i32 = arith.constant 0 : i32
    %c0_i32_0 = arith.constant 0 : i32
    return %arg0, %c0_i32 : i32, i32
  }
}

</mosaic_0001>

<bundles_post_ra>
// kernel: forward.1
= control target key start
LH: loop header
LB: loop body
LE: loop exit
PB: predicated region body
PF: predicated region fallthrough
CT: control target
= control target key end

     0   :  { %s9561_s0 = inlined_call_operand.vmem [shape: f32[224,28], index: 0, kind: input, shape index: {}]   ;;  %s9562_s1 = inlined_call_operand.hbm [shape: f32[5,192,224], index: 1, kind: input, shape index: {}]   ;;  %s9563_s2 = inlined_call_operand.hbm [shape: f32[5,28,72], index: 2, kind: input, shape index: {}]   ;;  %s9564_s3 = inlined_call_operand.vmem [shape: f32[1,72], index: 3, kind: input, shape index: {}]   ;;  %s9565_s4 = inlined_call_operand.vmem [shape: f32[96,192], index: 4, kind: input, shape index: {}]   ;;  %s9566_s5 = inlined_call_operand.hbm [shape: f32[5,64,96], index: 5, kind: input, shape index: {}]   ;;  %s9567_s6 = inlined_call_operand.vmem [shape: f32[5,72,64], index: 6, kind: input, shape index: {}]   ;;  %s9568_s7 = inlined_call_operand.vmem [shape: f32[1,64], index: 7, kind: input, shape index: {}]   ;;  %s9569_s8 = inlined_call_operand.hbm [shape: f32[32,64], index: 8, kind: input, shape index: {}]   ;;  %s9570_s9 = inlined_call_operand.hbm [shape: f32[4,8,32], index: 9, kind: input, shape index: {}]   ;;  %s9571_s10 = inlined_call_operand.hbm [shape: f32[4,64,120], index: 10, kind: input, shape index: {}]   ;;  %s9572_s11 = inlined_call_operand.vmem [shape: f32[1,120], index: 11, kind: input, shape index: {}]   ;;  %s9573_s12 = inlined_call_operand.hbm [shape: f32[120,84], index: 12, kind: input, shape index: {}]   ;;  %s9574_s13 = inlined_call_operand.vmem [shape: f32[1,84], index: 13, kind: input, shape index: {}]   ;;  %s9575_s14 = inlined_call_operand.hbm [shape: f32[84,128], index: 14, kind: input, shape index: {}]   ;;  %s9576_s15 = inlined_call_operand.vmem [shape: f32[1,128], index: 15, kind: input, shape index: {}]   ;;  %s9577_s16 = inlined_call_operand.vmem [shape: f32[8,128], index: 16, kind: output, shape index: {}]  }
   0x1   :  { %9579 = sst [smem:[#allocation20_spill]] %s9561_s0 }
   0x2   :  { %9580 = sst [smem:[#allocation21_spill]] %s9577_s16 }
   0x3   :  { %21 = vsyncpa [#allocation3], 0 }
   0x4   :  { %22 = vsyncpa [#allocation5], 0 }
   0x5   :  { %23 = vsyncpa [#allocation8], 0 }
   0x6   :  { %24 = vsyncpa [#allocation11], 0 }
   0x7   :  { %25 = vsyncpa [#allocation14], 0  ;;  %s8197_s21 = smov [#allocation4]   ;;  %s8011_s25 = scalar_lea.hbm %s9563_s2, 2560 }
   0x8   :  { %s45_s22 = sshll.u32 %s8197_s21, 4  ;;  %p8012_p0 = scmp.ne.s32.totalorder %s9563_s2, %s8011_s25  ;;  %s46_s22 = int_to_ptr.vmem [resolvable:$true] %s45_s22 }
   0x9   :  { %p8015_p1 = scmp.lt.u32.totalorder %s8011_s25, %s9563_s2 }
   0xb   :  { %p8017_p2 = pnand %p8015_p1, %p8012_p0 }
   0xd   :  { %8020 = shalt.err (!%p8017_p2)
}
   0xe   :  { %s8021_s30 = scalar_lea.vmem %s46_s22, 2560  ;;  %p8026_p4 = scmp.lt.s32.totalorder %s46_s22, %s46_s22 }
   0xf   :  { %p8022_p3 = scmp.ne.s32.totalorder %s46_s22, %s8021_s30  ;;  %p8027_p5 = scmp.lt.s32.totalorder %s8021_s30, %s8021_s30 }
  0x11   :  { %p8028_p6 = por %p8027_p5, %p8026_p4 }
  0x13   :  { %p8029_p7 = pnand %p8028_p6, %p8022_p3 }
  0x15   :  { %8032 = shalt.err (!%p8029_p7)
}
  0x16   :  { %s8198_s0 = smov 128   ;;  %s8199_s17 = smov 8  }
  0x17   :  { %51 = dma.hbm_to_vmem [thread:$0]  %s9563_s2, 2560, %s46_s22, [#allocation5], %s8198_s0, %s8198_s0, %s8199_s17  }
  0x18   :  { %s8200_s20 = smov [#allocation7]   ;;  %s8201_s23 = smov [#allocation10]  }
  0x19   :  { %s77_s21 = sshll.u32 %s8200_s20, 4  ;;  %s101_s24 = sshll.u32 %s8201_s23, 4  ;;  %s78_s21 = int_to_ptr.vmem [resolvable:$true] %s77_s21  ;;  %s102_s24 = int_to_ptr.vmem [resolvable:$true] %s101_s24 }
  0x1a   :  { %s8033_s27 = scalar_lea.hbm %s9569_s8, 512 }
  0x1b   :  { %p8034_p8 = scmp.ne.s32.totalorder %s9569_s8, %s8033_s27  ;;  %p8037_p9 = scmp.lt.u32.totalorder %s8033_s27, %s9569_s8 }
  0x1d   :  { %p8039_p10 = pnand %p8037_p9, %p8034_p8 }
  0x1f   :  { %8042 = shalt.err (!%p8039_p10)
}
  0x20   :  { %s8043_s2 = scalar_lea.vmem %s78_s21, 512  ;;  %p8048_p12 = scmp.lt.s32.totalorder %s78_s21, %s78_s21 }
  0x21   :  { %p8044_p11 = scmp.ne.s32.totalorder %s78_s21, %s8043_s2  ;;  %p8049_p13 = scmp.lt.s32.totalorder %s8043_s2, %s8043_s2 }
  0x23   :  { %p8050_p0 = por %p8049_p13, %p8048_p12 }
  0x25   :  { %p8051_p1 = pnand %p8050_p0, %p8044_p11 }
  0x27   :  { %8054 = shalt.err (!%p8051_p1)
}
  0x28   :  { %83 = dma.hbm_to_vmem [thread:$0]  %s9569_s8, 512, %s78_s21, [#allocation8], %s8198_s0, %s8198_s0, %s8199_s17  }
  0x29   :  { %s8055_s20 = scalar_lea.hbm %s9571_s10, 4096 }
  0x2a   :  { %p8056_p2 = scmp.ne.s32.totalorder %s9571_s10, %s8055_s20  ;;  %p8059_p3 = scmp.lt.u32.totalorder %s8055_s20, %s9571_s10 }
  0x2c   :  { %p8061_p4 = pnand %p8059_p3, %p8056_p2 }
  0x2e   :  { %8064 = shalt.err (!%p8061_p4)
}
  0x2f   :  { %s8065_s28 = scalar_lea.vmem %s102_s24, 4096  ;;  %p8070_p6 = scmp.lt.s32.totalorder %s102_s24, %s102_s24 }
  0x30   :  { %p8066_p5 = scmp.ne.s32.totalorder %s102_s24, %s8065_s28  ;;  %p8071_p7 = scmp.lt.s32.totalorder %s8065_s28, %s8065_s28 }
  0x32   :  { %p8072_p8 = por %p8071_p7, %p8070_p6 }
  0x34   :  { %p8073_p9 = pnand %p8072_p8, %p8066_p5 }
  0x36   :  { %8076 = shalt.err (!%p8073_p9)
}
  0x37   :  { %107 = dma.hbm_to_vmem [thread:$0]  %s9571_s10, 4096, %s102_s24, [#allocation11], %s8198_s0, %s8198_s0, %s8199_s17  }
  0x38   :  { %s8202_s29 = smov [#allocation2]   ;;  %s8077_s18 = scalar_lea.hbm %s9562_s1, 30720 }
  0x39   :  { %s33_s30 = sshll.u32 %s8202_s29, 4  ;;  %p8078_p10 = scmp.ne.s32.totalorder %s9562_s1, %s8077_s18  ;;  %s34_s30 = int_to_ptr.vmem [resolvable:$true] %s33_s30 }
  0x3a   :  { %p8081_p11 = scmp.lt.u32.totalorder %s8077_s18, %s9562_s1 }
  0x3c   :  { %p8083_p12 = pnand %p8081_p11, %p8078_p10 }
  0x3e   :  { %8086 = shalt.err (!%p8083_p12)
}
  0x3f   :  { %s8087_s25 = scalar_lea.vmem %s34_s30, 30720  ;;  %p8092_p0 = scmp.lt.s32.totalorder %s34_s30, %s34_s30 }
  0x40   :  { %p8088_p13 = scmp.ne.s32.totalorder %s34_s30, %s8087_s25  ;;  %p8093_p1 = scmp.lt.s32.totalorder %s8087_s25, %s8087_s25 }
  0x42   :  { %p8094_p2 = por %p8093_p1, %p8092_p0 }
  0x44   :  { %p8095_p3 = pnand %p8094_p2, %p8088_p13 }
  0x46   :  { %8098 = shalt.err (!%p8095_p3)
}
  0x47   :  { %s8203_s10 = smov 256   ;;  %s8204_s24 = smov 16  }
  0x48   :  { %39 = dma.hbm_to_vmem [thread:$0]  %s9562_s1, 30720, %s34_s30, [#allocation3], %s8203_s10, %s8203_s10, %s8204_s24  }
  0x49   :  { %s8205_s28 = smov [#allocation6]   ;;  %s8206_s21 = smov [#allocation9]  }
  0x4a   :  { %s61_s8 = sshll.u32 %s8205_s28, 4  ;;  %s89_s29 = sshll.u32 %s8206_s21, 4  ;;  %s62_s8 = int_to_ptr.vmem [resolvable:$true] %s61_s8  ;;  %s8355_s29 = int_to_ptr.vmem [resolvable:$true] %s89_s29 }
  0x4b   :  { %s8099_s18 = scalar_lea.hbm %s9566_s5, 5120 }
  0x4c   :  { %p8100_p4 = scmp.ne.s32.totalorder %s9566_s5, %s8099_s18  ;;  %p8103_p5 = scmp.lt.u32.totalorder %s8099_s18, %s9566_s5 }
  0x4e   :  { %p8105_p6 = pnand %p8103_p5, %p8100_p4 }
  0x50   :  { %8108 = shalt.err (!%p8105_p6)
}
  0x51   :  { %s8109_s1 = scalar_lea.vmem %s62_s8, 5120  ;;  %p8114_p8 = scmp.lt.s32.totalorder %s62_s8, %s62_s8 }
  0x52   :  { %p8110_p7 = scmp.ne.s32.totalorder %s62_s8, %s8109_s1  ;;  %p8115_p9 = scmp.lt.s32.totalorder %s8109_s1, %s8109_s1 }
  0x54   :  { %p8116_p10 = por %p8115_p9, %p8114_p8 }
  0x56   :  { %p8117_p11 = pnand %p8116_p10, %p8110_p7 }
  0x58   :  { %8120 = shalt.err (!%p8117_p11)
}
  0x59   :  { %67 = dma.hbm_to_vmem [thread:$0]  %s9566_s5, 5120, %s62_s8, [#allocation5], %s8198_s0, %s8198_s0, %s8199_s17  }
  0x5a   :  { %s8121_s26 = scalar_lea.hbm %s9570_s9, 512 }
  0x5b   :  { %p8122_p12 = scmp.ne.s32.totalorder %s9570_s9, %s8121_s26  ;;  %p8125_p13 = scmp.lt.u32.totalorder %s8121_s26, %s9570_s9 }
  0x5d   :  { %p8127_p0 = pnand %p8125_p13, %p8122_p12 }
  0x5f   :  { %8130 = shalt.err (!%p8127_p0)
}
  0x60   :  { %s8131_s22 = scalar_lea.vmem %s8355_s29, 512  ;;  %p8136_p2 = scmp.lt.s32.totalorder %s8355_s29, %s8355_s29 }
  0x61   :  { %p8132_p1 = scmp.ne.s32.totalorder %s8355_s29, %s8131_s22  ;;  %p8137_p3 = scmp.lt.s32.totalorder %s8131_s22, %s8131_s22 }
  0x63   :  { %p8138_p4 = por %p8137_p3, %p8136_p2 }
  0x65   :  { %p8139_p5 = pnand %p8138_p4, %p8132_p1 }
  0x67   :  { %8142 = shalt.err (!%p8139_p5)
}
  0x68   :  { %95 = dma.hbm_to_vmem [thread:$0]  %s9570_s9, 512, %s8355_s29, [#allocation8], %s8198_s0, %s8198_s0, %s8199_s17  }
  0x69   :  { %s8207_s18 = smov [#allocation12]   ;;  %s8208_s16 = smov [#allocation13]  }
  0x6a   :  { %s115_s19 = sshll.u32 %s8207_s18, 4  ;;  %s129_s20 = sshll.u32 %s8208_s16, 4  ;;  %s116_s19 = int_to_ptr.vmem [resolvable:$true] %s115_s19  ;;  %s8392_s20 = int_to_ptr.vmem [resolvable:$true] %s129_s20 }
  0x6b   :  { %s8143_s30 = scalar_lea.hbm %s9573_s12, 1920 }
  0x6c   :  { %p8144_p6 = scmp.ne.s32.totalorder %s9573_s12, %s8143_s30  ;;  %p8147_p7 = scmp.lt.u32.totalorder %s8143_s30, %s9573_s12 }
  0x6e   :  { %p8149_p8 = pnand %p8147_p7, %p8144_p6 }
  0x70   :  { %8152 = shalt.err (!%p8149_p8)
}
  0x71   :  { %s8153_s9 = scalar_lea.vmem %s116_s19, 1920  ;;  %p8158_p10 = scmp.lt.s32.totalorder %s116_s19, %s116_s19 }
  0x72   :  { %p8154_p9 = scmp.ne.s32.totalorder %s116_s19, %s8153_s9  ;;  %p8159_p11 = scmp.lt.s32.totalorder %s8153_s9, %s8153_s9 }
  0x74   :  { %p8160_p12 = por %p8159_p11, %p8158_p10 }
  0x76   :  { %p8161_p13 = pnand %p8160_p12, %p8154_p9 }
  0x78   :  { %8164 = shalt.err (!%p8161_p13)
}
  0x79   :  { %121 = dma.hbm_to_vmem [thread:$0]  %s9573_s12, 1920, %s116_s19, [#allocation11], %s8198_s0, %s8198_s0, %s8199_s17  }
  0x7a   :  { %s8165_s2 = scalar_lea.hbm %s9575_s14, 1408 }
  0x7b   :  { %p8166_p0 = scmp.ne.s32.totalorder %s9575_s14, %s8165_s2  ;;  %p8169_p1 = scmp.lt.u32.totalorder %s8165_s2, %s9575_s14 }
  0x7d   :  { %p8171_p2 = pnand %p8169_p1, %p8166_p0 }
  0x7f   :  { %8174 = shalt.err (!%p8171_p2)
}
  0x80   :  { %s8175_s16 = scalar_lea.vmem %s8392_s20, 1408  ;;  %p8180_p4 = scmp.lt.s32.totalorder %s8392_s20, %s8392_s20 }
  0x81   :  { %p8176_p3 = scmp.ne.s32.totalorder %s8392_s20, %s8175_s16  ;;  %p8181_p5 = scmp.lt.s32.totalorder %s8175_s16, %s8175_s16 }
  0x83   :  { %p8182_p6 = por %p8181_p5, %p8180_p4 }
  0x85   :  { %p8183_p7 = pnand %p8182_p6, %p8176_p3 }
  0x87   :  { %8186 = shalt.err (!%p8183_p7)
}
  0x88   :  { %135 = dma.hbm_to_vmem [thread:$0]  %s9575_s14, 1408, %s8392_s20, [#allocation14], %s8198_s0, %s8198_s0, %s8199_s17  }
  0x89   :  { %8187 = dma.done.wait [#allocation3], 30720  }
  0x8a   :  { %8188 = vsyncadd [#allocation3], 4294936576 }
  0x8b   :  { %8189 = dma.done.wait [#allocation5], 7680  }
  0x8c   :  { %8190 = vsyncadd [#allocation5], 4294959616 }
  0x8d   :  { %8191 = dma.done.wait [#allocation8], 1024  }
  0x8e   :  { %8192 = vsyncadd [#allocation8], 4294966272 }
  0x8f   :  { %8193 = dma.done.wait [#allocation11], 6016  }
  0x90   :  { %8194 = vsyncadd [#allocation11], 4294961280 }
  0x91   :  { %8195 = dma.done.wait [#allocation14], 1408  }
  0x92   :  { %8196 = vsyncadd [#allocation14], 4294965888  ;;  %v8209_v0 = vmov 0.0|0.0   ;;  %s9581_s30 = sld [smem:[#allocation20_spill]]  ;;  %vm238_vm0 = vcmask 785408   ;;  %v502_v12 = vld [vmem:[#allocation2 + $0x188] sm:$0xff] }
  0x93   :  { %7289 = vmatprep.subr.bf16.mxu1 %v8209_v0  ;;  %7247 = vmatprep.subr.bf16.mxu0 %v8209_v0  ;;  %v191_v19 = vld [vmem:[#allocation2 + $0x8] sm:$0xff]  ;;  %v501_v45 = vld [vmem:[#allocation2 + $0x180] sm:$0xff]  ;;  %v504_v47 = vld [vmem:[#allocation2 + $0x198] sm:$0xff]  ;;  %vm884_vm1 = vcmask 1043456   ;;  %vm8210_vm2 = vmmov 1   ;;  %vm811_vm4 = vcmask 228352  }
  0x94   :  { %5707 = vmatprep.mubr.msk.f32.mxu1 %vm238_vm0, %v502_v12  ;;  %5683 = vmatprep.mubr.msk.f32.mxu0 %vm238_vm0, %v191_v19  ;;  %v190_v46 = vld [vmem:[#allocation2] sm:$0xff]  ;;  %v193_v48 = vld [vmem:[#allocation2 + $0x18] sm:$0xff]  ;;  %v503_v49 = vld [vmem:[#allocation2 + $0x190] sm:$0xff]  ;;  %vm3149_vm5 = vcmask 523264   ;;  %vm3617_vm6 = vcmask 588800   ;;  %vm8211_vm7 = vmmov 0  }
  0x95   :  { %v192_v50 = vld [vmem:[#allocation2 + $0x10] sm:$0xff]  ;;  %v506_v51 = vld [vmem:[#allocation2 + $0x1a8] sm:$0xff]  ;;  %v505_v53 = vld [vmem:[#allocation2 + $0x1a0] sm:$0xff]  ;;  %vm4844_vm8 = vcmask 261120   ;;  %vm5503_vm9 = vcmask 982016   ;;  %vm5596_vm10 = vcmask 687104  }
  0x96   :  { %v195_v52 = vld [vmem:[#allocation2 + $0x28] sm:$0xff]  ;;  %v194_v54 = vld [vmem:[#allocation2 + $0x20] sm:$0xff]  ;;  %v508_v55 = vld [vmem:[#allocation2 + $0x1b8] sm:$0xff]  ;;  %s9584_s20 = sld [smem:[#allocation21_spill]] }
  0x97   :  { %v197_v56 = vld [vmem:[#allocation2 + $0x38] sm:$0xff]  ;;  %v507_v57 = vld [vmem:[#allocation2 + $0x1b0] sm:$0xff]  ;;  %v510_v59 = vld [vmem:[#allocation2 + $0x1c8] sm:$0xff] }
  0x98   :  { %v162_v1 = vld [vmem:[%s9581_s30] sm:$0xff]  ;;  %v163_v2 = vld [vmem:[%s9581_s30 + $0x8] sm:$0xff]  ;;  %v164_v3 = vld [vmem:[%s9581_s30 + $0x10] sm:$0xff] }
  0x99   :  { %v8440_v4 = vpack.c.bf16 %v163_v2, %v162_v1  ;;  %v165_v5 = vld [vmem:[%s9581_s30 + $0x18] sm:$0xff]  ;;  %v166_v7 = vld [vmem:[%s9581_s30 + $0x20] sm:$0xff]  ;;  %v167_v8 = vld [vmem:[%s9581_s30 + $0x28] sm:$0xff] }
  0x9a   :  { %v8446_v6 = vpack.c.bf16 %v165_v5, %v164_v3  ;;  %v8458_v9 = vpack.c.bf16 %v167_v8, %v166_v7  ;;  %v168_v10 = vld [vmem:[%s9581_s30 + $0x30] sm:$0xff]  ;;  %v169_v11 = vld [vmem:[%s9581_s30 + $0x38] sm:$0xff]  ;;  %v170_v14 = vld [vmem:[%s9581_s30 + $0x40] sm:$0xff] }
  0x9b   :  { %7291 = vmatpush1.bf16.msra.mxu1 %v8440_v4  ;;  %7249 = vmatpush1.bf16.msra.mxu0 %v8440_v4  ;;  %v8471_v13 = vpack.c.bf16 %v169_v11, %v168_v10  ;;  %v171_v15 = vld [vmem:[%s9581_s30 + $0x48] sm:$0xff]  ;;  %v172_v17 = vld [vmem:[%s9581_s30 + $0x50] sm:$0xff]  ;;  %v173_v18 = vld [vmem:[%s9581_s30 + $0x58] sm:$0xff] }
  0x9c   :  { %7292 = vmatprep.subr.bf16.mxu1 %v8209_v0  ;;  %7250 = vmatprep.subr.bf16.mxu0 %v8209_v0  ;;  %v8483_v16 = vpack.c.bf16 %v171_v15, %v170_v14  ;;  %v8496_v20 = vpack.c.bf16 %v173_v18, %v172_v17  ;;  %v174_v21 = vld [vmem:[%s9581_s30 + $0x60] sm:$0xff]  ;;  %v175_v22 = vld [vmem:[%s9581_s30 + $0x68] sm:$0xff]  ;;  %v176_v24 = vld [vmem:[%s9581_s30 + $0x70] sm:$0xff] }
  0x9d   :  { %v8508_v23 = vpack.c.bf16 %v175_v22, %v174_v21  ;;  %v177_v25 = vld [vmem:[%s9581_s30 + $0x78] sm:$0xff]  ;;  %v178_v27 = vld [vmem:[%s9581_s30 + $0x80] sm:$0xff]  ;;  %v179_v28 = vld [vmem:[%s9581_s30 + $0x88] sm:$0xff] }
  0x9e   :  { %v8520_v26 = vpack.c.bf16 %v177_v25, %v176_v24  ;;  %v8532_v29 = vpack.c.bf16 %v179_v28, %v178_v27  ;;  %v180_v30 = vld [vmem:[%s9581_s30 + $0x90] sm:$0xff]  ;;  %v181_v31 = vld [vmem:[%s9581_s30 + $0x98] sm:$0xff]  ;;  %v182_v33 = vld [vmem:[%s9581_s30 + $0xa0] sm:$0xff] }
  0x9f   :  { %7294 = vmatpush1.bf16.msra.mxu1 %v8446_v6  ;;  %7252 = vmatpush1.bf16.msra.mxu0 %v8446_v6  ;;  %v8544_v32 = vpack.c.bf16 %v181_v31, %v180_v30  ;;  %v183_v34 = vld [vmem:[%s9581_s30 + $0xa8] sm:$0xff]  ;;  %v184_v36 = vld [vmem:[%s9581_s30 + $0xb0] sm:$0xff]  ;;  %v185_v37 = vld [vmem:[%s9581_s30 + $0xb8] sm:$0xff] }
  0xa0   :  { %7295 = vmatprep.subr.bf16.mxu1 %v8209_v0  ;;  %7253 = vmatprep.subr.bf16.mxu0 %v8209_v0  ;;  %v8556_v35 = vpack.c.bf16 %v183_v34, %v182_v33  ;;  %v8568_v38 = vpack.c.bf16 %v185_v37, %v184_v36  ;;  %v186_v39 = vld [vmem:[%s9581_s30 + $0xc0] sm:$0xff]  ;;  %v187_v40 = vld [vmem:[%s9581_s30 + $0xc8] sm:$0xff]  ;;  %v188_v42 = vld [vmem:[%s9581_s30 + $0xd0] sm:$0xff] }
  0xa1   :  { %v8580_v41 = vpack.c.bf16 %v187_v40, %v186_v39  ;;  %v189_v43 = vld [vmem:[%s9581_s30 + $0xd8] sm:$0xff]  ;;  %v199_v60 = vld [vmem:[#allocation2 + $0x48] sm:$0xff]  ;;  %v509_v61 = vld [vmem:[#allocation2 + $0x1c0] sm:$0xff] }
  0xa2   :  { %v8592_v44 = vpack.c.bf16 %v189_v43, %v188_v42  ;;  %v196_v58 = vld [vmem:[#allocation2 + $0x30] sm:$0xff]  ;;  %v198_v62 = vld [vmem:[#allocation2 + $0x40] sm:$0xff]  ;;  %v512_v63 = vld [vmem:[#allocation2 + $0x1d8] sm:$0xff] }
  0xa3   :  { %7297 = vmatpush1.bf16.msra.mxu1 %v8458_v9  ;;  %7255 = vmatpush1.bf16.msra.mxu0 %v8458_v9  ;;  %v201_v1 = vld [vmem:[#allocation2 + $0x58] sm:$0xff]  ;;  %v511_v2 = vld [vmem:[#allocation2 + $0x1d0] sm:$0xff]  ;;  %v514_v5 = vld [vmem:[#allocation2 + $0x1e8] sm:$0xff] }
  0xa4   :  { %7298 = vmatprep.subr.bf16.mxu1 %v8209_v0  ;;  %7256 = vmatprep.subr.bf16.mxu0 %v8209_v0  ;;  %v200_v3 = vld [vmem:[#allocation2 + $0x50] sm:$0xff]  ;;  %v203_v7 = vld [vmem:[#allocation2 + $0x68] sm:$0xff]  ;;  %v513_v8 = vld [vmem:[#allocation2 + $0x1e0] sm:$0xff] }
  0xa5   :  { %v202_v10 = vld [vmem:[#allocation2 + $0x60] sm:$0xff]  ;;  %v516_v11 = vld [vmem:[#allocation2 + $0x1f8] sm:$0xff]  ;;  %v515_v14 = vld [vmem:[#allocation2 + $0x1f0] sm:$0xff] }
  0xa6   :  { %v205_v12 = vld [vmem:[#allocation2 + $0x78] sm:$0xff]  ;;  %v204_v15 = vld [vmem:[#allocation2 + $0x70] sm:$0xff]  ;;  %v518_v17 = vld [vmem:[#allocation2 + $0x208] sm:$0xff] }
  0xa7   :  { %7300 = vmatpush1.bf16.msra.mxu1 %v8471_v13  ;;  %7258 = vmatpush1.bf16.msra.mxu0 %v8471_v13  ;;  %v207_v18 = vld [vmem:[#allocation2 + $0x88] sm:$0xff]  ;;  %v517_v19 = vld [vmem:[#allocation2 + $0x200] sm:$0xff]  ;;  %v520_v22 = vld [vmem:[#allocation2 + $0x218] sm:$0xff] }
  0xa8   :  { %7301 = vmatprep.subr.bf16.mxu1 %v8209_v0  ;;  %7259 = vmatprep.subr.bf16.mxu0 %v8209_v0  ;;  %v206_v21 = vld [vmem:[#allocation2 + $0x80] sm:$0xff]  ;;  %v209_v24 = vld [vmem:[#allocation2 + $0x98] sm:$0xff]  ;;  %v519_v25 = vld [vmem:[#allocation2 + $0x210] sm:$0xff] }
  0xa9   :  { %v208_v27 = vld [vmem:[#allocation2 + $0x90] sm:$0xff]  ;;  %v522_v28 = vld [vmem:[#allocation2 + $0x228] sm:$0xff]  ;;  %v521_v31 = vld [vmem:[#allocation2 + $0x220] sm:$0xff] }
  0xaa   :  { %v211_v30 = vld [vmem:[#allocation2 + $0xa8] sm:$0xff]  ;;  %v210_v33 = vld [vmem:[#allocation2 + $0xa0] sm:$0xff]  ;;  %v524_v34 = vld [vmem:[#allocation2 + $0x238] sm:$0xff] }
  0xab   :  { %7303 = vmatpush1.bf16.msra.mxu1 %v8483_v16  ;;  %7261 = vmatpush1.bf16.msra.mxu0 %v8483_v16  ;;  %v213_v36 = vld [vmem:[#allocation2 + $0xb8] sm:$0xff]  ;;  %v523_v37 = vld [vmem:[#allocation2 + $0x230] sm:$0xff]  ;;  %v526_v40 = vld [vmem:[#allocation2 + $0x248] sm:$0xff] }
  0xac   :  { %7304 = vmatprep.subr.bf16.mxu1 %v8209_v0  ;;  %7262 = vmatprep.subr.bf16.mxu0 %v8209_v0  ;;  %v212_v39 = vld [vmem:[#allocation2 + $0xb0] sm:$0xff]  ;;  %v215_v42 = vld [vmem:[#allocation2 + $0xc8] sm:$0xff]  ;;  %v525_v43 = vld [vmem:[#allocation2 + $0x240] sm:$0xff] }
  0xad   :  { %vm8671_vm3 = vmpackc.low %vm884_vm1, %vm8210_vm2 }
  0xaf   :  { %7306 = vmatpush1.bf16.msra.mxu1 %v8496_v20  ;;  %7264 = vmatpush1.bf16.msra.mxu0 %v8496_v20 }
  0xb0   :  { %7307 = vmatprep.subr.bf16.mxu1 %v8209_v0  ;;  %7265 = vmatprep.subr.bf16.mxu0 %v8209_v0 }
  0xb3   :  { %7309 = vmatpush1.bf16.msra.mxu1 %v8508_v23  ;;  %7267 = vmatpush1.bf16.msra.mxu0 %v8508_v23 }
  0xb4   :  { %7310 = vmatprep.subr.bf16.mxu1 %v8209_v0  ;;  %7268 = vmatprep.subr.bf16.mxu0 %v8209_v0 }
  0xb7   :  { %7312 = vmatpush1.bf16.msra.mxu1 %v8520_v26  ;;  %7270 = vmatpush1.bf16.msra.mxu0 %v8520_v26 }
  0xb8   :  { %7313 = vmatprep.subr.bf16.mxu1 %v8209_v0  ;;  %7271 = vmatprep.subr.bf16.mxu0 %v8209_v0 }
  0xbb   :  { %7315 = vmatpush1.bf16.msra.mxu1 %v8532_v29  ;;  %7273 = vmatpush1.bf16.msra.mxu0 %v8532_v29 }
  0xbc   :  { %7316 = vmatprep.subr.bf16.mxu1 %v8209_v0  ;;  %7274 = vmatprep.subr.bf16.mxu0 %v8209_v0 }
  0xbf   :  { %7318 = vmatpush1.bf16.msra.mxu1 %v8544_v32  ;;  %7276 = vmatpush1.bf16.msra.mxu0 %v8544_v32 }
  0xc0   :  { %7319 = vmatprep.subr.bf16.mxu1 %v8209_v0  ;;  %7277 = vmatprep.subr.bf16.mxu0 %v8209_v0 }
  0xc3   :  { %7321 = vmatpush1.bf16.msra.mxu1 %v8556_v35  ;;  %7279 = vmatpush1.bf16.msra.mxu0 %v8556_v35 }
  0xc4   :  { %7322 = vmatprep.subr.bf16.mxu1 %v8209_v0  ;;  %7280 = vmatprep.subr.bf16.mxu0 %v8209_v0 }
  0xc7   :  { %7324 = vmatpush1.bf16.msra.mxu1 %v8568_v38  ;;  %7282 = vmatpush1.bf16.msra.mxu0 %v8568_v38 }
  0xc8   :  { %7325 = vmatprep.subr.bf16.mxu1 %v8209_v0  ;;  %7283 = vmatprep.subr.bf16.mxu0 %v8209_v0 }
  0xcb   :  { %7327 = vmatpush1.bf16.msra.mxu1 %v8580_v41  ;;  %7285 = vmatpush1.bf16.msra.mxu0 %v8580_v41 }
  0xcc   :  { %7328 = vmatprep.subr.bf16.mxu1 %v8209_v0  ;;  %7286 = vmatprep.subr.bf16.mxu0 %v8209_v0 }
  0xcf   :  { %7330 = vmatpush1.bf16.msra.mxu1 %v8592_v44  ;;  %7288 = vmatpush1.bf16.msra.mxu0 %v8592_v44 }
  0xd0   :  { %7351 = vmatprep.subr.bf16.mxu1 %v8209_v0 }
  0xd2   :  { %686 = vmatmul.mubr.f32.vlgmr.msra.gmra.mrb[0].mxu1 %v501_v45  ;;  %376 = vmatmul.mubr.f32.vlgmr.msra.gmra.mrb[0].mxu0 %v190_v46  ;;  %v214_v45 = vld [vmem:[#allocation2 + $0xc0] sm:$0xff]  ;;  %v528_v46 = vld [vmem:[#allocation2 + $0x258] sm:$0xff] }
  0xd3   :  { %5708 = vmatprep.mubr.msk.f32.mxu1 %vm238_vm0, %v504_v47  ;;  %7353 = vmatpush1.bf16.msra.mxu1 %v8440_v4  ;;  %v217_v47 = vld [vmem:[#allocation2 + $0xd8] sm:$0xff] }
  0xd4   :  { %7354 = vmatprep.subr.bf16.mxu1 %v8209_v0  ;;  %5684 = vmatprep.mubr.msk.f32.mxu0 %vm238_vm0, %v193_v48  ;;  %v527_v48 = vld [vmem:[#allocation2 + $0x250] sm:$0xff] }
  0xd6   :  { %691 = vmatmul.mubr.f32.gmra.mrb[2].mxu1 %v503_v49  ;;  %381 = vmatmul.mubr.f32.gmra.mrb[2].mxu0 %v192_v50  ;;  %v216_v49 = vld [vmem:[#allocation2 + $0xd0] sm:$0xff]  ;;  %v530_v50 = vld [vmem:[#allocation2 + $0x268] sm:$0xff] }
  0xd7   :  { %5709 = vmatprep.mubr.msk.f32.mxu1 %vm238_vm0, %v506_v51  ;;  %7356 = vmatpush1.bf16.msra.mxu1 %v8446_v6  ;;  %v219_v51 = vld [vmem:[#allocation2 + $0xe8] sm:$0xff] }
  0xd8   :  { %7357 = vmatprep.subr.bf16.mxu1 %v8209_v0  ;;  %5685 = vmatprep.mubr.msk.f32.mxu0 %vm238_vm0, %v195_v52  ;;  %v529_v52 = vld [vmem:[#allocation2 + $0x260] sm:$0xff] }
  0xda   :  { %696 = vmatmul.mubr.f32.gmra.mrb[4].mxu1 %v505_v53  ;;  %386 = vmatmul.mubr.f32.gmra.mrb[4].mxu0 %v194_v54  ;;  %v218_v53 = vld [vmem:[#allocation2 + $0xe0] sm:$0xff]  ;;  %v532_v54 = vld [vmem:[#allocation2 + $0x278] sm:$0xff] }
  0xdb   :  { %5710 = vmatprep.mubr.msk.f32.mxu1 %vm238_vm0, %v508_v55  ;;  %7359 = vmatpush1.bf16.msra.mxu1 %v8458_v9  ;;  %v221_v55 = vld [vmem:[#allocation2 + $0xf8] sm:$0xff] }
  0xdc   :  { %7360 = vmatprep.subr.bf16.mxu1 %v8209_v0  ;;  %5686 = vmatprep.mubr.msk.f32.mxu0 %vm238_vm0, %v197_v56  ;;  %v531_v56 = vld [vmem:[#allocation2 + $0x270] sm:$0xff] }
  0xde   :  { %701 = vmatmul.mubr.f32.gmra.mrb[6].mxu1 %v507_v57  ;;  %391 = vmatmul.mubr.f32.gmra.mrb[6].mxu0 %v196_v58  ;;  %v220_v57 = vld [vmem:[#allocation2 + $0xf0] sm:$0xff]  ;;  %v534_v58 = vld [vmem:[#allocation2 + $0x288] sm:$0xff] }
  0xdf   :  { %5711 = vmatprep.mubr.msk.f32.mxu1 %vm238_vm0, %v510_v59  ;;  %7362 = vmatpush1.bf16.msra.mxu1 %v8471_v13  ;;  %v223_v59 = vld [vmem:[#allocation2 + $0x108] sm:$0xff] }
  0xe0   :  { %7363 = vmatprep.subr.bf16.mxu1 %v8209_v0  ;;  %5687 = vmatprep.mubr.msk.f32.mxu0 %vm238_vm0, %v199_v60  ;;  %v533_v60 = vld [vmem:[#allocation2 + $0x280] sm:$0xff] }
  0xe2   :  { %706 = vmatmul.mubr.f32.gmra.mrb[8].mxu1 %v509_v61  ;;  %396 = vmatmul.mubr.f32.gmra.mrb[8].mxu0 %v198_v62  ;;  %v222_v61 = vld [vmem:[#allocation2 + $0x100] sm:$0xff]  ;;  %v536_v62 = vld [vmem:[#allocation2 + $0x298] sm:$0xff] }
  0xe3   :  { %5712 = vmatprep.mubr.msk.f32.mxu1 %vm238_vm0, %v512_v63  ;;  %7365 = vmatpush1.bf16.msra.mxu1 %v8483_v16  ;;  %v225_v63 = vld [vmem:[#allocation2 + $0x118] sm:$0xff] }
  0xe4   :  { %7366 = vmatprep.subr.bf16.mxu1 %v8209_v0  ;;  %5688 = vmatprep.mubr.msk.f32.mxu0 %vm238_vm0, %v201_v1  ;;  %v535_v1 = vld [vmem:[#allocation2 + $0x290] sm:$0xff] }
  0xe6   :  { %711 = vmatmul.mubr.f32.gmra.mrb[10].mxu1 %v511_v2  ;;  %401 = vmatmul.mubr.f32.gmra.mrb[10].mxu0 %v200_v3  ;;  %v224_v2 = vld [vmem:[#allocation2 + $0x110] sm:$0xff]  ;;  %v538_v3 = vld [vmem:[#allocation2 + $0x2a8] sm:$0xff] }
  0xe7   :  { %5713 = vmatprep.mubr.msk.f32.mxu1 %vm238_vm0, %v514_v5  ;;  %7368 = vmatpush1.bf16.msra.mxu1 %v8496_v20  ;;  %v227_v5 = vld [vmem:[#allocation2 + $0x128] sm:$0xff] }
  0xe8   :  { %7369 = vmatprep.subr.bf16.mxu1 %v8209_v0  ;;  %5689 = vmatprep.mubr.msk.f32.mxu0 %vm238_vm0, %v203_v7  ;;  %v537_v7 = vld [vmem:[#allocation2 + $0x2a0] sm:$0xff] }
  0xea   :  { %716 = vmatmul.mubr.f32.gmra.mrb[12].mxu1 %v513_v8  ;;  %406 = vmatmul.mubr.f32.gmra.mrb[12].mxu0 %v202_v10  ;;  %v226_v8 = vld [vmem:[#allocation2 + $0x120] sm:$0xff]  ;;  %v540_v10 = vld [vmem:[#allocation2 + $0x2b8] sm:$0xff] }
  0xeb   :  { %5714 = vmatprep.mubr.msk.f32.mxu1 %vm238_vm0, %v516_v11  ;;  %7371 = vmatpush1.bf16.msra.mxu1 %v8508_v23  ;;  %v229_v11 = vld [vmem:[#allocation2 + $0x138] sm:$0xff] }
  0xec   :  { %7372 = vmatprep.subr.bf16.mxu1 %v8209_v0  ;;  %5690 = vmatprep.mubr.msk.f32.mxu0 %vm238_vm0, %v205_v12  ;;  %v539_v12 = vld [vmem:[#allocation2 + $0x2b0] sm:$0xff] }
  0xee   :  { %721 = vmatmul.mubr.f32.gmra.mrb[14].mxu1 %v515_v14  ;;  %411 = vmatmul.mubr.f32.gmra.mrb[14].mxu0 %v204_v15  ;;  %v228_v14 = vld [vmem:[#allocation2 + $0x130] sm:$0xff]  ;;  %v542_v15 = vld [vmem:[#allocation2 + $0x2c8] sm:$0xff] }
  0xef   :  { %5715 = vmatprep.mubr.msk.f32.mxu1 %vm238_vm0, %v518_v17  ;;  %7374 = vmatpush1.bf16.msra.mxu1 %v8520_v26  ;;  %v231_v17 = vld [vmem:[#allocation2 + $0x148] sm:$0xff] }
  0xf0   :  { %7375 = vmatprep.subr.bf16.mxu1 %v8209_v0  ;;  %5691 = vmatprep.mubr.msk.f32.mxu0 %vm238_vm0, %v207_v18  ;;  %v541_v18 = vld [vmem:[#allocation2 + $0x2c0] sm:$0xff] }
  0xf2   :  { %726 = vmatmul.mubr.f32.gmra.mrb[16].mxu1 %v517_v19  ;;  %416 = vmatmul.mubr.f32.gmra.mrb[16].mxu0 %v206_v21  ;;  %v230_v19 = vld [vmem:[#allocation2 + $0x140] sm:$0xff] }
  0xf3   :  { %5716 = vmatprep.mubr.msk.f32.mxu1 %vm238_vm0, %v520_v22  ;;  %7377 = vmatpush1.bf16.msra.mxu1 %v8532_v29  ;;  %v807_v21 = vld [vmem:[#allocation4 + $0x20] sm:$0xff]  ;;  %v808_v22 = vld [vmem:[#allocation4 + $0x28] sm:$0xff] }
  0xf4   :  { %7378 = vmatprep.subr.bf16.mxu1 %v8209_v0  ;;  %5692 = vmatprep.mubr.msk.f32.mxu0 %vm238_vm0, %v209_v24  ;;  %v544_v24 = vld [vmem:[#allocation2 + $0x2d8] sm:$0xff] }
  0xf6   :  { %731 = vmatmul.mubr.f32.gmra.mrb[18].mxu1 %v519_v25  ;;  %421 = vmatmul.mubr.f32.gmra.mrb[18].mxu0 %v208_v27  ;;  %v233_v25 = vld [vmem:[#allocation2 + $0x158] sm:$0xff]  ;;  %v7331_v27 = vpack.c.bf16 %v808_v22, %v807_v21  ;;  %v1364_v22 = vld [vmem:[#allocation2 + $0x3f0] sm:$0xff] }
  0xf7   :  { %5717 = vmatprep.mubr.msk.f32.mxu1 %vm238_vm0, %v522_v28  ;;  %7380 = vmatpush1.bf16.msra.mxu1 %v8544_v32  ;;  %v543_v28 = vld [vmem:[#allocation2 + $0x2d0] sm:$0xff]  ;;  %v1365_v21 = vld [vmem:[#allocation2 + $0x3f8] sm:$0xff] }
  0xf8   :  { %7381 = vmatprep.subr.bf16.mxu1 %v8209_v0  ;;  %5693 = vmatprep.mubr.msk.f32.mxu0 %vm238_vm0, %v211_v30  ;;  %v232_v30 = vld [vmem:[#allocation2 + $0x150] sm:$0xff] }
  0xf9   :  { %7332 = vmatprep.subr.bf16.mxu0 %v7331_v27 }
  0xfa   :  { %736 = vmatmul.mubr.f32.gmra.mrb[20].mxu1 %v521_v31  ;;  %426 = vmatmul.mubr.f32.gmra.mrb[20].mxu0 %v210_v33  ;;  %v809_v31 = vld [vmem:[#allocation4 + $0x30] sm:$0xff]  ;;  %v810_v33 = vld [vmem:[#allocation4 + $0x38] sm:$0xf] }
  0xfb   :  { %5718 = vmatprep.mubr.msk.f32.mxu1 %vm238_vm0, %v524_v34  ;;  %7383 = vmatpush1.bf16.msra.mxu1 %v8556_v35  ;;  %v546_v34 = vld [vmem:[#allocation2 + $0x2e8] sm:$0xff] }
  0xfc   :  { %7384 = vmatprep.subr.bf16.mxu1 %v8209_v0  ;;  %5694 = vmatprep.mubr.msk.f32.mxu0 %vm238_vm0, %v213_v36  ;;  %v235_v36 = vld [vmem:[#allocation2 + $0x168] sm:$0xff] }
  0xfd   :  { %7334 = vmatpush3.bf16.msra.mxu0 %v7331_v27  ;;  %v1369_v27 = vld [vmem:[#allocation2 + $0x418] sm:$0xff] }
  0xfe   :  { %741 = vmatmul.mubr.f32.gmra.mrb[22].mxu1 %v523_v37  ;;  %431 = vmatmul.mubr.f32.gmra.mrb[22].mxu0 %v212_v39  ;;  %v7335_v37 = vpack.c.bf16 %v810_v33, %v809_v31  ;;  %v1370_v31 = vld [vmem:[#allocation2 + $0x420] sm:$0xff]  ;;  %v1373_v33 = vld [vmem:[#allocation2 + $0x438] sm:$0xff] }
  0xff   :  { %5719 = vmatprep.mubr.msk.f32.mxu1 %vm238_vm0, %v526_v40  ;;  %7386 = vmatpush1.bf16.msra.mxu1 %v8568_v38  ;;  %v545_v40 = vld [vmem:[#allocation2 + $0x2e0] sm:$0xff] }
 0x100   :  { %7387 = vmatprep.subr.bf16.mxu1 %v8209_v0  ;;  %5695 = vmatprep.mubr.msk.f32.mxu0 %vm238_vm0, %v215_v42  ;;  %v234_v42 = vld [vmem:[#allocation2 + $0x160] sm:$0xff] }
 0x101   :  { %7337 = vmatprep.subr.msk.bf16.mxu0 %vm8671_vm3, %v7335_v37 }
 0x102   :  { %746 = vmatmul.mubr.f32.gmra.mrb[24].mxu1 %v525_v43  ;;  %436 = vmatmul.mubr.f32.gmra.mrb[24].mxu0 %v214_v45  ;;  %v548_v43 = vld [vmem:[#allocation2 + $0x2f8] sm:$0xff] }
 0x103   :  { %5720 = vmatprep.mubr.msk.f32.mxu1 %vm238_vm0, %v528_v46  ;;  %7389 = vmatpush1.bf16.msra.mxu1 %v8580_v41  ;;  %v237_v45 = vld [vmem:[#allocation2 + $0x178] sm:$0xff]  ;;  %v547_v46 = vld [vmem:[#allocation2 + $0x2f0] sm:$0xff] }
 0x104   :  { %7390 = vmatprep.subr.bf16.mxu1 %v8209_v0  ;;  %5696 = vmatprep.mubr.msk.f32.mxu0 %vm238_vm0, %v217_v47  ;;  %v236_v47 = vld [vmem:[#allocation2 + $0x170] sm:$0xff] }
 0x105   :  { %7340 = vmatpush3.bf16.msk.msra.mxu0 %vm8671_vm3, %v7335_v37  ;;  %v497_v37 = vld [vmem:[#allocation4 + $0x8] sm:$0xff] }
 0x106   :  { %751 = vmatmul.mubr.f32.gmra.mrb[26].mxu1 %v527_v48  ;;  %441 = vmatmul.mubr.f32.gmra.mrb[26].mxu0 %v216_v49  ;;  %v1335_v48 = vld [vmem:[#allocation2 + $0x308] sm:$0xff]  ;;  %v1334_v49 = vld [vmem:[#allocation2 + $0x300] sm:$0xff] }
 0x107   :  { %5721 = vmatprep.mubr.msk.f32.mxu1 %vm238_vm0, %v530_v50  ;;  %7392 = vmatpush1.bf16.msra.mxu1 %v8592_v44  ;;  %v1337_v50 = vld [vmem:[#allocation2 + $0x318] sm:$0xff] }
 0x108   :  { %5697 = vmatprep.mubr.msk.f32.mxu0 %vm238_vm0, %v219_v51  ;;  %7403 = vmatprep.subr.bf16.mxu1 %v8209_v0  ;;  %v1336_v51 = vld [vmem:[#allocation2 + $0x310] sm:$0xff] }
 0x10a   :  { %756 = vmatmul.mubr.f32.gmra.mrb[28].mxu1 %v529_v52  ;;  %446 = vmatmul.mubr.f32.gmra.mrb[28].mxu0 %v218_v53  ;;  %v1339_v52 = vld [vmem:[#allocation2 + $0x328] sm:$0xff]  ;;  %v1338_v53 = vld [vmem:[#allocation2 + $0x320] sm:$0xff] }
 0x10b   :  { %5722 = vmatprep.mubr.msk.f32.mxu1 %vm238_vm0, %v532_v54  ;;  %5698 = vmatprep.mubr.msk.f32.mxu0 %vm238_vm0, %v221_v55  ;;  %v1341_v54 = vld [vmem:[#allocation2 + $0x338] sm:$0xff]  ;;  %v1340_v55 = vld [vmem:[#allocation2 + $0x330] sm:$0xff] }
 0x10e   :  { %761 = vmatmul.mubr.f32.gmra.mrb[30].mxu1 %v531_v56  ;;  %451 = vmatmul.mubr.f32.gmra.mrb[30].mxu0 %v220_v57  ;;  %v1343_v56 = vld [vmem:[#allocation2 + $0x348] sm:$0xff]  ;;  %v1342_v57 = vld [vmem:[#allocation2 + $0x340] sm:$0xff] }
 0x10f   :  { %5723 = vmatprep.mubr.msk.f32.mxu1 %vm238_vm0, %v534_v58  ;;  %5699 = vmatprep.mubr.msk.f32.mxu0 %vm238_vm0, %v223_v59  ;;  %v1345_v58 = vld [vmem:[#allocation2 + $0x358] sm:$0xff]  ;;  %v1344_v59 = vld [vmem:[#allocation2 + $0x350] sm:$0xff] }
 0x112   :  { %766 = vmatmul.mubr.f32.gmra.mrb[32].mxu1 %v533_v60  ;;  %456 = vmatmul.mubr.f32.gmra.mrb[32].mxu0 %v222_v61  ;;  %v1347_v60 = vld [vmem:[#allocation2 + $0x368] sm:$0xff]  ;;  %v1346_v61 = vld [vmem:[#allocation2 + $0x360] sm:$0xff] }
 0x113   :  { %5724 = vmatprep.mubr.msk.f32.mxu1 %vm238_vm0, %v536_v62  ;;  %5700 = vmatprep.mubr.msk.f32.mxu0 %vm238_vm0, %v225_v63  ;;  %v1349_v62 = vld [vmem:[#allocation2 + $0x378] sm:$0xff]  ;;  %v1348_v63 = vld [vmem:[#allocation2 + $0x370] sm:$0xff] }
 0x116   :  { %771 = vmatmul.mubr.f32.gmra.mrb[34].mxu1 %v535_v1  ;;  %461 = vmatmul.mubr.f32.gmra.mrb[34].mxu0 %v224_v2  ;;  %v1351_v1 = vld [vmem:[#allocation2 + $0x388] sm:$0xff]  ;;  %v1350_v2 = vld [vmem:[#allocation2 + $0x380] sm:$0xff] }
 0x117   :  { %5725 = vmatprep.mubr.msk.f32.mxu1 %vm238_vm0, %v538_v3  ;;  %5701 = vmatprep.mubr.msk.f32.mxu0 %vm238_vm0, %v227_v5  ;;  %v1353_v3 = vld [vmem:[#allocation2 + $0x398] sm:$0xff]  ;;  %v1352_v5 = vld [vmem:[#allocation2 + $0x390] sm:$0xff] }
 0x11a   :  { %776 = vmatmul.mubr.f32.gmra.mrb[36].mxu1 %v537_v7  ;;  %466 = vmatmul.mubr.f32.gmra.mrb[36].mxu0 %v226_v8  ;;  %v1355_v7 = vld [vmem:[#allocation2 + $0x3a8] sm:$0xff]  ;;  %v1354_v8 = vld [vmem:[#allocation2 + $0x3a0] sm:$0xff] }
 0x11b   :  { %5726 = vmatprep.mubr.msk.f32.mxu1 %vm238_vm0, %v540_v10  ;;  %5702 = vmatprep.mubr.msk.f32.mxu0 %vm238_vm0, %v229_v11  ;;  %v1357_v10 = vld [vmem:[#allocation2 + $0x3b8] sm:$0xff]  ;;  %v1356_v11 = vld [vmem:[#allocation2 + $0x3b0] sm:$0xff] }
 0x11e   :  { %781 = vmatmul.mubr.f32.gmra.mrb[38].mxu1 %v539_v12  ;;  %471 = vmatmul.mubr.f32.gmra.mrb[38].mxu0 %v228_v14  ;;  %v1359_v12 = vld [vmem:[#allocation2 + $0x3c8] sm:$0xff]  ;;  %v1358_v14 = vld [vmem:[#allocation2 + $0x3c0] sm:$0xff] }
 0x11f   :  { %5727 = vmatprep.mubr.msk.f32.mxu1 %vm238_vm0, %v542_v15  ;;  %5703 = vmatprep.mubr.msk.f32.mxu0 %vm238_vm0, %v231_v17  ;;  %v1361_v15 = vld [vmem:[#allocation2 + $0x3d8] sm:$0xff]  ;;  %v1360_v17 = vld [vmem:[#allocation2 + $0x3d0] sm:$0xff] }
 0x122   :  { %786 = vmatmul.mubr.f32.gmra.mrb[40].mxu1 %v541_v18  ;;  %476 = vmatmul.mubr.f32.gmra.mrb[40].mxu0 %v230_v19  ;;  %v1363_v18 = vld [vmem:[#allocation2 + $0x3e8] sm:$0xff]  ;;  %v1362_v19 = vld [vmem:[#allocation2 + $0x3e0] sm:$0xff] }
 0x123   :  { %5728 = vmatprep.mubr.msk.f32.mxu1 %vm238_vm0, %v544_v24  ;;  %5704 = vmatprep.mubr.msk.f32.mxu0 %vm238_vm0, %v233_v25  ;;  %v1367_v24 = vld [vmem:[#allocation2 + $0x408] sm:$0xff]  ;;  %v1366_v25 = vld [vmem:[#allocation2 + $0x400] sm:$0xff] }
 0x126   :  { %791 = vmatmul.mubr.f32.gmra.mrb[42].mxu1 %v543_v28  ;;  %481 = vmatmul.mubr.f32.gmra.mrb[42].mxu0 %v232_v30  ;;  %v1368_v28 = vld [vmem:[#allocation2 + $0x410] sm:$0xff]  ;;  %v1371_v30 = vld [vmem:[#allocation2 + $0x428] sm:$0xff] }
 0x127   :  { %5729 = vmatprep.mubr.msk.f32.mxu1 %vm238_vm0, %v546_v34  ;;  %5705 = vmatprep.mubr.msk.f32.mxu0 %vm238_vm0, %v235_v36  ;;  %v1372_v34 = vld [vmem:[#allocation2 + $0x430] sm:$0xff]  ;;  %v496_v36 = vld [vmem:[#allocation4] sm:$0xff] }
 0x12a   :  { %796 = vmatmul.mubr.f32.gmra.mrb[44].mxu1 %v545_v40  ;;  %486 = vmatmul.mubr.f32.gmra.mrb[44].mxu0 %v234_v42  ;;  %v1375_v40 = vld [vmem:[#allocation2 + $0x448] sm:$0xff]  ;;  %v8731_v42 = vpack.c.bf16 %v497_v37, %v496_v36 }
 0x12b   :  { %5730 = vmatprep.mubr.msk.f32.mxu1 %vm238_vm0, %v548_v43  ;;  %5706 = vmatprep.mubr.msk.f32.mxu0 %vm238_vm0, %v237_v45  ;;  %v1374_v43 = vld [vmem:[#allocation2 + $0x440] sm:$0xff]  ;;  %v1377_v45 = vld [vmem:[#allocation2 + $0x458] sm:$0xff] }
 0x12c   :  { %7342 = vmatprep.subr.bf16.mxu0 %v8731_v42 }
 0x12e   :  { %801 = vmatmul.mubr.f32.gmra.mrb[46].mxu1 %v547_v46  ;;  %491 = vmatmul.mubr.f32.gmra.mrb[46].mxu0 %v236_v47  ;;  %v1376_v46 = vld [vmem:[#allocation2 + $0x450] sm:$0xff]  ;;  %v1379_v47 = vld [vmem:[#allocation2 + $0x468] sm:$0xff] }
 0x12f   :  { %5781 = vmatprep.mubr.msk.f32.mxu1 %vm238_vm0, %v1335_v48  ;;  %v1378_v48 = vld [vmem:[#allocation2 + $0x460] sm:$0xff] }
 0x132   :  { %1519 = vmatmul.mubr.f32.vlgmr.msra.gmra.mrb[48].mxu1 %v1334_v49  ;;  %v1381_v49 = vld [vmem:[#allocation2 + $0x478] sm:$0xff] }
 0x133   :  { %5782 = vmatprep.mubr.msk.f32.mxu1 %vm238_vm0, %v1337_v50  ;;  %7405 = vmatpush1.bf16.msra.mxu1 %v8440_v4  ;;  %v1380_v50 = vld [vmem:[#allocation2 + $0x470] sm:$0xff] }
 0x134   :  { %7406 = vmatprep.subr.bf16.mxu1 %v8209_v0 }
 0x136   :  { %1524 = vmatmul.mubr.f32.gmra.mrb[50].mxu1 %v1336_v51  ;;  %v1930_v51 = vld [vmem:[#allocation2 + $0x488] sm:$0xff] }
 0x137   :  { %5783 = vmatprep.mubr.msk.f32.mxu1 %vm238_vm0, %v1339_v52  ;;  %7408 = vmatpush1.bf16.msra.mxu1 %v8446_v6  ;;  %v1929_v52 = vld [vmem:[#allocation2 + $0x480] sm:$0xff] }
 0x138   :  { %7409 = vmatprep.subr.bf16.mxu1 %v8209_v0 }
 0x13a   :  { %1529 = vmatmul.mubr.f32.gmra.mrb[52].mxu1 %v1338_v53  ;;  %v1932_v53 = vld [vmem:[#allocation2 + $0x498] sm:$0xff] }
 0x13b   :  { %5784 = vmatprep.mubr.msk.f32.mxu1 %vm238_vm0, %v1341_v54  ;;  %7411 = vmatpush1.bf16.msra.mxu1 %v8458_v9  ;;  %v1931_v54 = vld [vmem:[#allocation2 + $0x490] sm:$0xff] }
 0x13c   :  { %7412 = vmatprep.subr.bf16.mxu1 %v8209_v0 }
 0x13e   :  { %1534 = vmatmul.mubr.f32.gmra.mrb[54].mxu1 %v1340_v55  ;;  %v1934_v55 = vld [vmem:[#allocation2 + $0x4a8] sm:$0xff] }
 0x13f   :  { %5785 = vmatprep.mubr.msk.f32.mxu1 %vm238_vm0, %v1343_v56  ;;  %7414 = vmatpush1.bf16.msra.mxu1 %v8471_v13  ;;  %v1933_v56 = vld [vmem:[#allocation2 + $0x4a0] sm:$0xff] }
 0x140   :  { %7415 = vmatprep.subr.bf16.mxu1 %v8209_v0 }
 0x142   :  { %1539 = vmatmul.mubr.f32.gmra.mrb[56].mxu1 %v1342_v57  ;;  %v1936_v57 = vld [vmem:[#allocation2 + $0x4b8] sm:$0xff] }
 0x143   :  { %5786 = vmatprep.mubr.msk.f32.mxu1 %vm238_vm0, %v1345_v58  ;;  %7417 = vmatpush1.bf16.msra.mxu1 %v8483_v16  ;;  %v1935_v58 = vld [vmem:[#allocation2 + $0x4b0] sm:$0xff] }
 0x144   :  { %7418 = vmatprep.subr.bf16.mxu1 %v8209_v0 }
 0x146   :  { %1544 = vmatmul.mubr.f32.gmra.mrb[58].mxu1 %v1344_v59  ;;  %v1938_v59 = vld [vmem:[#allocation2 + $0x4c8] sm:$0xff] }
 0x147   :  { %5787 = vmatprep.mubr.msk.f32.mxu1 %vm238_vm0, %v1347_v60  ;;  %7420 = vmatpush1.bf16.msra.mxu1 %v8496_v20  ;;  %v1940_v60 = vld [vmem:[#allocation2 + $0x4d8] sm:$0xff] }
 0x148   :  { %7421 = vmatprep.subr.bf16.mxu1 %v8209_v0 }
 0x14a   :  { %1549 = vmatmul.mubr.f32.gmra.mrb[60].mxu1 %v1346_v61 }
 0x14b   :  { %5788 = vmatprep.mubr.msk.f32.mxu1 %vm238_vm0, %v1349_v62  ;;  %7423 = vmatpush1.bf16.msra.mxu1 %v8508_v23 }
 0x14c   :  { %7424 = vmatprep.subr.bf16.mxu1 %v8209_v0 }
 0x14e   :  { %1554 = vmatmul.mubr.f32.gmra.mrb[62].mxu1 %v1348_v63 }
 0x14f   :  { %5789 = vmatprep.mubr.msk.f32.mxu1 %vm238_vm0, %v1351_v1  ;;  %7426 = vmatpush1.bf16.msra.mxu1 %v8520_v26  ;;  %v499_v1 = vld [vmem:[#allocation4 + $0x18] sm:$0xf] }
 0x150   :  { %7427 = vmatprep.subr.bf16.mxu1 %v8209_v0 }
 0x152   :  { %1559 = vmatmul.mubr.f32.gmra.mrb[64].mxu1 %v1350_v2 }
 0x153   :  { %5790 = vmatprep.mubr.msk.f32.mxu1 %vm238_vm0, %v1353_v3  ;;  %7429 = vmatpush1.bf16.msra.mxu1 %v8532_v29  ;;  %v1941_v3 = vld [vmem:[#allocation2 + $0x4e0] sm:$0xff] }
 0x154   :  { %7430 = vmatprep.subr.bf16.mxu1 %v8209_v0 }
 0x156   :  { %1564 = vmatmul.mubr.f32.gmra.mrb[66].mxu1 %v1352_v5  ;;  %v1944_v5 = vld [vmem:[#allocation2 + $0x4f8] sm:$0xff] }
 0x157   :  { %5791 = vmatprep.mubr.msk.f32.mxu1 %vm238_vm0, %v1355_v7  ;;  %7432 = vmatpush1.bf16.msra.mxu1 %v8544_v32 }
 0x158   :  { %7433 = vmatprep.subr.bf16.mxu1 %v8209_v0 }
 0x15a   :  { %1569 = vmatmul.mubr.f32.gmra.mrb[68].mxu1 %v1354_v8 }
 0x15b   :  { %5792 = vmatprep.mubr.msk.f32.mxu1 %vm238_vm0, %v1357_v10  ;;  %7435 = vmatpush1.bf16.msra.mxu1 %v8556_v35 }
 0x15c   :  { %7436 = vmatprep.subr.bf16.mxu1 %v8209_v0 }
 0x15e   :  { %1574 = vmatmul.mubr.f32.gmra.mrb[70].mxu1 %v1356_v11 }
 0x15f   :  { %5793 = vmatprep.mubr.msk.f32.mxu1 %vm238_vm0, %v1359_v12  ;;  %7438 = vmatpush1.bf16.msra.mxu1 %v8568_v38  ;;  %v1943_v12 = vld [vmem:[#allocation2 + $0x4f0] sm:$0xff] }
 0x160   :  { %7439 = vmatprep.subr.bf16.mxu1 %v8209_v0 }
 0x162   :  { %1579 = vmatmul.mubr.f32.gmra.mrb[72].mxu1 %v1358_v14  ;;  %v1640_v14 = vld [vmem:[#allocation4 + $0x40] sm:$0xff] }
 0x163   :  { %5794 = vmatprep.mubr.msk.f32.mxu1 %vm238_vm0, %v1361_v15  ;;  %7441 = vmatpush1.bf16.msra.mxu1 %v8580_v41  ;;  %v1641_v15 = vld [vmem:[#allocation4 + $0x48] sm:$0xff] }
 0x164   :  { %7442 = vmatprep.subr.bf16.mxu1 %v8209_v0 }
 0x166   :  { %1584 = vmatmul.mubr.f32.gmra.mrb[74].mxu1 %v1360_v17 }
 0x167   :  { %5795 = vmatprep.mubr.msk.f32.mxu1 %vm238_vm0, %v1363_v18  ;;  %7444 = vmatpush1.bf16.msra.mxu1 %v8592_v44 }
 0x168   :  { %7455 = vmatprep.subr.bf16.mxu1 %v8209_v0 }
 0x16a   :  { %1589 = vmatmul.mubr.f32.gmra.mrb[76].mxu1 %v1362_v19  ;;  %v8771_v19 = vpack.c.bf16 %v1641_v15, %v1640_v14 }
 0x16b   :  { %5796 = vmatprep.mubr.msk.f32.mxu1 %vm238_vm0, %v1365_v21 }
 0x16e   :  { %1594 = vmatmul.mubr.f32.gmra.mrb[78].mxu1 %v1364_v22  ;;  %v1945_v22 = vld [vmem:[#allocation2 + $0x500] sm:$0xff] }
 0x16f   :  { %5797 = vmatprep.mubr.msk.f32.mxu1 %vm238_vm0, %v1367_v24  ;;  %v1948_v24 = vld [vmem:[#allocation2 + $0x518] sm:$0xff] }
 0x172   :  { %1599 = vmatmul.mubr.f32.gmra.mrb[80].mxu1 %v1366_v25 }
 0x173   :  { %5798 = vmatprep.mubr.msk.f32.mxu1 %vm238_vm0, %v1369_v27 }
 0x176   :  { %1604 = vmatmul.mubr.f32.gmra.mrb[82].mxu1 %v1368_v28 }
 0x177   :  { %5799 = vmatprep.mubr.msk.f32.mxu1 %vm238_vm0, %v1371_v30 }
 0x17a   :  { %1609 = vmatmul.mubr.f32.gmra.mrb[84].mxu1 %v1370_v31  ;;  %v1947_v31 = vld [vmem:[#allocation2 + $0x510] sm:$0xff] }
 0x17b   :  { %5800 = vmatprep.mubr.msk.f32.mxu1 %vm238_vm0, %v1373_v33 }
 0x17e   :  { %1614 = vmatmul.mubr.f32.gmra.mrb[86].mxu1 %v1372_v34 }
 0x17f   :  { %5801 = vmatprep.mubr.msk.f32.mxu1 %vm238_vm0, %v1375_v40  ;;  %v1949_v40 = vld [vmem:[#allocation2 + $0x520] sm:$0xff] }
 0x182   :  { %1619 = vmatmul.mubr.f32.gmra.mrb[88].mxu1 %v1374_v43 }
 0x183   :  { %5802 = vmatprep.mubr.msk.f32.mxu1 %vm238_vm0, %v1377_v45 }
 0x186   :  { %1624 = vmatmul.mubr.f32.gmra.mrb[90].mxu1 %v1376_v46 }
 0x187   :  { %5803 = vmatprep.mubr.msk.f32.mxu1 %vm238_vm0, %v1379_v47  ;;  %v1951_v47 = vld [vmem:[#allocation2 + $0x530] sm:$0xff] }
 0x18a   :  { %1629 = vmatmul.mubr.f32.gmra.mrb[92].mxu1 %v1378_v48  ;;  %v1954_v48 = vld [vmem:[#allocation2 + $0x548] sm:$0xff] }
 0x18b   :  { %5804 = vmatprep.mubr.msk.f32.mxu1 %vm238_vm0, %v1381_v49 }
 0x18e   :  { %1634 = vmatmul.mubr.f32.gmra.mrb[94].mxu1 %v1380_v50 }
 0x18f   :  { %5830 = vmatprep.mubr.msk.f32.mxu1 %vm238_vm0, %v1930_v51 }
 0x192   :  { %2114 = vmatmul.mubr.f32.vlgmr.msra.gmra.mrb[96].mxu1 %v1929_v52  ;;  %v1953_v52 = vld [vmem:[#allocation2 + $0x540] sm:$0xff] }
 0x193   :  { %5831 = vmatprep.mubr.msk.f32.mxu1 %vm238_vm0, %v1932_v53  ;;  %7457 = vmatpush1.bf16.msra.mxu1 %v8440_v4  ;;  %v1937_v4 = vld [vmem:[#allocation2 + $0x4c0] sm:$0xff]  ;;  %v1956_v53 = vld [vmem:[#allocation2 + $0x558] sm:$0xff] }
 0x194   :  { %7458 = vmatprep.subr.bf16.mxu1 %v8209_v0 }
 0x196   :  { %2119 = vmatmul.mubr.f32.gmra.mrb[98].mxu1 %v1931_v54 }
 0x197   :  { %5832 = vmatprep.mubr.msk.f32.mxu1 %vm238_vm0, %v1934_v55  ;;  %7460 = vmatpush1.bf16.msra.mxu1 %v8446_v6  ;;  %v1939_v6 = vld [vmem:[#allocation2 + $0x4d0] sm:$0xff] }
 0x198   :  { %7461 = vmatprep.subr.bf16.mxu1 %v8209_v0 }
 0x19a   :  { %2124 = vmatmul.mubr.f32.gmra.mrb[100].mxu1 %v1933_v56 }
 0x19b   :  { %5833 = vmatprep.mubr.msk.f32.mxu1 %vm238_vm0, %v1936_v57  ;;  %7463 = vmatpush1.bf16.msra.mxu1 %v8458_v9  ;;  %v1942_v9 = vld [vmem:[#allocation2 + $0x4e8] sm:$0xff]  ;;  %v1955_v57 = vld [vmem:[#allocation2 + $0x550] sm:$0xff] }
 0x19c   :  { %7464 = vmatprep.subr.bf16.mxu1 %v8209_v0 }
 0x19e   :  { %2129 = vmatmul.mubr.f32.gmra.mrb[102].mxu1 %v1935_v58  ;;  %v1958_v58 = vld [vmem:[#allocation2 + $0x568] sm:$0xff] }
 0x19f   :  { %5834 = vmatprep.mubr.msk.f32.mxu1 %vm238_vm0, %v1938_v59  ;;  %7466 = vmatpush1.bf16.msra.mxu1 %v8471_v13  ;;  %v498_v13 = vld [vmem:[#allocation4 + $0x10] sm:$0xff] }
 0x1a0   :  { %7467 = vmatprep.subr.bf16.mxu1 %v8209_v0  ;;  %v7345_v7 = vpack.c.bf16 %v499_v1, %v498_v13  ;;  %v1959_v1 = vld [vmem:[#allocation2 + $0x570] sm:$0xff] }
 0x1a2   :  { %2134 = vmatmul.mubr.f32.gmra.mrb[104].mxu1 %v1937_v4 }
 0x1a3   :  { %5835 = vmatprep.mubr.msk.f32.mxu1 %vm238_vm0, %v1940_v60  ;;  %7469 = vmatpush1.bf16.msra.mxu1 %v8483_v16 }
 0x1a4   :  { %7470 = vmatprep.subr.bf16.mxu1 %v8209_v0 }
 0x1a5   :  { %v687_v61 = vpop.f32.mrb[0].mxu1  ;;  %v8754_v62 = vpop.f32.mrb[0].mxu0 }
 0x1a6   :  { %v689_v63 = vpop.f32.mrb[1].mxu1  ;;  %6505 = vmatprep.mubr.msk.f32.mxu0 %vm811_vm4, %v687_v61  ;;  %2139 = vmatmul.mubr.f32.gmra.mrb[106].mxu1 %v1939_v6  ;;  %v379_v2 = vpop.f32.mrb[1].mxu0  ;;  %v1957_v6 = vld [vmem:[#allocation2 + $0x560] sm:$0xff] }
 0x1a7   :  { %5836 = vmatprep.mubr.msk.f32.mxu1 %vm238_vm0, %v1942_v9  ;;  %7472 = vmatpush1.bf16.msra.mxu1 %v8496_v20  ;;  %v1946_v20 = vld [vmem:[#allocation2 + $0x508] sm:$0xff]  ;;  %v1960_v9 = vld [vmem:[#allocation2 + $0x578] sm:$0xff] }
 0x1a8   :  { %7473 = vmatprep.subr.bf16.mxu1 %v8209_v0  ;;  %v1962_v2 = vld [vmem:[#allocation2 + $0x588] sm:$0xff] }
 0x1a9   :  { %v692_v16 = vpop.f32.mrb[2].mxu1  ;;  %v8760_v8 = vpop.f32.mrb[2].mxu0 }
 0x1aa   :  { %v694_v10 = vpop.f32.mrb[3].mxu1  ;;  %6506 = vmatmul.mubr.msk.f32.vlgmr.msra.gmra.mrb[48].mxu0 %vm811_vm4, %v692_v16  ;;  %2144 = vmatmul.mubr.f32.gmra.mrb[108].mxu1 %v1941_v3  ;;  %v384_v11 = vpop.f32.mrb[3].mxu0 }
 0x1ab   :  { %5837 = vmatprep.mubr.msk.f32.mxu1 %vm238_vm0, %v1944_v5  ;;  %7475 = vmatpush1.bf16.msra.mxu1 %v8508_v23  ;;  %v1964_v10 = vld [vmem:[#allocation2 + $0x598] sm:$0xff] }
 0x1ac   :  { %7476 = vmatprep.subr.bf16.mxu1 %v8209_v0  ;;  %7344 = vmatpush3.bf16.msra.mxu0 %v8731_v42  ;;  %v1952_v42 = vld [vmem:[#allocation2 + $0x538] sm:$0xff] }
 0x1ad   :  { %v697_v17 = vpop.f32.mrb[4].mxu1  ;;  %7347 = vmatprep.subr.msk.bf16.mxu0 %vm8671_vm3, %v7345_v7  ;;  %v8769_v18 = vpop.f32.mrb[4].mxu0 }
 0x1ae   :  { %v699_v21 = vpop.f32.mrb[5].mxu1  ;;  %6508 = vmatprep.mubr.msk.f32.mxu0 %vm811_vm4, %v697_v17  ;;  %2149 = vmatmul.mubr.f32.gmra.mrb[110].mxu1 %v1943_v12  ;;  %v389_v23 = vpop.f32.mrb[5].mxu0  ;;  %v1966_v17 = vld [vmem:[#allocation2 + $0x5a8] sm:$0xff] }
 0x1af   :  { %5838 = vmatprep.mubr.msk.f32.mxu1 %vm238_vm0, %v1946_v20  ;;  %7478 = vmatpush1.bf16.msra.mxu1 %v8520_v26  ;;  %v1950_v26 = vld [vmem:[#allocation2 + $0x528] sm:$0xff]  ;;  %v1963_v20 = vld [vmem:[#allocation2 + $0x590] sm:$0xff] }
 0x1b0   :  { %7479 = vmatprep.subr.bf16.mxu1 %v8209_v0  ;;  %7350 = vmatpush3.bf16.msk.msra.mxu0 %vm8671_vm3, %v7345_v7  ;;  %v1961_v7 = vld [vmem:[#allocation2 + $0x580] sm:$0xff] }
 0x1b1   :  { %v702_v25 = vpop.f32.mrb[6].mxu1  ;;  %v8779_v27 = vpop.f32.mrb[6].mxu0  ;;  %7394 = vmatprep.subr.bf16.mxu0 %v8771_v19 }
 0x1b2   :  { %v704_v28 = vpop.f32.mrb[7].mxu1  ;;  %6509 = vmatmul.mubr.msk.f32.gmra.mrb[50].mxu0 %vm811_vm4, %v702_v25  ;;  %2154 = vmatmul.mubr.f32.gmra.mrb[112].mxu1 %v1945_v22  ;;  %v394_v30 = vpop.f32.mrb[7].mxu0  ;;  %v1965_v25 = vld [vmem:[#allocation2 + $0x5a0] sm:$0xff] }
 0x1b3   :  { %5839 = vmatprep.mubr.msk.f32.mxu1 %vm238_vm0, %v1948_v24  ;;  %7481 = vmatpush1.bf16.msra.mxu1 %v8532_v29  ;;  %v1968_v28 = vld [vmem:[#allocation2 + $0x5b8] sm:$0xff] }
 0x1b4   :  { %7482 = vmatprep.subr.bf16.mxu1 %v8209_v0 }
 0x1b5   :  { %v707_v33 = vpop.f32.mrb[8].mxu1  ;;  %v8786_v34 = vpop.f32.mrb[8].mxu0 }
 0x1b6   :  { %v709_v36 = vpop.f32.mrb[9].mxu1  ;;  %6511 = vmatprep.mubr.msk.f32.mxu0 %vm811_vm4, %v707_v33  ;;  %2159 = vmatmul.mubr.f32.gmra.mrb[114].mxu1 %v1947_v31  ;;  %v399_v37 = vpop.f32.mrb[9].mxu0 }
 0x1b7   :  { %5840 = vmatprep.mubr.msk.f32.mxu1 %vm238_vm0, %v1950_v26  ;;  %7484 = vmatpush1.bf16.msra.mxu1 %v8544_v32  ;;  %v1967_v36 = vld [vmem:[#allocation2 + $0x5b0] sm:$0xff]  ;;  %v1970_v37 = vld [vmem:[#allocation2 + $0x5c8] sm:$0xff] }
 0x1b8   :  { %7485 = vmatprep.subr.bf16.mxu1 %v8209_v0 }
 0x1b9   :  { %v712_v29 = vpop.f32.mrb[10].mxu1  ;;  %v8792_v43 = vpop.f32.mrb[10].mxu0 }
 0x1ba   :  { %v714_v45 = vpop.f32.mrb[11].mxu1  ;;  %6512 = vmatmul.mubr.msk.f32.gmra.mrb[52].mxu0 %vm811_vm4, %v712_v29  ;;  %2164 = vmatmul.mubr.f32.gmra.mrb[116].mxu1 %v1949_v40  ;;  %v404_v46 = vpop.f32.mrb[11].mxu0 }
 0x1bb   :  { %5841 = vmatprep.mubr.msk.f32.mxu1 %vm238_vm0, %v1952_v42  ;;  %7487 = vmatpush1.bf16.msra.mxu1 %v8556_v35  ;;  %v1969_v46 = vld [vmem:[#allocation2 + $0x5c0] sm:$0xff] }
 0x1bc   :  { %7488 = vmatprep.subr.bf16.mxu1 %v8209_v0 }
 0x1bd   :  { %v717_v32 = vpop.f32.mrb[12].mxu1  ;;  %v8798_v49 = vpop.f32.mrb[12].mxu0 }
 0x1be   :  { %v719_v50 = vpop.f32.mrb[13].mxu1  ;;  %6514 = vmatprep.mubr.msk.f32.mxu0 %vm811_vm4, %v717_v32  ;;  %2169 = vmatmul.mubr.f32.gmra.mrb[118].mxu1 %v1951_v47  ;;  %v409_v51 = vpop.f32.mrb[13].mxu0  ;;  %v1972_v47 = vld [vmem:[#allocation2 + $0x5d8] sm:$0xff] }
 0x1bf   :  { %5842 = vmatprep.mubr.msk.f32.mxu1 %vm238_vm0, %v1954_v48  ;;  %7490 = vmatpush1.bf16.msra.mxu1 %v8568_v38 }
 0x1c0   :  { %7491 = vmatprep.subr.bf16.mxu1 %v8209_v0 }
 0x1c1   :  { %v722_v35 = vpop.f32.mrb[14].mxu1  ;;  %v8804_v54 = vpop.f32.mrb[14].mxu0 }
 0x1c2   :  { %v724_v55 = vpop.f32.mrb[15].mxu1  ;;  %6515 = vmatmul.mubr.msk.f32.gmra.mrb[54].mxu0 %vm811_vm4, %v722_v35  ;;  %2174 = vmatmul.mubr.f32.gmra.mrb[120].mxu1 %v1953_v52  ;;  %v414_v56 = vpop.f32.mrb[15].mxu0  ;;  %v1971_v52 = vld [vmem:[#allocation2 + $0x5d0] sm:$0xff] }
 0x1c3   :  { %5843 = vmatprep.mubr.msk.f32.mxu1 %vm238_vm0, %v1956_v53  ;;  %7493 = vmatpush1.bf16.msra.mxu1 %v8580_v41  ;;  %v1974_v53 = vld [vmem:[#allocation2 + $0x5e8] sm:$0xff] }
 0x1c4   :  { %7494 = vmatprep.subr.bf16.mxu1 %v8209_v0 }
 0x1c5   :  { %v727_v38 = vpop.f32.mrb[16].mxu1  ;;  %v8810_v59 = vpop.f32.mrb[16].mxu0 }
 0x1c6   :  { %v729_v4 = vpop.f32.mrb[17].mxu1  ;;  %6517 = vmatprep.mubr.msk.f32.mxu0 %vm811_vm4, %v727_v38  ;;  %2179 = vmatmul.mubr.f32.gmra.mrb[122].mxu1 %v1955_v57  ;;  %v419_v60 = vpop.f32.mrb[17].mxu0  ;;  %v1976_v38 = vld [vmem:[#allocation2 + $0x5f8] sm:$0xff] }
 0x1c7   :  { %5844 = vmatprep.mubr.msk.f32.mxu1 %vm238_vm0, %v1958_v58  ;;  %7496 = vmatpush1.bf16.msra.mxu1 %v8592_v44  ;;  %v1973_v58 = vld [vmem:[#allocation2 + $0x5e0] sm:$0xff] }
 0x1c9   :  { %v732_v61 = vpop.f32.mrb[18].mxu1  ;;  %v8815_v63 = vpop.f32.mrb[18].mxu0 }
 0x1ca   :  { %v734_v41 = vpop.f32.mrb[19].mxu1  ;;  %6518 = vmatmul.mubr.msk.f32.gmra.mrb[56].mxu0 %vm811_vm4, %v732_v61  ;;  %2184 = vmatmul.mubr.f32.gmra.mrb[124].mxu1 %v1957_v6  ;;  %v424_v13 = vpop.f32.mrb[19].mxu0  ;;  %v1975_v61 = vld [vmem:[#allocation2 + $0x5f0] sm:$0xff] }
 0x1cb   :  { %5845 = vmatprep.mubr.msk.f32.mxu1 %vm238_vm0, %v1960_v9  ;;  %v2525_v41 = vld [vmem:[#allocation2 + $0x608] sm:$0xff] }
 0x1cd   :  { %v737_v3 = vpop.f32.mrb[20].mxu1  ;;  %v8819_v5 = vpop.f32.mrb[20].mxu0 }
 0x1ce   :  { %v739_v16 = vpop.f32.mrb[21].mxu1  ;;  %6520 = vmatprep.mubr.msk.f32.mxu0 %vm811_vm4, %v737_v3  ;;  %2189 = vmatmul.mubr.f32.gmra.mrb[126].mxu1 %v1959_v1  ;;  %v429_v44 = vpop.f32.mrb[21].mxu0 }
 0x1cf   :  { %5846 = vmatprep.mubr.msk.f32.mxu1 %vm238_vm0, %v1962_v2  ;;  %v2524_v16 = vld [vmem:[#allocation2 + $0x600] sm:$0xff]  ;;  %v2527_v44 = vld [vmem:[#allocation2 + $0x618] sm:$0xff] }
 0x1d1   :  { %v742_v11 = vpop.f32.mrb[22].mxu1  ;;  %v8823_v12 = vpop.f32.mrb[22].mxu0 }
 0x1d2   :  { %v744_v14 = vpop.f32.mrb[23].mxu1  ;;  %6521 = vmatmul.mubr.msk.f32.gmra.mrb[58].mxu0 %vm811_vm4, %v742_v11  ;;  %2194 = vmatmul.mubr.f32.gmra.mrb[128].mxu1 %v1961_v7  ;;  %v434_v15 = vpop.f32.mrb[23].mxu0 }
 0x1d3   :  { %5847 = vmatprep.mubr.msk.f32.mxu1 %vm238_vm0, %v1964_v10  ;;  %v2526_v15 = vld [vmem:[#allocation2 + $0x610] sm:$0xff] }
 0x1d5   :  { %v747_v21 = vpop.f32.mrb[24].mxu1  ;;  %v8827_v23 = vpop.f32.mrb[24].mxu0 }
 0x1d6   :  { %v749_v22 = vpop.f32.mrb[25].mxu1  ;;  %6523 = vmatprep.mubr.msk.f32.mxu0 %vm811_vm4, %v747_v21  ;;  %2199 = vmatmul.mubr.f32.gmra.mrb[130].mxu1 %v1963_v20  ;;  %v439_v24 = vpop.f32.mrb[25].mxu0  ;;  %v2529_v20 = vld [vmem:[#allocation2 + $0x628] sm:$0xff] }
 0x1d7   :  { %5848 = vmatprep.mubr.msk.f32.mxu1 %vm238_vm0, %v1966_v17 }
 0x1d9   :  { %v752_v30 = vpop.f32.mrb[26].mxu1  ;;  %v8831_v31 = vpop.f32.mrb[26].mxu0 }
 0x1da   :  { %v754_v26 = vpop.f32.mrb[27].mxu1  ;;  %6524 = vmatmul.mubr.msk.f32.gmra.mrb[60].mxu0 %vm811_vm4, %v752_v30  ;;  %2204 = vmatmul.mubr.f32.gmra.mrb[132].mxu1 %v1965_v25  ;;  %v444_v33 = vpop.f32.mrb[27].mxu0  ;;  %v2528_v25 = vld [vmem:[#allocation2 + $0x620] sm:$0xff] }
 0x1db   :  { %5849 = vmatprep.mubr.msk.f32.mxu1 %vm238_vm0, %v1968_v28  ;;  %v2531_v28 = vld [vmem:[#allocation2 + $0x638] sm:$0xff] }
 0x1dd   :  { %v757_v40 = vpop.f32.mrb[28].mxu1  ;;  %v8835_v42 = vpop.f32.mrb[28].mxu0 }
 0x1de   :  { %v759_v29 = vpop.f32.mrb[29].mxu1  ;;  %6526 = vmatprep.mubr.msk.f32.mxu0 %vm811_vm4, %v757_v40  ;;  %2209 = vmatmul.mubr.f32.gmra.mrb[134].mxu1 %v1967_v36  ;;  %v449_v45 = vpop.f32.mrb[29].mxu0  ;;  %v2533_v40 = vld [vmem:[#allocation2 + $0x648] sm:$0xff] }
 0x1df   :  { %5850 = vmatprep.mubr.msk.f32.mxu1 %vm238_vm0, %v1970_v37  ;;  %v2530_v37 = vld [vmem:[#allocation2 + $0x630] sm:$0xff] }
 0x1e1   :  { %v762_v48 = vpop.f32.mrb[30].mxu1  ;;  %v8839_v32 = vpop.f32.mrb[30].mxu0 }
 0x1e2   :  { %v764_v50 = vpop.f32.mrb[31].mxu1  ;;  %6527 = vmatmul.mubr.msk.f32.gmra.mrb[62].mxu0 %vm811_vm4, %v762_v48  ;;  %2214 = vmatmul.mubr.f32.gmra.mrb[136].mxu1 %v1969_v46  ;;  %v454_v51 = vpop.f32.mrb[31].mxu0  ;;  %v2532_v48 = vld [vmem:[#allocation2 + $0x640] sm:$0xff] }
 0x1e3   :  { %5851 = vmatprep.mubr.msk.f32.mxu1 %vm238_vm0, %v1972_v47  ;;  %v2535_v50 = vld [vmem:[#allocation2 + $0x658] sm:$0xff] }
 0x1e5   :  { %v767_v35 = vpop.f32.mrb[32].mxu1  ;;  %v8843_v55 = vpop.f32.mrb[32].mxu0 }
 0x1e6   :  { %v769_v56 = vpop.f32.mrb[33].mxu1  ;;  %6529 = vmatprep.mubr.msk.f32.mxu0 %vm811_vm4, %v767_v35  ;;  %2219 = vmatmul.mubr.f32.gmra.mrb[138].mxu1 %v1971_v52  ;;  %v459_v57 = vpop.f32.mrb[33].mxu0  ;;  %v1642_v35 = vld [vmem:[#allocation4 + $0x50] sm:$0xff] }
 0x1e7   :  { %5852 = vmatprep.mubr.msk.f32.mxu1 %vm238_vm0, %v1974_v53  ;;  %v1643_v56 = vld [vmem:[#allocation4 + $0x58] sm:$0xf] }
 0x1e9   :  { %v772_v4 = vpop.f32.mrb[34].mxu1  ;;  %v8847_v60 = vpop.f32.mrb[34].mxu0 }
 0x1ea   :  { %v774_v6 = vpop.f32.mrb[35].mxu1  ;;  %6530 = vmatmul.mubr.msk.f32.gmra.mrb[64].mxu0 %vm811_vm4, %v772_v4  ;;  %2224 = vmatmul.mubr.f32.gmra.mrb[140].mxu1 %v1973_v58  ;;  %v464_v9 = vpop.f32.mrb[35].mxu0  ;;  %v2534_v58 = vld [vmem:[#allocation2 + $0x650] sm:$0xff] }
 0x1eb   :  { %5853 = vmatprep.mubr.msk.f32.mxu1 %vm238_vm0, %v1976_v38  ;;  %v2537_v38 = vld [vmem:[#allocation2 + $0x668] sm:$0xff]  ;;  %v7397_v6 = vpack.c.bf16 %v1643_v56, %v1642_v35  ;;  %v2563_v56 = vld [vmem:[#allocation2 + $0x738] sm:$0xff] }
 0x1ed   :  { %v777_v13 = vpop.f32.mrb[36].mxu1  ;;  %v8851_v1 = vpop.f32.mrb[36].mxu0 }
 0x1ee   :  { %v779_v2 = vpop.f32.mrb[37].mxu1  ;;  %6532 = vmatprep.mubr.msk.f32.mxu0 %vm811_vm4, %v777_v13  ;;  %2229 = vmatmul.mubr.f32.gmra.mrb[142].mxu1 %v1975_v61  ;;  %v469_v3 = vpop.f32.mrb[37].mxu0  ;;  %v2235_v61 = vld [vmem:[#allocation4 + $0x60] sm:$0xff]  ;;  %v2539_v13 = vld [vmem:[#allocation2 + $0x678] sm:$0xff] }
 0x1ef   :  { %5879 = vmatprep.mubr.msk.f32.mxu1 %vm238_vm0, %v2525_v41  ;;  %v2236_v41 = vld [vmem:[#allocation4 + $0x68] sm:$0xff] }
 0x1f0   :  { %v8889_v3 = vpack.c.bf16 %v2236_v41, %v2235_v61  ;;  %v2564_v61 = vld [vmem:[#allocation2 + $0x740] sm:$0xff] }
 0x1f1   :  { %v782_v7 = vpop.f32.mrb[38].mxu1  ;;  %v8855_v10 = vpop.f32.mrb[38].mxu0  ;;  %v2830_v41 = vld [vmem:[#allocation4 + $0x80] sm:$0xff] }
 0x1f2   :  { %v784_v11 = vpop.f32.mrb[39].mxu1  ;;  %6533 = vmatmul.mubr.msk.f32.gmra.mrb[66].mxu0 %vm811_vm4, %v782_v7  ;;  %2709 = vmatmul.mubr.f32.vlgmr.msra.gmra.mrb[144].mxu1 %v2524_v16  ;;  %v474_v14 = vpop.f32.mrb[39].mxu0  ;;  %v2541_v16 = vld [vmem:[#allocation2 + $0x688] sm:$0xff] }
 0x1f3   :  { %5880 = vmatprep.mubr.msk.f32.mxu1 %vm238_vm0, %v2527_v44  ;;  %v2543_v44 = vld [vmem:[#allocation2 + $0x698] sm:$0xff]  ;;  %v2545_v14 = vld [vmem:[#allocation2 + $0x6a8] sm:$0xff] }
 0x1f5   :  { %v787_v17 = vpop.f32.mrb[40].mxu1  ;;  %v8859_v21 = vpop.f32.mrb[40].mxu0 }
 0x1f6   :  { %v789_v22 = vpop.f32.mrb[41].mxu1  ;;  %6535 = vmatprep.mubr.msk.f32.mxu0 %vm811_vm4, %v787_v17  ;;  %2714 = vmatmul.mubr.f32.gmra.mrb[146].mxu1 %v2526_v15  ;;  %v479_v24 = vpop.f32.mrb[41].mxu0 }
 0x1f7   :  { %5881 = vmatprep.mubr.msk.f32.mxu1 %vm238_vm0, %v2529_v20  ;;  %v2547_v20 = vld [vmem:[#allocation2 + $0x6b8] sm:$0xff]  ;;  %v2549_v22 = vld [vmem:[#allocation2 + $0x6c8] sm:$0xff] }
 0x1f9   :  { %v792_v30 = vpop.f32.mrb[42].mxu1  ;;  %v8863_v26 = vpop.f32.mrb[42].mxu0 }
 0x1fa   :  { %v794_v33 = vpop.f32.mrb[43].mxu1  ;;  %6536 = vmatmul.mubr.msk.f32.gmra.mrb[68].mxu0 %vm811_vm4, %v792_v30  ;;  %2719 = vmatmul.mubr.f32.gmra.mrb[148].mxu1 %v2528_v25  ;;  %v484_v36 = vpop.f32.mrb[43].mxu0  ;;  %v2551_v25 = vld [vmem:[#allocation2 + $0x6d8] sm:$0xff]  ;;  %v2553_v30 = vld [vmem:[#allocation2 + $0x6e8] sm:$0xff] }
 0x1fb   :  { %5882 = vmatprep.mubr.msk.f32.mxu1 %vm238_vm0, %v2531_v28  ;;  %v2555_v36 = vld [vmem:[#allocation2 + $0x6f8] sm:$0xff] }
 0x1fd   :  { %v797_v29 = vpop.f32.mrb[44].mxu1  ;;  %v8867_v45 = vpop.f32.mrb[44].mxu0 }
 0x1fe   :  { %v799_v46 = vpop.f32.mrb[45].mxu1  ;;  %6538 = vmatprep.mubr.msk.f32.mxu0 %vm811_vm4, %v797_v29  ;;  %2724 = vmatmul.mubr.f32.gmra.mrb[150].mxu1 %v2530_v37  ;;  %v489_v47 = vpop.f32.mrb[45].mxu0 }
 0x1ff   :  { %5883 = vmatprep.mubr.msk.f32.mxu1 %vm238_vm0, %v2533_v40  ;;  %v2557_v40 = vld [vmem:[#allocation2 + $0x708] sm:$0xff]  ;;  %v2559_v46 = vld [vmem:[#allocation2 + $0x718] sm:$0xff] }
 0x201   :  { %v802_v51 = vpop.f32.mrb[46].mxu1  ;;  %v8871_v52 = vpop.f32.mrb[46].mxu0 }
 0x202   :  { %v804_v53 = vpop.f32.mrb[47].mxu1  ;;  %6539 = vmatmul.mubr.msk.f32.gmra.mrb[70].mxu0 %vm811_vm4, %v802_v51  ;;  %2729 = vmatmul.mubr.f32.gmra.mrb[152].mxu1 %v2532_v48  ;;  %v494_v57 = vpop.f32.mrb[47].mxu0  ;;  %v2237_v48 = vld [vmem:[#allocation4 + $0x70] sm:$0xff]  ;;  %v2561_v51 = vld [vmem:[#allocation2 + $0x728] sm:$0xff] }
 0x203   :  { %6549 = vmatprep.mubr.msk.f32.mxu0 %vm811_vm4, %v8754_v62  ;;  %5884 = vmatprep.mubr.msk.f32.mxu1 %vm238_vm0, %v2535_v50  ;;  %v2536_v62 = vld [vmem:[#allocation2 + $0x660] sm:$0xff]  ;;  %v2238_v50 = vld [vmem:[#allocation4 + $0x78] sm:$0xf] }
 0x204   :  { %v7449_v53 = vpack.c.bf16 %v2238_v50, %v2237_v48 }
 0x205   :  { %v8877_v4 = vpop.f32.mrb[48].mxu1 }
 0x206   :  { %6550 = vmatmul.mubr.msk.f32.vlgmr.msra.gmra.mrb[48].mxu0 %vm811_vm4, %v8760_v8  ;;  %v1522_v9 = vpop.f32.mrb[49].mxu1  ;;  %2734 = vmatmul.mubr.f32.gmra.mrb[154].mxu1 %v2534_v58 }
 0x207   :  { %6552 = vmatprep.mubr.msk.f32.mxu0 %vm811_vm4, %v8769_v18  ;;  %5885 = vmatprep.mubr.msk.f32.mxu1 %vm238_vm0, %v2537_v38  ;;  %v2538_v18 = vld [vmem:[#allocation2 + $0x670] sm:$0xff] }
 0x208   :  { %7396 = vmatpush3.bf16.msra.mxu0 %v8771_v19  ;;  %v2562_v38 = vld [vmem:[#allocation2 + $0x730] sm:$0xff] }
 0x209   :  { %v8885_v2 = vpop.f32.mrb[50].mxu1  ;;  %7399 = vmatprep.subr.msk.bf16.mxu0 %vm8671_vm3, %v7397_v6 }
 0x20a   :  { %6553 = vmatmul.mubr.msk.f32.gmra.mrb[50].mxu0 %vm811_vm4, %v8779_v27  ;;  %v1527_v8 = vpop.f32.mrb[51].mxu1  ;;  %2739 = vmatmul.mubr.f32.gmra.mrb[156].mxu1 %v2536_v62  ;;  %v2831_v62 = vld [vmem:[#allocation4 + $0x88] sm:$0xff] }
 0x20b   :  { %6555 = vmatprep.mubr.msk.f32.mxu0 %vm811_vm4, %v8786_v34  ;;  %5886 = vmatprep.mubr.msk.f32.mxu1 %vm238_vm0, %v2539_v13  ;;  %v2540_v34 = vld [vmem:[#allocation2 + $0x680] sm:$0xff]  ;;  %v2567_v13 = vld [vmem:[#allocation2 + $0x758] sm:$0xff] }
 0x20c   :  { %7402 = vmatpush3.bf16.msk.msra.mxu0 %vm8671_vm3, %v7397_v6 }
 0x20d   :  { %v8898_v19 = vpop.f32.mrb[52].mxu1  ;;  %7446 = vmatprep.subr.bf16.mxu0 %v8889_v3 }
 0x20e   :  { %6556 = vmatmul.mubr.msk.f32.gmra.mrb[52].mxu0 %vm811_vm4, %v8792_v43  ;;  %v1532_v27 = vpop.f32.mrb[53].mxu1  ;;  %2744 = vmatmul.mubr.f32.gmra.mrb[158].mxu1 %v2538_v18  ;;  %v2542_v43 = vld [vmem:[#allocation2 + $0x690] sm:$0xff] }
 0x20f   :  { %6558 = vmatprep.mubr.msk.f32.mxu0 %vm811_vm4, %v8798_v49  ;;  %5887 = vmatprep.mubr.msk.f32.mxu1 %vm238_vm0, %v2541_v16  ;;  %v2566_v18 = vld [vmem:[#allocation2 + $0x750] sm:$0xff]  ;;  %v2569_v16 = vld [vmem:[#allocation2 + $0x768] sm:$0xff] }
 0x211   :  { %v8906_v7 = vpop.f32.mrb[54].mxu1 }
 0x212   :  { %6559 = vmatmul.mubr.msk.f32.gmra.mrb[54].mxu0 %vm811_vm4, %v8804_v54  ;;  %v1537_v11 = vpop.f32.mrb[55].mxu1  ;;  %2749 = vmatmul.mubr.f32.gmra.mrb[160].mxu1 %v2540_v34  ;;  %v2544_v54 = vld [vmem:[#allocation2 + $0x6a0] sm:$0xff] }
 0x213   :  { %6561 = vmatprep.mubr.msk.f32.mxu0 %vm811_vm4, %v8810_v59  ;;  %5888 = vmatprep.mubr.msk.f32.mxu1 %vm238_vm0, %v2543_v44  ;;  %v2568_v34 = vld [vmem:[#allocation2 + $0x760] sm:$0xff]  ;;  %v2571_v44 = vld [vmem:[#allocation2 + $0x778] sm:$0xff] }
 0x215   :  { %v8913_v15 = vpop.f32.mrb[56].mxu1 }
 0x216   :  { %6562 = vmatmul.mubr.msk.f32.gmra.mrb[56].mxu0 %vm811_vm4, %v8815_v63  ;;  %v1542_v49 = vpop.f32.mrb[57].mxu1  ;;  %2754 = vmatmul.mubr.f32.gmra.mrb[162].mxu1 %v2542_v43  ;;  %v2546_v63 = vld [vmem:[#allocation2 + $0x6b0] sm:$0xff] }
 0x217   :  { %6564 = vmatprep.mubr.msk.f32.mxu0 %vm811_vm4, %v8819_v5  ;;  %5889 = vmatprep.mubr.msk.f32.mxu1 %vm238_vm0, %v2545_v14  ;;  %v2570_v43 = vld [vmem:[#allocation2 + $0x770] sm:$0xff] }
 0x219   :  { %v8920_v17 = vpop.f32.mrb[58].mxu1 }
 0x21a   :  { %6565 = vmatmul.mubr.msk.f32.gmra.mrb[58].mxu0 %vm811_vm4, %v8823_v12  ;;  %v1547_v59 = vpop.f32.mrb[59].mxu1  ;;  %2759 = vmatmul.mubr.f32.gmra.mrb[164].mxu1 %v2544_v54  ;;  %v2548_v12 = vld [vmem:[#allocation2 + $0x6c0] sm:$0xff] }
 0x21b   :  { %6567 = vmatprep.mubr.msk.f32.mxu0 %vm811_vm4, %v8827_v23  ;;  %5890 = vmatprep.mubr.msk.f32.mxu1 %vm238_vm0, %v2547_v20 }
 0x21d   :  { %v8927_v24 = vpop.f32.mrb[60].mxu1 }
 0x21e   :  { %6568 = vmatmul.mubr.msk.f32.gmra.mrb[60].mxu0 %vm811_vm4, %v8831_v31  ;;  %v1552_v5 = vpop.f32.mrb[61].mxu1  ;;  %2764 = vmatmul.mubr.f32.gmra.mrb[166].mxu1 %v2546_v63  ;;  %v2550_v31 = vld [vmem:[#allocation2 + $0x6d0] sm:$0xff] }
 0x21f   :  { %6570 = vmatprep.mubr.msk.f32.mxu0 %vm811_vm4, %v8835_v42  ;;  %5891 = vmatprep.mubr.msk.f32.mxu1 %vm238_vm0, %v2549_v22 }
 0x221   :  { %v8934_v28 = vpop.f32.mrb[62].mxu1 }
 0x222   :  { %6571 = vmatmul.mubr.msk.f32.gmra.mrb[62].mxu0 %vm811_vm4, %v8839_v32  ;;  %v1557_v23 = vpop.f32.mrb[63].mxu1  ;;  %2769 = vmatmul.mubr.f32.gmra.mrb[168].mxu1 %v2548_v12  ;;  %v2552_v32 = vld [vmem:[#allocation2 + $0x6e0] sm:$0xff] }
 0x223   :  { %6573 = vmatprep.mubr.msk.f32.mxu0 %vm811_vm4, %v8843_v55  ;;  %5892 = vmatprep.mubr.msk.f32.mxu1 %vm238_vm0, %v2551_v25  ;;  %v2833_v23 = vld [vmem:[#allocation4 + $0x98] sm:$0xf] }
 0x225   :  { %v8941_v33 = vpop.f32.mrb[64].mxu1 }
 0x226   :  { %6574 = vmatmul.mubr.msk.f32.gmra.mrb[64].mxu0 %vm811_vm4, %v8847_v60  ;;  %v1562_v42 = vpop.f32.mrb[65].mxu1  ;;  %2774 = vmatmul.mubr.f32.gmra.mrb[170].mxu1 %v2550_v31  ;;  %v2554_v60 = vld [vmem:[#allocation2 + $0x6f0] sm:$0xff] }
 0x227   :  { %6576 = vmatprep.mubr.msk.f32.mxu0 %vm811_vm4, %v8851_v1  ;;  %5893 = vmatprep.mubr.msk.f32.mxu1 %vm238_vm0, %v2553_v30 }
 0x229   :  { %v8948_v37 = vpop.f32.mrb[66].mxu1 }
 0x22a   :  { %6577 = vmatmul.mubr.msk.f32.gmra.mrb[66].mxu0 %vm811_vm4, %v8855_v10  ;;  %v1567_v55 = vpop.f32.mrb[67].mxu1  ;;  %2779 = vmatmul.mubr.f32.gmra.mrb[172].mxu1 %v2552_v32  ;;  %v2556_v10 = vld [vmem:[#allocation2 + $0x700] sm:$0xff] }
 0x22b   :  { %6579 = vmatprep.mubr.msk.f32.mxu0 %vm811_vm4, %v8859_v21  ;;  %5894 = vmatprep.mubr.msk.f32.mxu1 %vm238_vm0, %v2555_v36 }
 0x22d   :  { %v1570_v29 = vpop.f32.mrb[68].mxu1 }
 0x22e   :  { %6580 = vmatmul.mubr.msk.f32.gmra.mrb[68].mxu0 %vm811_vm4, %v8863_v26  ;;  %v1572_v1 = vpop.f32.mrb[69].mxu1  ;;  %2784 = vmatmul.mubr.f32.gmra.mrb[174].mxu1 %v2554_v60  ;;  %v2558_v26 = vld [vmem:[#allocation2 + $0x710] sm:$0xff] }
 0x22f   :  { %6582 = vmatprep.mubr.msk.f32.mxu0 %vm811_vm4, %v8867_v45  ;;  %5895 = vmatprep.mubr.msk.f32.mxu1 %vm238_vm0, %v2557_v40 }
 0x231   :  { %v1575_v47 = vpop.f32.mrb[70].mxu1 }
 0x232   :  { %6583 = vmatmul.mubr.msk.f32.gmra.mrb[70].mxu0 %vm811_vm4, %v8871_v52  ;;  %v1577_v21 = vpop.f32.mrb[71].mxu1  ;;  %2789 = vmatmul.mubr.f32.gmra.mrb[176].mxu1 %v2556_v10  ;;  %v2560_v52 = vld [vmem:[#allocation2 + $0x720] sm:$0xff] }
 0x233   :  { %6593 = vmatprep.mubr.msk.f32.mxu0 %vm811_vm4, %v8877_v4  ;;  %5896 = vmatprep.mubr.msk.f32.mxu1 %vm238_vm0, %v2559_v46  ;;  %v2565_v4 = vld [vmem:[#allocation2 + $0x748] sm:$0xff] }
 0x235   :  { %v1580_v45 = vpop.f32.mrb[72].mxu1 }
 0x236   :  { %v1582_v35 = vpop.f32.mrb[73].mxu1  ;;  %6594 = vmatmul.mubr.msk.f32.vlgmr.msra.gmra.mrb[48].mxu0 %vm811_vm4, %v8885_v2  ;;  %2794 = vmatmul.mubr.f32.gmra.mrb[178].mxu1 %v2558_v26  ;;  %v7497_v2 = vpack.c.bf16 %v2831_v62, %v2830_v41 }
 0x237   :  { %6596 = vmatprep.mubr.msk.f32.mxu0 %vm811_vm4, %v8898_v19  ;;  %5897 = vmatprep.mubr.msk.f32.mxu1 %vm238_vm0, %v2561_v51 }
 0x238   :  { %7448 = vmatpush3.bf16.msra.mxu0 %v8889_v3 }
 0x239   :  { %v1585_v57 = vpop.f32.mrb[74].mxu1  ;;  %7451 = vmatprep.subr.msk.bf16.mxu0 %vm8671_vm3, %v7449_v53 }
 0x23a   :  { %v1587_v58 = vpop.f32.mrb[75].mxu1  ;;  %6597 = vmatmul.mubr.msk.f32.gmra.mrb[50].mxu0 %vm811_vm4, %v8906_v7  ;;  %2799 = vmatmul.mubr.f32.gmra.mrb[180].mxu1 %v2560_v52 }
 0x23b   :  { %6599 = vmatprep.mubr.msk.f32.mxu0 %vm811_vm4, %v8913_v15  ;;  %5898 = vmatprep.mubr.msk.f32.mxu1 %vm238_vm0, %v2563_v56 }
 0x23c   :  { %7454 = vmatpush3.bf16.msk.msra.mxu0 %vm8671_vm3, %v7449_v53 }
 0x23d   :  { %v1590_v6 = vpop.f32.mrb[76].mxu1  ;;  %7498 = vmatprep.subr.bf16.mxu0 %v7497_v2 }
 0x23e   :  { %v1592_v9 = vpop.f32.mrb[77].mxu1  ;;  %6600 = vmatmul.mubr.msk.f32.gmra.mrb[52].mxu0 %vm811_vm4, %v8920_v17  ;;  %2804 = vmatmul.mubr.f32.gmra.mrb[182].mxu1 %v2562_v38 }
 0x23f   :  { %6602 = vmatprep.mubr.msk.f32.mxu0 %vm811_vm4, %v8927_v24  ;;  %5899 = vmatprep.mubr.msk.f32.mxu1 %vm238_vm0, %v2565_v4 }
 0x241   :  { %v1595_v3 = vpop.f32.mrb[78].mxu1 }
 0x242   :  { %v1597_v8 = vpop.f32.mrb[79].mxu1  ;;  %6603 = vmatmul.mubr.msk.f32.gmra.mrb[54].mxu0 %vm811_vm4, %v8934_v28  ;;  %2809 = vmatmul.mubr.f32.gmra.mrb[184].mxu1 %v2564_v61  ;;  %v2832_v28 = vld [vmem:[#allocation4 + $0x90] sm:$0xff] }
 0x243   :  { %6605 = vmatprep.mubr.msk.f32.mxu0 %vm811_vm4, %v8941_v33  ;;  %5900 = vmatprep.mubr.msk.f32.mxu1 %vm238_vm0, %v2567_v13  ;;  %v7501_v30 = vpack.c.bf16 %v2833_v23, %v2832_v28 }
 0x245   :  { %v1600_v19 = vpop.f32.mrb[80].mxu1 }
 0x246   :  { %v1602_v27 = vpop.f32.mrb[81].mxu1  ;;  %6606 = vmatmul.mubr.msk.f32.gmra.mrb[56].mxu0 %vm811_vm4, %v8948_v37  ;;  %2814 = vmatmul.mubr.f32.gmra.mrb[186].mxu1 %v2566_v18 }
 0x247   :  { %6608 = vmatprep.mubr.msk.f32.mxu0 %vm811_vm4, %v1570_v29  ;;  %5901 = vmatprep.mubr.msk.f32.mxu1 %vm238_vm0, %v2569_v16 }
 0x249   :  { %v1605_v7 = vpop.f32.mrb[82].mxu1 }
 0x24a   :  { %v1607_v11 = vpop.f32.mrb[83].mxu1  ;;  %6609 = vmatmul.mubr.msk.f32.gmra.mrb[58].mxu0 %vm811_vm4, %v1575_v47  ;;  %2819 = vmatmul.mubr.f32.gmra.mrb[188].mxu1 %v2568_v34 }
 0x24b   :  { %6611 = vmatprep.mubr.msk.f32.mxu0 %vm811_vm4, %v1580_v45  ;;  %5902 = vmatprep.mubr.msk.f32.mxu1 %vm238_vm0, %v2571_v44 }
 0x24d   :  { %v1610_v14 = vpop.f32.mrb[84].mxu1 }
 0x24e   :  { %v1612_v15 = vpop.f32.mrb[85].mxu1  ;;  %6612 = vmatmul.mubr.msk.f32.gmra.mrb[60].mxu0 %vm811_vm4, %v1585_v57  ;;  %2824 = vmatmul.mubr.f32.gmra.mrb[190].mxu1 %v2570_v43 }
 0x24f   :  { %6614 = vmatprep.mubr.msk.f32.mxu0 %vm811_vm4, %v1590_v6 }
 0x251   :  { %v1615_v49 = vpop.f32.mrb[86].mxu1 }
 0x252   :  { %v1617_v54 = vpop.f32.mrb[87].mxu1  ;;  %6615 = vmatmul.mubr.msk.f32.gmra.mrb[62].mxu0 %vm811_vm4, %v1595_v3 }
 0x253   :  { %6617 = vmatprep.mubr.msk.f32.mxu0 %vm811_vm4, %v1600_v19 }
 0x255   :  { %v1620_v20 = vpop.f32.mrb[88].mxu1 }
 0x256   :  { %v1622_v17 = vpop.f32.mrb[89].mxu1  ;;  %6618 = vmatmul.mubr.msk.f32.gmra.mrb[64].mxu0 %vm811_vm4, %v1605_v7 }
 0x257   :  { %6620 = vmatprep.mubr.msk.f32.mxu0 %vm811_vm4, %v1610_v14 }
 0x259   :  { %v1625_v59 = vpop.f32.mrb[90].mxu1 }
 0x25a   :  { %v1627_v63 = vpop.f32.mrb[91].mxu1  ;;  %6621 = vmatmul.mubr.msk.f32.gmra.mrb[66].mxu0 %vm811_vm4, %v1615_v49 }
 0x25b   :  { %6623 = vmatprep.mubr.msk.f32.mxu0 %vm811_vm4, %v1620_v20 }
 0x25d   :  { %v1630_v22 = vpop.f32.mrb[92].mxu1 }
 0x25e   :  { %v1632_v24 = vpop.f32.mrb[93].mxu1  ;;  %6624 = vmatmul.mubr.msk.f32.gmra.mrb[68].mxu0 %vm811_vm4, %v1625_v59 }
 0x25f   :  { %6626 = vmatprep.mubr.msk.f32.mxu0 %vm811_vm4, %v1630_v22 }
 0x261   :  { %v1635_v5 = vpop.f32.mrb[94].mxu1 }
 0x262   :  { %v1637_v12 = vpop.f32.mrb[95].mxu1  ;;  %6627 = vmatmul.mubr.msk.f32.gmra.mrb[70].mxu0 %vm811_vm4, %v1635_v5 }
 0x265   :  { %v2115_v25 = vpop.f32.mrb[96].mxu1 }
 0x266   :  { %v2117_v31 = vpop.f32.mrb[97].mxu1  ;;  %6637 = vmatprep.mubr.msk.f32.mxu0 %vm811_vm4, %v2115_v25 }
 0x269   :  { %v2120_v33 = vpop.f32.mrb[98].mxu1 }
 0x26a   :  { %v2122_v42 = vpop.f32.mrb[99].mxu1  ;;  %6638 = vmatmul.mubr.msk.f32.vlgmr.msra.gmra.mrb[48].mxu0 %vm811_vm4, %v2120_v33 }
 0x26b   :  { %7500 = vmatpush3.bf16.msra.mxu0 %v7497_v2 }
 0x26c   :  { %7503 = vmatprep.subr.msk.bf16.mxu0 %vm8671_vm3, %v7501_v30 }
 0x26d   :  { %v2125_v32 = vpop.f32.mrb[100].mxu1 }
 0x26e   :  { %v2127_v36 = vpop.f32.mrb[101].mxu1  ;;  %6640 = vmatprep.mubr.msk.f32.mxu0 %vm811_vm4, %v2125_v32 }
 0x26f   :  { %7506 = vmatpush3.bf16.msk.msra.mxu0 %vm8671_vm3, %v7501_v30 }
 0x270   :  { %7507 = vmatprep.subr.bf16.mxu0 %v8209_v0 }
 0x271   :  { %v2130_v37 = vpop.f32.mrb[102].mxu1 }
 0x272   :  { %v2132_v55 = vpop.f32.mrb[103].mxu1  ;;  %6641 = vmatmul.mubr.msk.f32.gmra.mrb[50].mxu0 %vm811_vm4, %v2130_v37 }
 0x275   :  { %v2135_v60 = vpop.f32.mrb[104].mxu1 }
 0x276   :  { %v2137_v40 = vpop.f32.mrb[105].mxu1  ;;  %6643 = vmatprep.mubr.msk.f32.mxu0 %vm811_vm4, %v2135_v60 }
 0x279   :  { %v2140_v29 = vpop.f32.mrb[106].mxu1 }
 0x27a   :  { %v2142_v1 = vpop.f32.mrb[107].mxu1  ;;  %6644 = vmatmul.mubr.msk.f32.gmra.mrb[52].mxu0 %vm811_vm4, %v2140_v29 }
 0x27d   :  { %v2145_v10 = vpop.f32.mrb[108].mxu1 }
 0x27e   :  { %v2147_v46 = vpop.f32.mrb[109].mxu1  ;;  %6646 = vmatprep.mubr.msk.f32.mxu0 %vm811_vm4, %v2145_v10 }
 0x281   :  { %v2150_v39 = vpop.f32.mrb[110].mxu1 }
 0x282   :  { %v2152_v47 = vpop.f32.mrb[111].mxu1  ;;  %6647 = vmatmul.mubr.msk.f32.gmra.mrb[54].mxu0 %vm811_vm4, %v2150_v39 }
 0x285   :  { %v2155_v21 = vpop.f32.mrb[112].mxu1 }
 0x286   :  { %v2157_v48 = vpop.f32.mrb[113].mxu1  ;;  %6649 = vmatprep.mubr.msk.f32.mxu0 %vm811_vm4, %v2155_v21 }
 0x289   :  { %v2160_v50 = vpop.f32.mrb[114].mxu1 }
 0x28a   :  { %v2162_v26 = vpop.f32.mrb[115].mxu1  ;;  %6650 = vmatmul.mubr.msk.f32.gmra.mrb[56].mxu0 %vm811_vm4, %v2160_v50 }
 0x28d   :  { %v2165_v51 = vpop.f32.mrb[116].mxu1 }
 0x28e   :  { %v2167_v45 = vpop.f32.mrb[117].mxu1  ;;  %6652 = vmatprep.mubr.msk.f32.mxu0 %vm811_vm4, %v2165_v51 }
 0x291   :  { %v2170_v53 = vpop.f32.mrb[118].mxu1 }
 0x292   :  { %v2172_v35 = vpop.f32.mrb[119].mxu1  ;;  %6653 = vmatmul.mubr.msk.f32.gmra.mrb[58].mxu0 %vm811_vm4, %v2170_v53 }
 0x295   :  { %v2175_v52 = vpop.f32.mrb[120].mxu1 }
 0x296   :  { %v2177_v56 = vpop.f32.mrb[121].mxu1  ;;  %6655 = vmatprep.mubr.msk.f32.mxu0 %vm811_vm4, %v2175_v52 }
 0x299   :  { %v2180_v57 = vpop.f32.mrb[122].mxu1 }
 0x29a   :  { %v2182_v58 = vpop.f32.mrb[123].mxu1  ;;  %6656 = vmatmul.mubr.msk.f32.gmra.mrb[60].mxu0 %vm811_vm4, %v2180_v57 }
 0x29d   :  { %v2185_v38 = vpop.f32.mrb[124].mxu1 }
 0x29e   :  { %v2187_v4 = vpop.f32.mrb[125].mxu1  ;;  %6658 = vmatprep.mubr.msk.f32.mxu0 %vm811_vm4, %v2185_v38 }
 0x2a1   :  { %v2190_v6 = vpop.f32.mrb[126].mxu1 }
 0x2a2   :  { %v2192_v9 = vpop.f32.mrb[127].mxu1  ;;  %6659 = vmatmul.mubr.msk.f32.gmra.mrb[62].mxu0 %vm811_vm4, %v2190_v6 }
 0x2a5   :  { %v2195_v61 = vpop.f32.mrb[128].mxu1 }
 0x2a6   :  { %v2197_v41 = vpop.f32.mrb[129].mxu1  ;;  %6661 = vmatprep.mubr.msk.f32.mxu0 %vm811_vm4, %v2195_v61 }
 0x2a7   :  { %v3119_v41 = vld [vmem:[%s9565_s4 + $0x8] sm:$0xff] }
 0x2a9   :  { %v2200_v62 = vpop.f32.mrb[130].mxu1 }
 0x2aa   :  { %v2202_v13 = vpop.f32.mrb[131].mxu1  ;;  %6662 = vmatmul.mubr.msk.f32.gmra.mrb[64].mxu0 %vm811_vm4, %v2200_v62 }
 0x2ad   :  { %v2205_v2 = vpop.f32.mrb[132].mxu1 }
 0x2ae   :  { %v2207_v3 = vpop.f32.mrb[133].mxu1  ;;  %6664 = vmatprep.mubr.msk.f32.mxu0 %vm811_vm4, %v2205_v2 }
 0x2b1   :  { %v2210_v8 = vpop.f32.mrb[134].mxu1 }
 0x2b2   :  { %v2212_v18 = vpop.f32.mrb[135].mxu1  ;;  %6665 = vmatmul.mubr.msk.f32.gmra.mrb[66].mxu0 %vm811_vm4, %v2210_v8 }
 0x2b5   :  { %v2215_v16 = vpop.f32.mrb[136].mxu1 }
 0x2b6   :  { %v2217_v19 = vpop.f32.mrb[137].mxu1  ;;  %6667 = vmatprep.mubr.msk.f32.mxu0 %vm811_vm4, %v2215_v16 }
 0x2b9   :  { %v2220_v27 = vpop.f32.mrb[138].mxu1 }
 0x2ba   :  { %v2222_v34 = vpop.f32.mrb[139].mxu1  ;;  %6668 = vmatmul.mubr.msk.f32.gmra.mrb[68].mxu0 %vm811_vm4, %v2220_v27 }
 0x2bd   :  { %v2225_v44 = vpop.f32.mrb[140].mxu1 }
 0x2be   :  { %v2227_v7 = vpop.f32.mrb[141].mxu1  ;;  %6670 = vmatprep.mubr.msk.f32.mxu0 %vm811_vm4, %v2225_v44 }
 0x2c1   :  { %v2230_v11 = vpop.f32.mrb[142].mxu1 }
 0x2c2   :  { %v2232_v43 = vpop.f32.mrb[143].mxu1  ;;  %6671 = vmatmul.mubr.msk.f32.gmra.mrb[70].mxu0 %vm811_vm4, %v2230_v11 }
 0x2c5   :  { %v2710_v14 = vpop.f32.mrb[144].mxu1 }
 0x2c6   :  { %v2712_v15 = vpop.f32.mrb[145].mxu1  ;;  %6681 = vmatprep.mubr.msk.f32.mxu0 %vm811_vm4, %v2710_v14 }
 0x2c9   :  { %v2715_v49 = vpop.f32.mrb[146].mxu1 }
 0x2ca   :  { %v2717_v54 = vpop.f32.mrb[147].mxu1  ;;  %6682 = vmatmul.mubr.msk.f32.vlgmr.msra.gmra.mrb[48].mxu0 %vm811_vm4, %v2715_v49 }
 0x2cd   :  { %v2720_v20 = vpop.f32.mrb[148].mxu1 }
 0x2ce   :  { %v2722_v17 = vpop.f32.mrb[149].mxu1  ;;  %6684 = vmatprep.mubr.msk.f32.mxu0 %vm811_vm4, %v2720_v20 }
 0x2d1   :  { %v2725_v59 = vpop.f32.mrb[150].mxu1 }
 0x2d2   :  { %v2727_v63 = vpop.f32.mrb[151].mxu1  ;;  %6685 = vmatmul.mubr.msk.f32.gmra.mrb[50].mxu0 %vm811_vm4, %v2725_v59 }
 0x2d5   :  { %v2730_v22 = vpop.f32.mrb[152].mxu1 }
 0x2d6   :  { %v2732_v24 = vpop.f32.mrb[153].mxu1  ;;  %6687 = vmatprep.mubr.msk.f32.mxu0 %vm811_vm4, %v2730_v22 }
 0x2d9   :  { %v2735_v5 = vpop.f32.mrb[154].mxu1 }
 0x2da   :  { %v2737_v12 = vpop.f32.mrb[155].mxu1  ;;  %6688 = vmatmul.mubr.msk.f32.gmra.mrb[52].mxu0 %vm811_vm4, %v2735_v5 }
 0x2dd   :  { %v2740_v25 = vpop.f32.mrb[156].mxu1 }
 0x2de   :  { %v2742_v28 = vpop.f32.mrb[157].mxu1  ;;  %6690 = vmatprep.mubr.msk.f32.mxu0 %vm811_vm4, %v2740_v25 }
 0x2e1   :  { %v2745_v23 = vpop.f32.mrb[158].mxu1 }
 0x2e2   :  { %v2747_v31 = vpop.f32.mrb[159].mxu1  ;;  %6691 = vmatmul.mubr.msk.f32.gmra.mrb[54].mxu0 %vm811_vm4, %v2745_v23 }
 0x2e5   :  { %v2750_v30 = vpop.f32.mrb[160].mxu1 }
 0x2e6   :  { %v2752_v33 = vpop.f32.mrb[161].mxu1  ;;  %6693 = vmatprep.mubr.msk.f32.mxu0 %vm811_vm4, %v2750_v30 }
 0x2e9   :  { %v2755_v42 = vpop.f32.mrb[162].mxu1 }
 0x2ea   :  { %v2757_v32 = vpop.f32.mrb[163].mxu1  ;;  %6694 = vmatmul.mubr.msk.f32.gmra.mrb[56].mxu0 %vm811_vm4, %v2755_v42 }
 0x2ed   :  { %v2760_v36 = vpop.f32.mrb[164].mxu1 }
 0x2ee   :  { %v2762_v37 = vpop.f32.mrb[165].mxu1  ;;  %6696 = vmatprep.mubr.msk.f32.mxu0 %vm811_vm4, %v2760_v36 }
 0x2f1   :  { %v2765_v55 = vpop.f32.mrb[166].mxu1 }
 0x2f2   :  { %v2767_v60 = vpop.f32.mrb[167].mxu1  ;;  %6697 = vmatmul.mubr.msk.f32.gmra.mrb[58].mxu0 %vm811_vm4, %v2765_v55  ;;  %v3118_v55 = vld [vmem:[%s9565_s4] sm:$0xff] }
 0x2f3   :  { %v3121_v60 = vld [vmem:[%s9565_s4 + $0x18] sm:$0xff] }
 0x2f5   :  { %v2770_v40 = vpop.f32.mrb[168].mxu1 }
 0x2f6   :  { %v2772_v29 = vpop.f32.mrb[169].mxu1  ;;  %6699 = vmatprep.mubr.msk.f32.mxu0 %vm811_vm4, %v2770_v40  ;;  %v3120_v40 = vld [vmem:[%s9565_s4 + $0x10] sm:$0xff] }
 0x2f7   :  { %v3123_v29 = vld [vmem:[%s9565_s4 + $0x28] sm:$0xff] }
 0x2f9   :  { %v2775_v1 = vpop.f32.mrb[170].mxu1 }
 0x2fa   :  { %v2777_v10 = vpop.f32.mrb[171].mxu1  ;;  %6700 = vmatmul.mubr.msk.f32.gmra.mrb[60].mxu0 %vm811_vm4, %v2775_v1  ;;  %v3122_v1 = vld [vmem:[%s9565_s4 + $0x20] sm:$0xff] }
 0x2fb   :  { %v3125_v10 = vld [vmem:[%s9565_s4 + $0x38] sm:$0xff] }
 0x2fd   :  { %v2780_v46 = vpop.f32.mrb[172].mxu1 }
 0x2fe   :  { %v2782_v39 = vpop.f32.mrb[173].mxu1  ;;  %6702 = vmatprep.mubr.msk.f32.mxu0 %vm811_vm4, %v2780_v46  ;;  %v3124_v46 = vld [vmem:[%s9565_s4 + $0x30] sm:$0xff] }
 0x2ff   :  { %v3127_v39 = vld [vmem:[%s9565_s4 + $0x48] sm:$0xff] }
 0x301   :  { %v2785_v47 = vpop.f32.mrb[174].mxu1 }
 0x302   :  { %v2787_v21 = vpop.f32.mrb[175].mxu1  ;;  %6703 = vmatmul.mubr.msk.f32.gmra.mrb[62].mxu0 %vm811_vm4, %v2785_v47  ;;  %v3126_v47 = vld [vmem:[%s9565_s4 + $0x40] sm:$0xff] }
 0x303   :  { %v3129_v21 = vld [vmem:[%s9565_s4 + $0x58] sm:$0xff] }
 0x305   :  { %v2790_v48 = vpop.f32.mrb[176].mxu1 }
 0x306   :  { %v2792_v50 = vpop.f32.mrb[177].mxu1  ;;  %6705 = vmatprep.mubr.msk.f32.mxu0 %vm811_vm4, %v2790_v48  ;;  %v3128_v48 = vld [vmem:[%s9565_s4 + $0x50] sm:$0xff] }
 0x307   :  { %v3131_v50 = vld [vmem:[%s9565_s4 + $0x68] sm:$0xff] }
 0x309   :  { %v2795_v26 = vpop.f32.mrb[178].mxu1 }
 0x30a   :  { %v2797_v51 = vpop.f32.mrb[179].mxu1  ;;  %6706 = vmatmul.mubr.msk.f32.gmra.mrb[64].mxu0 %vm811_vm4, %v2795_v26  ;;  %v3130_v26 = vld [vmem:[%s9565_s4 + $0x60] sm:$0xff] }
 0x30b   :  { %v3133_v51 = vld [vmem:[%s9565_s4 + $0x78] sm:$0xff] }
 0x30d   :  { %v2800_v45 = vpop.f32.mrb[180].mxu1 }
 0x30e   :  { %v2802_v53 = vpop.f32.mrb[181].mxu1  ;;  %6708 = vmatprep.mubr.msk.f32.mxu0 %vm811_vm4, %v2800_v45  ;;  %v3132_v45 = vld [vmem:[%s9565_s4 + $0x70] sm:$0xff] }
 0x30f   :  { %v3135_v53 = vld [vmem:[%s9565_s4 + $0x88] sm:$0xff] }
 0x311   :  { %v2805_v35 = vpop.f32.mrb[182].mxu1 }
 0x312   :  { %v2807_v52 = vpop.f32.mrb[183].mxu1  ;;  %6709 = vmatmul.mubr.msk.f32.gmra.mrb[66].mxu0 %vm811_vm4, %v2805_v35  ;;  %v3134_v35 = vld [vmem:[%s9565_s4 + $0x80] sm:$0xff] }
 0x313   :  { %v3137_v52 = vld [vmem:[%s9565_s4 + $0x98] sm:$0xff] }
 0x315   :  { %v2810_v56 = vpop.f32.mrb[184].mxu1 }
 0x316   :  { %v2812_v57 = vpop.f32.mrb[185].mxu1  ;;  %6711 = vmatprep.mubr.msk.f32.mxu0 %vm811_vm4, %v2810_v56  ;;  %v3136_v56 = vld [vmem:[%s9565_s4 + $0x90] sm:$0xff] }
 0x317   :  { %v3139_v57 = vld [vmem:[%s9565_s4 + $0xa8] sm:$0xff] }
 0x319   :  { %v2815_v58 = vpop.f32.mrb[186].mxu1 }
 0x31a   :  { %v2817_v38 = vpop.f32.mrb[187].mxu1  ;;  %6712 = vmatmul.mubr.msk.f32.gmra.mrb[68].mxu0 %vm811_vm4, %v2815_v58  ;;  %v3138_v58 = vld [vmem:[%s9565_s4 + $0xa0] sm:$0xff] }
 0x31b   :  { %v3141_v38 = vld [vmem:[%s9565_s4 + $0xb8] sm:$0xff] }
 0x31d   :  { %v2820_v4 = vpop.f32.mrb[188].mxu1 }
 0x31e   :  { %v2822_v6 = vpop.f32.mrb[189].mxu1  ;;  %6714 = vmatprep.mubr.msk.f32.mxu0 %vm811_vm4, %v2820_v4  ;;  %v3140_v4 = vld [vmem:[%s9565_s4 + $0xb0] sm:$0xff] }
 0x31f   :  { %v3470_v6 = vld [vmem:[#allocation6 + $0x40] sm:$0xff] }
 0x320   :  { %6777 = vmatprep.mubr.msk.f32.mxu1 %vm238_vm0, %v3470_v6  ;;  %v3325_v6 = vld [vmem:[#allocation6 + $0x10] sm:$0xff] }
 0x321   :  { %v2825_v9 = vpop.f32.mrb[190].mxu1 }
 0x322   :  { %v2827_v61 = vpop.f32.mrb[191].mxu1  ;;  %6715 = vmatmul.mubr.msk.f32.gmra.mrb[70].mxu0 %vm811_vm4, %v2825_v9  ;;  %v3323_v9 = vld [vmem:[#allocation6] sm:$0xff] }
 0x323   :  { %5929 = vmatprep.mubr.msk.f32.mxu0 %vm3149_vm5, %v3119_v41  ;;  %v9161_v61 = vld [vmem:[%s9564_s3] ss:$0 sm:$0xff] }
 0x39d   :  { %v6683_v62 = vpop.f32.mrb[48].mxu0 }
 0x39e   :  { %v2975_v13 = vpop.f32.mrb[49].mxu0 }
 0x39f   :  { %v7508_v2 = vpack.c.bf16 %v6683_v62, %v2975_v13 }
 0x3a1   :  { %7509 = vmatpush1.bf16.msra.mxu0 %v7508_v2 }
 0x3a2   :  { %7510 = vmatprep.subr.bf16.mxu0 %v8209_v0 }
 0x3a5   :  { %v6686_v3 = vpop.f32.mrb[50].mxu0 }
 0x3a6   :  { %v2985_v8 = vpop.f32.mrb[51].mxu0 }
 0x3a7   :  { %v7511_v18 = vpack.c.bf16 %v6686_v3, %v2985_v8 }
 0x3a9   :  { %7512 = vmatpush1.bf16.msra.mxu0 %v7511_v18 }
 0x3aa   :  { %7513 = vmatprep.subr.bf16.mxu0 %v8209_v0 }
 0x3ad   :  { %v6689_v16 = vpop.f32.mrb[52].mxu0 }
 0x3ae   :  { %v2995_v19 = vpop.f32.mrb[53].mxu0 }
 0x3af   :  { %v7514_v27 = vpack.c.bf16 %v6689_v16, %v2995_v19 }
 0x3b1   :  { %7515 = vmatpush1.bf16.msra.mxu0 %v7514_v27 }
 0x3b2   :  { %7516 = vmatprep.subr.bf16.mxu0 %v8209_v0 }
 0x3b5   :  { %v6692_v34 = vpop.f32.mrb[54].mxu0 }
 0x3b6   :  { %v3005_v44 = vpop.f32.mrb[55].mxu0 }
 0x3b7   :  { %v7517_v7 = vpack.c.bf16 %v6692_v34, %v3005_v44 }
 0x3b9   :  { %7518 = vmatpush1.bf16.msra.mxu0 %v7517_v7 }
 0x3ba   :  { %7519 = vmatprep.subr.bf16.mxu0 %v8209_v0 }
 0x3bd   :  { %v6695_v11 = vpop.f32.mrb[56].mxu0 }
 0x3be   :  { %v3015_v43 = vpop.f32.mrb[57].mxu0 }
 0x3bf   :  { %v7520_v14 = vpack.c.bf16 %v6695_v11, %v3015_v43 }
 0x3c1   :  { %7521 = vmatpush1.bf16.msra.mxu0 %v7520_v14 }
 0x3c2   :  { %7522 = vmatprep.subr.bf16.mxu0 %v8209_v0 }
 0x3c5   :  { %v6698_v15 = vpop.f32.mrb[58].mxu0 }
 0x3c6   :  { %v3025_v49 = vpop.f32.mrb[59].mxu0 }
 0x3c7   :  { %v7523_v54 = vpack.c.bf16 %v6698_v15, %v3025_v49 }
 0x3c9   :  { %7524 = vmatpush1.bf16.msra.mxu0 %v7523_v54 }
 0x3ca   :  { %7525 = vmatprep.subr.bf16.mxu0 %v8209_v0 }
 0x3cd   :  { %v6701_v20 = vpop.f32.mrb[60].mxu0 }
 0x3ce   :  { %v3035_v17 = vpop.f32.mrb[61].mxu0 }
 0x3cf   :  { %v7526_v59 = vpack.c.bf16 %v6701_v20, %v3035_v17 }
 0x3d1   :  { %7527 = vmatpush1.bf16.msra.mxu0 %v7526_v59 }
 0x3d2   :  { %7528 = vmatprep.subr.bf16.mxu0 %v8209_v0 }
 0x3d5   :  { %v6704_v63 = vpop.f32.mrb[62].mxu0 }
 0x3d6   :  { %v3045_v22 = vpop.f32.mrb[63].mxu0 }
 0x3d7   :  { %v7529_v24 = vpack.c.bf16 %v6704_v63, %v3045_v22 }
 0x3d9   :  { %7530 = vmatpush1.bf16.msra.mxu0 %v7529_v24 }
 0x3da   :  { %7531 = vmatprep.subr.bf16.mxu0 %v8209_v0 }
 0x3dd   :  { %v6707_v5 = vpop.f32.mrb[64].mxu0 }
 0x3de   :  { %v3055_v12 = vpop.f32.mrb[65].mxu0 }
 0x3df   :  { %v7532_v25 = vpack.c.bf16 %v6707_v5, %v3055_v12 }
 0x3e1   :  { %7533 = vmatpush1.bf16.msra.mxu0 %v7532_v25 }
 0x3e2   :  { %7534 = vmatprep.subr.bf16.mxu0 %v8209_v0 }
 0x3e5   :  { %v6710_v28 = vpop.f32.mrb[66].mxu0 }
 0x3e6   :  { %v3065_v23 = vpop.f32.mrb[67].mxu0 }
 0x3e7   :  { %v7535_v31 = vpack.c.bf16 %v6710_v28, %v3065_v23 }
 0x3e9   :  { %7536 = vmatpush1.bf16.msra.mxu0 %v7535_v31 }
 0x3ea   :  { %7537 = vmatprep.subr.bf16.mxu0 %v8209_v0 }
 0x3ed   :  { %v6713_v30 = vpop.f32.mrb[68].mxu0 }
 0x3ee   :  { %v3075_v33 = vpop.f32.mrb[69].mxu0 }
 0x3ef   :  { %v7538_v42 = vpack.c.bf16 %v6713_v30, %v3075_v33 }
 0x3f1   :  { %7539 = vmatpush1.bf16.msra.mxu0 %v7538_v42 }
 0x3f2   :  { %7540 = vmatprep.subr.bf16.mxu0 %v8209_v0 }
 0x3f5   :  { %v6716_v32 = vpop.f32.mrb[70].mxu0 }
 0x3f6   :  { %v3085_v36 = vpop.f32.mrb[71].mxu0 }
 0x3f7   :  { %v7541_v37 = vpack.c.bf16 %v6716_v32, %v3085_v36 }
 0x3f9   :  { %7542 = vmatpush1.bf16.msra.mxu0 %v7541_v37 }
 0x3fc   :  { %3251 = vmatmul.mubr.f32.vlgmr.msra.gmra.mrb[72].mxu0 %v3118_v55 }
 0x3fd   :  { %5930 = vmatprep.mubr.msk.f32.mxu0 %vm3149_vm5, %v3121_v60 }
 0x400   :  { %3256 = vmatmul.mubr.f32.gmra.mrb[74].mxu0 %v3120_v40 }
 0x401   :  { %5931 = vmatprep.mubr.msk.f32.mxu0 %vm3149_vm5, %v3123_v29 }
 0x404   :  { %3261 = vmatmul.mubr.f32.gmra.mrb[76].mxu0 %v3122_v1 }
 0x405   :  { %5932 = vmatprep.mubr.msk.f32.mxu0 %vm3149_vm5, %v3125_v10 }
 0x408   :  { %3266 = vmatmul.mubr.f32.gmra.mrb[78].mxu0 %v3124_v46 }
 0x409   :  { %5933 = vmatprep.mubr.msk.f32.mxu0 %vm3149_vm5, %v3127_v39 }
 0x40c   :  { %3271 = vmatmul.mubr.f32.gmra.mrb[80].mxu0 %v3126_v47 }
 0x40d   :  { %5934 = vmatprep.mubr.msk.f32.mxu0 %vm3149_vm5, %v3129_v21 }
 0x410   :  { %3276 = vmatmul.mubr.f32.gmra.mrb[82].mxu0 %v3128_v48 }
 0x411   :  { %5935 = vmatprep.mubr.msk.f32.mxu0 %vm3149_vm5, %v3131_v50 }
 0x414   :  { %3281 = vmatmul.mubr.f32.gmra.mrb[84].mxu0 %v3130_v26 }
 0x415   :  { %5936 = vmatprep.mubr.msk.f32.mxu0 %vm3149_vm5, %v3133_v51 }
 0x418   :  { %3286 = vmatmul.mubr.f32.gmra.mrb[86].mxu0 %v3132_v45  ;;  %v5957_v45 = vld [vmem:[%s9567_s6 + $0x48] sm:$0xff] }
 0x419   :  { %5937 = vmatprep.mubr.msk.f32.mxu0 %vm3149_vm5, %v3135_v53  ;;  %v5958_v53 = vld [vmem:[%s9567_s6 + $0x50] sm:$0xff] }
 0x41c   :  { %3291 = vmatmul.mubr.f32.gmra.mrb[88].mxu0 %v3134_v35 }
 0x41d   :  { %5938 = vmatprep.mubr.msk.f32.mxu0 %vm3149_vm5, %v3137_v52 }
 0x420   :  { %3296 = vmatmul.mubr.f32.gmra.mrb[90].mxu0 %v3136_v56 }
 0x421   :  { %5939 = vmatprep.mubr.msk.f32.mxu0 %vm3149_vm5, %v3139_v57  ;;  %v7591_v57 = vpack.c.bf16 %v5958_v53, %v5957_v45  ;;  %v3464_v53 = vld [vmem:[%s9567_s6 + $0x20] sm:$0xff] }
 0x424   :  { %3301 = vmatmul.mubr.f32.gmra.mrb[92].mxu0 %v3138_v58  ;;  %v3471_v58 = vld [vmem:[#allocation6 + $0x48] sm:$0xff] }
 0x425   :  { %5940 = vmatprep.mubr.msk.f32.mxu0 %vm3149_vm5, %v3141_v38  ;;  %v3324_v38 = vld [vmem:[#allocation6 + $0x8] sm:$0xff] }
 0x428   :  { %3306 = vmatmul.mubr.f32.gmra.mrb[94].mxu0 %v3140_v4  ;;  %v3472_v4 = vld [vmem:[#allocation6 + $0x50] sm:$0xff] }
 0x429   :  { %6741 = vmatprep.mubr.msk.f32.mxu0 %vm238_vm0, %v3323_v9  ;;  %v5959_v9 = vld [vmem:[%s9567_s6 + $0x58] sm:$0xff] }
 0x4cf   :  { %v3252_v41 = vpop.f32.mrb[72].mxu0 }
 0x4d0   :  { %v3254_v62 = vpop.f32.mrb[73].mxu0  ;;  %v3253_v13 = vadd.f32 %v9161_v61, %v3252_v41  ;;  %v3473_v41 = vld [vmem:[#allocation6 + $0x58] sm:$0xff] }
 0x4d1   :  { %v3326_v62 = vld [vmem:[#allocation6 + $0x18] sm:$0xff] }
 0x4d2   :  { %v3311_v18 = vmul.f32 %v3253_v13, %v3253_v13  ;;  %v3474_v13 = vld [vmem:[#allocation6 + $0x60] sm:$0xff] }
 0x4d3   :  { %v3257_v2 = vpop.f32.mrb[74].mxu0 }
 0x4d4   :  { %v3258_v3 = vadd.f32 %v9161_v61, %v3257_v2  ;;  %v3259_v8 = vpop.f32.mrb[75].mxu0  ;;  %v3327_v2 = vld [vmem:[#allocation6 + $0x20] sm:$0xff] }
 0x4d5   :  { %v3475_v8 = vld [vmem:[#allocation6 + $0x68] sm:$0xff] }
 0x4d6   :  { %v3312_v16 = vmul.f32 %v3258_v3, %v3258_v3 }
 0x4d7   :  { %v3262_v19 = vpop.f32.mrb[76].mxu0 }
 0x4d8   :  { %v9165_v27 = vpack.c.bf16 %v3312_v16, %v3311_v18  ;;  %v3264_v34 = vpop.f32.mrb[77].mxu0  ;;  %v3263_v44 = vadd.f32 %v9161_v61, %v3262_v19  ;;  %v3328_v18 = vld [vmem:[#allocation6 + $0x28] sm:$0xff]  ;;  %v3476_v16 = vld [vmem:[#allocation6 + $0x70] sm:$0xff] }
 0x4d9   :  { %v3329_v19 = vld [vmem:[#allocation6 + $0x30] sm:$0xff]  ;;  %v5961_v34 = vld [vmem:[%s9567_s6 + $0x68] sm:$0xff] }
 0x4da   :  { %7544 = vmatprep.subr.bf16.mxu0 %v9165_v27  ;;  %7568 = vmatprep.subr.bf16.mxu1 %v9165_v27  ;;  %v3313_v14 = vmul.f32 %v3263_v44, %v3263_v44  ;;  %v5962_v44 = vld [vmem:[%s9567_s6 + $0x70] sm:$0xff] }
 0x4db   :  { %7546 = vmatpush3.bf16.msra.mxu0 %v9165_v27  ;;  %7570 = vmatpush3.bf16.msra.mxu1 %v9165_v27  ;;  %v3267_v7 = vpop.f32.mrb[78].mxu0 }
 0x4dc   :  { %v3268_v11 = vadd.f32 %v9161_v61, %v3267_v7  ;;  %v3269_v43 = vpop.f32.mrb[79].mxu0  ;;  %v3477_v7 = vld [vmem:[#allocation6 + $0x78] sm:$0xff] }
 0x4dd   :  { %v5963_v43 = vld [vmem:[%s9567_s6 + $0x78] sm:$0xff] }
 0x4de   :  { %v3314_v15 = vmul.f32 %v3268_v11, %v3268_v11  ;;  %v3330_v11 = vld [vmem:[#allocation6 + $0x38] sm:$0xff] }
 0x4df   :  { %v3272_v49 = vpop.f32.mrb[80].mxu0 }
 0x4e0   :  { %v9173_v54 = vpack.c.bf16 %v3314_v15, %v3313_v14  ;;  %v3274_v20 = vpop.f32.mrb[81].mxu0  ;;  %v3273_v17 = vadd.f32 %v9161_v61, %v3272_v49  ;;  %v5964_v14 = vld [vmem:[%s9567_s6 + $0x80] sm:$0xff]  ;;  %v3877_v15 = vld [vmem:[#allocation6 + $0x80] sm:$0xff]  ;;  %v7599_v49 = vpack.c.bf16 %v5962_v44, %v5961_v34  ;;  %v5991_v34 = vld [vmem:[%s9567_s6 + $0x98] sm:$0xff] }
 0x4e1   :  { %v7603_v20 = vpack.c.bf16 %v5964_v14, %v5963_v43  ;;  %v5992_v44 = vld [vmem:[%s9567_s6 + $0xa0] sm:$0xff]  ;;  %v5994_v14 = vld [vmem:[%s9567_s6 + $0xb0] sm:$0xff] }
 0x4e2   :  { %7548 = vmatprep.subr.bf16.mxu0 %v9173_v54  ;;  %7572 = vmatprep.subr.bf16.mxu1 %v9173_v54  ;;  %v3315_v24 = vmul.f32 %v3273_v17, %v3273_v17  ;;  %v3878_v17 = vld [vmem:[#allocation6 + $0x88] sm:$0xff] }
 0x4e3   :  { %7550 = vmatpush3.bf16.msra.mxu0 %v9173_v54  ;;  %7574 = vmatpush3.bf16.msra.mxu1 %v9173_v54  ;;  %v3277_v59 = vpop.f32.mrb[82].mxu0 }
 0x4e4   :  { %v3278_v63 = vadd.f32 %v9161_v61, %v3277_v59  ;;  %v3279_v22 = vpop.f32.mrb[83].mxu0  ;;  %v3879_v59 = vld [vmem:[#allocation6 + $0x90] sm:$0xff] }
 0x4e5   :  { %v3881_v22 = vld [vmem:[#allocation6 + $0xa0] sm:$0xff] }
 0x4e6   :  { %v3316_v5 = vmul.f32 %v3278_v63, %v3278_v63  ;;  %v3880_v63 = vld [vmem:[#allocation6 + $0x98] sm:$0xff] }
 0x4e7   :  { %v3282_v12 = vpop.f32.mrb[84].mxu0 }
 0x4e8   :  { %v9181_v25 = vpack.c.bf16 %v3316_v5, %v3315_v24  ;;  %v3284_v28 = vpop.f32.mrb[85].mxu0  ;;  %v3283_v23 = vadd.f32 %v9161_v61, %v3282_v12  ;;  %v3882_v24 = vld [vmem:[#allocation6 + $0xa8] sm:$0xff]  ;;  %v3883_v5 = vld [vmem:[#allocation6 + $0xb0] sm:$0xff]  ;;  %v3884_v12 = vld [vmem:[#allocation6 + $0xb8] sm:$0xff] }
 0x4e9   :  { %v4162_v28 = vld [vmem:[#allocation6 + $0xc0] sm:$0xff] }
 0x4ea   :  { %7552 = vmatprep.subr.bf16.mxu0 %v9181_v25  ;;  %7576 = vmatprep.subr.bf16.mxu1 %v9181_v25  ;;  %v3317_v42 = vmul.f32 %v3283_v23, %v3283_v23  ;;  %v4163_v23 = vld [vmem:[#allocation6 + $0xc8] sm:$0xff] }
 0x4eb   :  { %v3287_v31 = vpop.f32.mrb[86].mxu0  ;;  %7554 = vmatpush3.bf16.msra.mxu0 %v9181_v25  ;;  %7578 = vmatpush3.bf16.msra.mxu1 %v9181_v25 }
 0x4ec   :  { %v3288_v30 = vadd.f32 %v9161_v61, %v3287_v31  ;;  %v3289_v33 = vpop.f32.mrb[87].mxu0  ;;  %v4164_v31 = vld [vmem:[#allocation6 + $0xd0] sm:$0xff] }
 0x4ed   :  { %v4166_v33 = vld [vmem:[#allocation6 + $0xe0] sm:$0xff] }
 0x4ee   :  { %v3318_v32 = vmul.f32 %v3288_v30, %v3288_v30  ;;  %v4165_v30 = vld [vmem:[#allocation6 + $0xd8] sm:$0xff] }
 0x4ef   :  { %v3292_v36 = vpop.f32.mrb[88].mxu0 }
 0x4f0   :  { %v9189_v37 = vpack.c.bf16 %v3318_v32, %v3317_v42  ;;  %v3294_v55 = vpop.f32.mrb[89].mxu0  ;;  %v3293_v60 = vadd.f32 %v9161_v61, %v3292_v36  ;;  %v4167_v42 = vld [vmem:[#allocation6 + $0xe8] sm:$0xff]  ;;  %v4168_v32 = vld [vmem:[#allocation6 + $0xf0] sm:$0xff]  ;;  %v4447_v36 = vld [vmem:[#allocation6 + $0x100] sm:$0xff] }
 0x4f1   :  { %v4450_v55 = vld [vmem:[#allocation6 + $0x118] sm:$0xff] }
 0x4f2   :  { %7580 = vmatprep.subr.bf16.mxu1 %v9189_v37  ;;  %7556 = vmatprep.subr.bf16.mxu0 %v9189_v37  ;;  %v3319_v10 = vmul.f32 %v3293_v60, %v3293_v60  ;;  %v4451_v60 = vld [vmem:[#allocation6 + $0x120] sm:$0xff] }
 0x4f3   :  { %v3297_v40 = vpop.f32.mrb[90].mxu0  ;;  %7582 = vmatpush3.bf16.msra.mxu1 %v9189_v37  ;;  %7558 = vmatpush3.bf16.msra.mxu0 %v9189_v37 }
 0x4f4   :  { %v3298_v29 = vadd.f32 %v9161_v61, %v3297_v40  ;;  %v3299_v1 = vpop.f32.mrb[91].mxu0  ;;  %v4453_v40 = vld [vmem:[#allocation6 + $0x130] sm:$0xff] }
 0x4f5   :  { %v5965_v1 = vld [vmem:[%s9567_s6 + $0x88] sm:$0xff] }
 0x4f6   :  { %v3320_v46 = vmul.f32 %v3298_v29, %v3298_v29  ;;  %v4454_v29 = vld [vmem:[#allocation6 + $0x138] sm:$0xff] }
 0x4f7   :  { %v3302_v39 = vpop.f32.mrb[92].mxu0 }
 0x4f8   :  { %v9197_v47 = vpack.c.bf16 %v3320_v46, %v3319_v10  ;;  %v3304_v21 = vpop.f32.mrb[93].mxu0  ;;  %v3303_v48 = vadd.f32 %v9161_v61, %v3302_v39  ;;  %v3460_v10 = vld [vmem:[%s9567_s6] sm:$0xff]  ;;  %v3461_v46 = vld [vmem:[%s9567_s6 + $0x8] sm:$0xff] }
 0x4f9   :  { %v7607_v39 = vpack.c.bf16 %v3461_v46, %v3460_v10  ;;  %v3463_v21 = vld [vmem:[%s9567_s6 + $0x18] sm:$0xff] }
 0x4fa   :  { %7584 = vmatprep.subr.bf16.mxu1 %v9197_v47  ;;  %7560 = vmatprep.subr.bf16.mxu0 %v9197_v47  ;;  %v3321_v35 = vmul.f32 %v3303_v48, %v3303_v48  ;;  %v6023_v46 = vld [vmem:[%s9567_s6 + $0x118] sm:$0xff] }
 0x4fb   :  { %v3307_v50 = vpop.f32.mrb[94].mxu0  ;;  %7586 = vmatpush3.bf16.msra.mxu1 %v9197_v47  ;;  %7562 = vmatpush3.bf16.msra.mxu0 %v9197_v47 }
 0x4fc   :  { %v3308_v26 = vadd.f32 %v9161_v61, %v3307_v50  ;;  %v3309_v51 = vpop.f32.mrb[95].mxu0  ;;  %v5960_v61 = vld [vmem:[%s9567_s6 + $0x60] sm:$0xff] }
 0x4fd   :  { %v7595_v3 = vpack.c.bf16 %v5960_v61, %v5959_v9 }
 0x4fe   :  { %v3322_v52 = vmul.f32 %v3308_v26, %v3308_v26 }
 0x500   :  { %v9211_v56 = vpack.c.bf16 %v3322_v52, %v3321_v35  ;;  %v3465_v35 = vld [vmem:[%s9567_s6 + $0x28] sm:$0xff] }
 0x502   :  { %7588 = vmatprep.subr.bf16.mxu1 %v9211_v56  ;;  %7564 = vmatprep.subr.bf16.mxu0 %v9211_v56 }
 0x503   :  { %7590 = vmatpush3.bf16.msra.mxu1 %v9211_v56  ;;  %7566 = vmatpush3.bf16.msra.mxu0 %v9211_v56 }
 0x504   :  { %7624 = vmatprep.subr.bf16.mxu1 %v9165_v27  ;;  %7592 = vmatprep.subr.bf16.mxu0 %v7591_v57 }
 0x506   :  { %6778 = vmatmul.mubr.msk.f32.vlgmr.msra.gmra.mrb[192].mxu1 %vm238_vm0, %v3471_v58  ;;  %6742 = vmatmul.mubr.msk.f32.vlgmr.msra.gmra.mrb[96].mxu0 %vm238_vm0, %v3324_v38  ;;  %v7615_v58 = vpack.c.bf16 %v3465_v35, %v3464_v53  ;;  %v6044_v35 = vld [vmem:[%s9567_s6 + $0x140] sm:$0xff] }
 0x507   :  { %7626 = vmatpush3.bf16.msra.mxu1 %v9165_v27  ;;  %6780 = vmatprep.mubr.msk.f32.mxu1 %vm238_vm0, %v3472_v4  ;;  %v3466_v4 = vld [vmem:[%s9567_s6 + $0x30] sm:$0xff] }
 0x508   :  { %7628 = vmatprep.subr.bf16.mxu1 %v9173_v54  ;;  %6744 = vmatprep.mubr.msk.f32.mxu0 %vm238_vm0, %v3325_v6  ;;  %v3467_v6 = vld [vmem:[%s9567_s6 + $0x38] sm:$0xff] }
 0x509   :  { %7594 = vmatpush3.bf16.msra.mxu0 %v7591_v57 }
 0x50a   :  { %6781 = vmatmul.mubr.msk.f32.gmra.mrb[194].mxu1 %vm238_vm0, %v3473_v41  ;;  %6745 = vmatmul.mubr.msk.f32.gmra.mrb[98].mxu0 %vm238_vm0, %v3326_v62  ;;  %v7619_v62 = vpack.c.bf16 %v3467_v6, %v3466_v4  ;;  %v6047_v4 = vld [vmem:[%s9567_s6 + $0x158] sm:$0xff] }
 0x50b   :  { %7630 = vmatpush3.bf16.msra.mxu1 %v9173_v54  ;;  %6783 = vmatprep.mubr.msk.f32.mxu1 %vm238_vm0, %v3474_v13 }
 0x50c   :  { %7632 = vmatprep.subr.bf16.mxu1 %v9181_v25  ;;  %6747 = vmatprep.mubr.msk.f32.mxu0 %vm238_vm0, %v3327_v2 }
 0x50d   :  { %7596 = vmatprep.subr.bf16.mxu0 %v7595_v3 }
 0x50e   :  { %6784 = vmatmul.mubr.msk.f32.gmra.mrb[196].mxu1 %vm238_vm0, %v3475_v8  ;;  %6748 = vmatmul.mubr.msk.f32.gmra.mrb[100].mxu0 %vm238_vm0, %v3328_v18 }
 0x50f   :  { %7634 = vmatpush3.bf16.msra.mxu1 %v9181_v25  ;;  %6786 = vmatprep.mubr.msk.f32.mxu1 %vm238_vm0, %v3476_v16  ;;  %v3468_v16 = vld [vmem:[%s9567_s6 + $0x40] sm:$0xff] }
 0x510   :  { %7636 = vmatprep.subr.bf16.mxu1 %v9189_v37  ;;  %6750 = vmatprep.mubr.msk.f32.mxu0 %vm238_vm0, %v3329_v19  ;;  %v5990_v19 = vld [vmem:[%s9567_s6 + $0x90] sm:$0xff] }
 0x511   :  { %7598 = vmatpush3.bf16.msra.mxu0 %v7595_v3 }
 0x512   :  { %6787 = vmatmul.mubr.msk.f32.gmra.mrb[198].mxu1 %vm238_vm0, %v3477_v7  ;;  %6751 = vmatmul.mubr.msk.f32.gmra.mrb[102].mxu0 %vm238_vm0, %v3330_v11  ;;  %v5993_v7 = vld [vmem:[%s9567_s6 + $0xa8] sm:$0xff]  ;;  %v7647_v11 = vpack.c.bf16 %v5991_v34, %v5990_v19 }
 0x513   :  { %7638 = vmatpush3.bf16.msra.mxu1 %v9189_v37  ;;  %6873 = vmatprep.mubr.msk.f32.mxu1 %vm238_vm0, %v3877_v15  ;;  %v7651_v43 = vpack.c.bf16 %v5993_v7, %v5992_v44  ;;  %v5995_v15 = vld [vmem:[%s9567_s6 + $0xb8] sm:$0xff]  ;;  %v4731_v19 = vld [vmem:[#allocation7] sm:$0xff] }
 0x514   :  { %7640 = vmatprep.subr.bf16.mxu1 %v9197_v47  ;;  %7600 = vmatprep.subr.bf16.mxu0 %v7599_v49 }
 0x515   :  { %7602 = vmatpush3.bf16.msra.mxu0 %v7599_v49  ;;  %v7655_v49 = vpack.c.bf16 %v5995_v15, %v5994_v14 }
 0x516   :  { %7604 = vmatprep.subr.bf16.mxu0 %v7603_v20 }
 0x517   :  { %7642 = vmatpush3.bf16.msra.mxu1 %v9197_v47 }
 0x518   :  { %7644 = vmatprep.subr.bf16.mxu1 %v9211_v56 }
 0x519   :  { %7606 = vmatpush3.bf16.msra.mxu0 %v7603_v20  ;;  %v5996_v20 = vld [vmem:[%s9567_s6 + $0xc0] sm:$0xff] }
 0x51a   :  { %6805 = vmatprep.subr.mxu0 %v5965_v1 }
 0x51b   :  { %7646 = vmatpush3.bf16.msra.mxu1 %v9211_v56 }
 0x51c   :  { %7664 = vmatprep.subr.bf16.mxu1 %v9165_v27 }
 0x51d   :  { %6806 = vmatpush3.msra.mxu0 %v5965_v1 }
 0x51e   :  { %6874 = vmatmul.mubr.msk.f32.vlgmr.msra.gmra.mrb[200].mxu1 %vm238_vm0, %v3878_v17  ;;  %7608 = vmatprep.subr.bf16.mxu0 %v7607_v39  ;;  %v5997_v17 = vld [vmem:[%s9567_s6 + $0xc8] sm:$0xff] }
 0x51f   :  { %7666 = vmatpush3.bf16.msra.mxu1 %v9165_v27  ;;  %6876 = vmatprep.mubr.msk.f32.mxu1 %vm238_vm0, %v3879_v59 }
 0x520   :  { %7668 = vmatprep.subr.bf16.mxu1 %v9173_v54 }
 0x522   :  { %6877 = vmatmul.mubr.msk.f32.gmra.mrb[202].mxu1 %vm238_vm0, %v3880_v63 }
 0x523   :  { %7670 = vmatpush3.bf16.msra.mxu1 %v9173_v54  ;;  %6879 = vmatprep.mubr.msk.f32.mxu1 %vm238_vm0, %v3881_v22  ;;  %v7659_v22 = vpack.c.bf16 %v5997_v17, %v5996_v20 }
 0x524   :  { %7672 = vmatprep.subr.bf16.mxu1 %v9181_v25 }
 0x526   :  { %6880 = vmatmul.mubr.msk.f32.gmra.mrb[204].mxu1 %vm238_vm0, %v3882_v24 }
 0x527   :  { %7674 = vmatpush3.bf16.msra.mxu1 %v9181_v25  ;;  %6882 = vmatprep.mubr.msk.f32.mxu1 %vm238_vm0, %v3883_v5 }
 0x528   :  { %7676 = vmatprep.subr.bf16.mxu1 %v9189_v37 }
 0x52a   :  { %6883 = vmatmul.mubr.msk.f32.gmra.mrb[206].mxu1 %vm238_vm0, %v3884_v12  ;;  %v5998_v12 = vld [vmem:[%s9567_s6 + $0xd0] sm:$0xff] }
 0x52b   :  { %7678 = vmatpush3.bf16.msra.mxu1 %v9189_v37  ;;  %6939 = vmatprep.mubr.msk.f32.mxu1 %vm238_vm0, %v4162_v28  ;;  %v6015_v28 = vld [vmem:[%s9567_s6 + $0xd8] sm:$0xff] }
 0x52c   :  { %7680 = vmatprep.subr.bf16.mxu1 %v9197_v47 }
 0x52f   :  { %7682 = vmatpush3.bf16.msra.mxu1 %v9197_v47 }
 0x530   :  { %7684 = vmatprep.subr.bf16.mxu1 %v9211_v56 }
 0x533   :  { %7686 = vmatpush3.bf16.msra.mxu1 %v9211_v56 }
 0x534   :  { %7704 = vmatprep.subr.bf16.mxu1 %v9165_v27 }
 0x536   :  { %6940 = vmatmul.mubr.msk.f32.vlgmr.msra.gmra.mrb[208].mxu1 %vm238_vm0, %v4163_v23  ;;  %v6016_v23 = vld [vmem:[%s9567_s6 + $0xe0] sm:$0xff] }
 0x537   :  { %7706 = vmatpush3.bf16.msra.mxu1 %v9165_v27  ;;  %6942 = vmatprep.mubr.msk.f32.mxu1 %vm238_vm0, %v4164_v31  ;;  %v4169_v27 = vld [vmem:[#allocation6 + $0xf8] sm:$0xff] }
 0x538   :  { %7708 = vmatprep.subr.bf16.mxu1 %v9173_v54 }
 0x53a   :  { %6943 = vmatmul.mubr.msk.f32.gmra.mrb[210].mxu1 %vm238_vm0, %v4165_v30 }
 0x53b   :  { %7710 = vmatpush3.bf16.msra.mxu1 %v9173_v54  ;;  %6945 = vmatprep.mubr.msk.f32.mxu1 %vm238_vm0, %v4166_v33  ;;  %v4448_v54 = vld [vmem:[#allocation6 + $0x108] sm:$0xff]  ;;  %v6017_v33 = vld [vmem:[%s9567_s6 + $0xe8] sm:$0xff] }
 0x53c   :  { %7712 = vmatprep.subr.bf16.mxu1 %v9181_v25 }
 0x53e   :  { %6946 = vmatmul.mubr.msk.f32.gmra.mrb[212].mxu1 %vm238_vm0, %v4167_v42  ;;  %v6018_v42 = vld [vmem:[%s9567_s6 + $0xf0] sm:$0xff] }
 0x53f   :  { %7714 = vmatpush3.bf16.msra.mxu1 %v9181_v25  ;;  %6948 = vmatprep.mubr.msk.f32.mxu1 %vm238_vm0, %v4168_v32  ;;  %v4449_v25 = vld [vmem:[#allocation6 + $0x110] sm:$0xff]  ;;  %v7687_v32 = vpack.c.bf16 %v6016_v23, %v6015_v28  ;;  %v5002_v28 = vld [vmem:[#allocation10 + $0x40] sm:$0xff]  ;;  %v5003_v23 = vld [vmem:[#allocation10 + $0x48] sm:$0xff] }
 0x540   :  { %7716 = vmatprep.subr.bf16.mxu1 %v9189_v37 }
 0x542   :  { %6949 = vmatmul.mubr.msk.f32.gmra.mrb[214].mxu1 %vm238_vm0, %v4169_v27 }
 0x543   :  { %7718 = vmatpush3.bf16.msra.mxu1 %v9189_v37  ;;  %7005 = vmatprep.mubr.msk.f32.mxu1 %vm238_vm0, %v4447_v36  ;;  %v4452_v37 = vld [vmem:[#allocation6 + $0x128] sm:$0xff]  ;;  %v7691_v36 = vpack.c.bf16 %v6018_v42, %v6017_v33  ;;  %v5005_v33 = vld [vmem:[#allocation10 + $0x58] sm:$0xff] }
 0x544   :  { %7720 = vmatprep.subr.bf16.mxu1 %v9197_v47 }
 0x547   :  { %7722 = vmatpush3.bf16.msra.mxu1 %v9197_v47  ;;  %v3462_v47 = vld [vmem:[%s9567_s6 + $0x10] sm:$0xff] }
 0x548   :  { %7724 = vmatprep.subr.bf16.mxu1 %v9211_v56  ;;  %v7611_v51 = vpack.c.bf16 %v3463_v21, %v3462_v47  ;;  %v6041_v47 = vld [vmem:[%s9567_s6 + $0x128] sm:$0xff] }
 0x54b   :  { %7726 = vmatpush3.bf16.msra.mxu1 %v9211_v56 }
 0x54e   :  { %7006 = vmatmul.mubr.msk.f32.vlgmr.msra.gmra.mrb[216].mxu1 %vm238_vm0, %v4448_v54 }
 0x54f   :  { %7008 = vmatprep.mubr.msk.f32.mxu1 %vm238_vm0, %v4449_v25  ;;  %v6019_v25 = vld [vmem:[%s9567_s6 + $0xf8] sm:$0xff] }
 0x552   :  { %7009 = vmatmul.mubr.msk.f32.gmra.mrb[218].mxu1 %vm238_vm0, %v4450_v55  ;;  %v6020_v55 = vld [vmem:[%s9567_s6 + $0x100] sm:$0xff] }
 0x553   :  { %7011 = vmatprep.mubr.msk.f32.mxu1 %vm238_vm0, %v4451_v60  ;;  %v7695_v60 = vpack.c.bf16 %v6020_v55, %v6019_v25 }
 0x556   :  { %7012 = vmatmul.mubr.msk.f32.gmra.mrb[220].mxu1 %vm238_vm0, %v4452_v37  ;;  %v6021_v37 = vld [vmem:[%s9567_s6 + $0x108] sm:$0xff] }
 0x557   :  { %7014 = vmatprep.mubr.msk.f32.mxu1 %vm238_vm0, %v4453_v40  ;;  %v6022_v40 = vld [vmem:[%s9567_s6 + $0x110] sm:$0xff] }
 0x55a   :  { %7015 = vmatmul.mubr.msk.f32.gmra.mrb[222].mxu1 %vm238_vm0, %v4454_v29  ;;  %v7699_v29 = vpack.c.bf16 %v6022_v40, %v6021_v37 }
 0x55b   :  { %7063 = vmatprep.mubr.msk.f32.mxu1 %vm3149_vm5, %v4731_v19 }
 0x5d9   :  { %v6779_v48 = vpop.f32.mrb[192].mxu1  ;;  %v6743_v50 = vpop.f32.mrb[96].mxu0 }
 0x5da   :  { %v3568_v26 = vpop.f32.mrb[193].mxu1  ;;  %v3421_v45 = vpop.f32.mrb[97].mxu0 }
 0x5db   :  { %6807 = vmatprep.mubr.msk.f32.mxu0 %vm3617_vm6, %v3568_v26 }
 0x5dc   :  { %6808 = vmatmul.mubr.msk.f32.vlgmr.msra.gmra.mrb[104].mxu0 %vm3617_vm6, %v6779_v48  ;;  %v6042_v48 = vld [vmem:[%s9567_s6 + $0x130] sm:$0xff] }
 0x5dd   :  { %7610 = vmatpush3.bf16.msra.mxu0 %v7607_v39  ;;  %v6782_v52 = vpop.f32.mrb[194].mxu1  ;;  %v6746_v56 = vpop.f32.mrb[98].mxu0  ;;  %v6040_v39 = vld [vmem:[%s9567_s6 + $0x120] sm:$0xff] }
 0x5de   :  { %7612 = vmatprep.subr.bf16.mxu0 %v7611_v51  ;;  %v3578_v57 = vpop.f32.mrb[195].mxu1  ;;  %v3431_v38 = vpop.f32.mrb[99].mxu0  ;;  %v7727_v26 = vpack.c.bf16 %v6041_v47, %v6040_v39 }
 0x5df   :  { %6810 = vmatprep.mubr.msk.f32.mxu0 %vm3617_vm6, %v3578_v57 }
 0x5e0   :  { %6811 = vmatmul.mubr.msk.f32.gmra.mrb[106].mxu0 %vm3617_vm6, %v6782_v52  ;;  %v6045_v52 = vld [vmem:[%s9567_s6 + $0x148] sm:$0xff] }
 0x5e1   :  { %7614 = vmatpush3.bf16.msra.mxu0 %v7611_v51  ;;  %v6785_v9 = vpop.f32.mrb[196].mxu1  ;;  %v6749_v61 = vpop.f32.mrb[100].mxu0  ;;  %v7735_v57 = vpack.c.bf16 %v6045_v52, %v6044_v35  ;;  %v4922_v52 = vld [vmem:[#allocation10 + $0x20] sm:$0xff] }
 0x5e2   :  { %7616 = vmatprep.subr.bf16.mxu0 %v7615_v58  ;;  %v3588_v41 = vpop.f32.mrb[197].mxu1  ;;  %v3441_v13 = vpop.f32.mrb[101].mxu0 }
 0x5e3   :  { %6813 = vmatprep.mubr.msk.f32.mxu0 %vm3617_vm6, %v3588_v41 }
 0x5e4   :  { %6814 = vmatmul.mubr.msk.f32.gmra.mrb[108].mxu0 %vm3617_vm6, %v6785_v9 }
 0x5e5   :  { %7618 = vmatpush3.bf16.msra.mxu0 %v7615_v58  ;;  %v6788_v2 = vpop.f32.mrb[198].mxu1  ;;  %v6752_v3 = vpop.f32.mrb[102].mxu0 }
 0x5e6   :  { %7620 = vmatprep.subr.bf16.mxu0 %v7619_v62  ;;  %v3598_v8 = vpop.f32.mrb[199].mxu1  ;;  %v3451_v18 = vpop.f32.mrb[103].mxu0 }
 0x5e7   :  { %6816 = vmatprep.mubr.msk.f32.mxu0 %vm3617_vm6, %v3598_v8 }
 0x5e8   :  { %6817 = vmatmul.mubr.msk.f32.gmra.mrb[110].mxu0 %vm3617_vm6, %v6788_v2 }
 0x5e9   :  { %7622 = vmatpush3.bf16.msra.mxu0 %v7619_v62  ;;  %6837 = vmatprep.mubr.msk.f32.mxu0 %vm3617_vm6, %v3421_v45 }
 0x5ea   :  { %6835 = vmatprep.subr.mxu0 %v3468_v16 }
 0x5ed   :  { %6836 = vmatpush3.msra.mxu0 %v3468_v16 }
 0x5ee   :  { %7648 = vmatprep.subr.bf16.mxu0 %v7647_v11  ;;  %6838 = vmatmul.mubr.msk.f32.vlgmr.msra.gmra.mrb[104].mxu0 %vm3617_vm6, %v6743_v50  ;;  %v6043_v50 = vld [vmem:[%s9567_s6 + $0x138] sm:$0xff] }
 0x5ef   :  { %7650 = vmatpush3.bf16.msra.mxu0 %v7647_v11  ;;  %6840 = vmatprep.mubr.msk.f32.mxu0 %vm3617_vm6, %v3431_v38  ;;  %v7731_v45 = vpack.c.bf16 %v6043_v50, %v6042_v48  ;;  %v6046_v38 = vld [vmem:[%s9567_s6 + $0x150] sm:$0xff]  ;;  %v4918_v48 = vld [vmem:[#allocation10] sm:$0xff] }
 0x5f0   :  { %7652 = vmatprep.subr.bf16.mxu0 %v7651_v43  ;;  %v7739_v9 = vpack.c.bf16 %v6047_v4, %v6046_v38  ;;  %v4919_v50 = vld [vmem:[#allocation10 + $0x8] sm:$0xff]  ;;  %v4925_v38 = vld [vmem:[#allocation10 + $0x38] sm:$0xff] }
 0x5f1   :  { %v6875_v59 = vpop.f32.mrb[200].mxu1 }
 0x5f2   :  { %6841 = vmatmul.mubr.msk.f32.gmra.mrb[106].mxu0 %vm3617_vm6, %v6746_v56  ;;  %v3975_v63 = vpop.f32.mrb[201].mxu1 }
 0x5f3   :  { %7654 = vmatpush3.bf16.msra.mxu0 %v7651_v43  ;;  %6843 = vmatprep.mubr.msk.f32.mxu0 %vm3617_vm6, %v3441_v13 }
 0x5f4   :  { %7656 = vmatprep.subr.bf16.mxu0 %v7655_v49 }
 0x5f5   :  { %v6878_v24 = vpop.f32.mrb[202].mxu1 }
 0x5f6   :  { %6844 = vmatmul.mubr.msk.f32.gmra.mrb[108].mxu0 %vm3617_vm6, %v6749_v61  ;;  %v3985_v5 = vpop.f32.mrb[203].mxu1  ;;  %v6048_v61 = vld [vmem:[%s9567_s6 + $0x160] sm:$0xff] }
 0x5f7   :  { %7658 = vmatpush3.bf16.msra.mxu0 %v7655_v49  ;;  %6846 = vmatprep.mubr.msk.f32.mxu0 %vm3617_vm6, %v3451_v18 }
 0x5f8   :  { %7660 = vmatprep.subr.bf16.mxu0 %v7659_v22 }
 0x5f9   :  { %v6881_v31 = vpop.f32.mrb[204].mxu1 }
 0x5fa   :  { %6847 = vmatmul.mubr.msk.f32.gmra.mrb[110].mxu0 %vm3617_vm6, %v6752_v3  ;;  %v3995_v30 = vpop.f32.mrb[205].mxu1 }
 0x5fb   :  { %7662 = vmatpush3.bf16.msra.mxu0 %v7659_v22  ;;  %6903 = vmatprep.mubr.msk.f32.mxu0 %vm3617_vm6, %v3975_v63  ;;  %v4732_v22 = vld [vmem:[#allocation7 + $0x8] sm:$0xff] }
 0x5fc   :  { %6901 = vmatprep.subr.mxu0 %v5998_v12 }
 0x5fd   :  { %v6884_v27 = vpop.f32.mrb[206].mxu1 }
 0x5fe   :  { %v4005_v54 = vpop.f32.mrb[207].mxu1 }
 0x5ff   :  { %6902 = vmatpush3.msra.mxu0 %v5998_v12  ;;  %v8212_v12 = vmov 0.0  }
 0x600   :  { %7688 = vmatprep.subr.bf16.mxu0 %v7687_v32  ;;  %6904 = vmatmul.mubr.msk.f32.vlgmr.msra.gmra.mrb[104].mxu0 %vm3617_vm6, %v6875_v59 }
 0x601   :  { %7690 = vmatpush3.bf16.msra.mxu0 %v7687_v32  ;;  %6906 = vmatprep.mubr.msk.f32.mxu0 %vm3617_vm6, %v3985_v5  ;;  %v4734_v5 = vld [vmem:[#allocation7 + $0x18] sm:$0xff] }
 0x602   :  { %7692 = vmatprep.subr.bf16.mxu0 %v7691_v36  ;;  %v6057_v32 = vld [vmem:[%s9568_s7] ss:$0 sm:$0xff] }
 0x604   :  { %6907 = vmatmul.mubr.msk.f32.gmra.mrb[106].mxu0 %vm3617_vm6, %v6878_v24  ;;  %v4733_v24 = vld [vmem:[#allocation7 + $0x10] sm:$0xff] }
 0x605   :  { %7694 = vmatpush3.bf16.msra.mxu0 %v7691_v36  ;;  %6909 = vmatprep.mubr.msk.f32.mxu0 %vm3617_vm6, %v3995_v30  ;;  %v5004_v30 = vld [vmem:[#allocation10 + $0x50] sm:$0xff] }
 0x606   :  { %7696 = vmatprep.subr.bf16.mxu0 %v7695_v60  ;;  %v7775_v42 = vpack.c.bf16 %v5005_v33, %v5004_v30  ;;  %v5238_v30 = vld [vmem:[#allocation10 + $0xb0] sm:$0xff]  ;;  %v5239_v33 = vld [vmem:[#allocation10 + $0xb8] sm:$0xff] }
 0x608   :  { %6910 = vmatmul.mubr.msk.f32.gmra.mrb[108].mxu0 %vm3617_vm6, %v6881_v31  ;;  %v7772_v31 = vpack.c.bf16 %v5003_v23, %v5002_v28  ;;  %v5236_v28 = vld [vmem:[#allocation10 + $0xa0] sm:$0xff]  ;;  %v5237_v23 = vld [vmem:[#allocation10 + $0xa8] sm:$0xff] }
 0x609   :  { %7698 = vmatpush3.bf16.msra.mxu0 %v7695_v60  ;;  %6912 = vmatprep.mubr.msk.f32.mxu0 %vm3617_vm6, %v4005_v54  ;;  %v6941_v1 = vpop.f32.mrb[208].mxu1 }
 0x60a   :  { %7700 = vmatprep.subr.bf16.mxu0 %v7699_v29  ;;  %v4260_v10 = vpop.f32.mrb[209].mxu1 }
 0x60c   :  { %6913 = vmatmul.mubr.msk.f32.gmra.mrb[110].mxu0 %vm3617_vm6, %v6884_v27 }
 0x60d   :  { %7702 = vmatpush3.bf16.msra.mxu0 %v7699_v29  ;;  %6969 = vmatprep.mubr.msk.f32.mxu0 %vm3617_vm6, %v4260_v10  ;;  %v6944_v21 = vpop.f32.mrb[210].mxu1 }
 0x60e   :  { %6967 = vmatprep.subr.mxu0 %v6023_v46  ;;  %v4270_v51 = vpop.f32.mrb[211].mxu1 }
 0x611   :  { %6968 = vmatpush3.msra.mxu0 %v6023_v46  ;;  %v6947_v53 = vpop.f32.mrb[212].mxu1 }
 0x612   :  { %7728 = vmatprep.subr.bf16.mxu0 %v7727_v26  ;;  %6970 = vmatmul.mubr.msk.f32.vlgmr.msra.gmra.mrb[104].mxu0 %vm3617_vm6, %v6941_v1  ;;  %v4280_v56 = vpop.f32.mrb[213].mxu1 }
 0x613   :  { %7730 = vmatpush3.bf16.msra.mxu0 %v7727_v26  ;;  %6972 = vmatprep.mubr.msk.f32.mxu0 %vm3617_vm6, %v4270_v51  ;;  %v4927_v26 = vld [vmem:[#allocation9 + $0x8] sm:$0xff]  ;;  %v7784_v51 = vpack.c.bf16 %v4919_v50, %v4918_v48 }
 0x614   :  { %7732 = vmatprep.subr.bf16.mxu0 %v7731_v45 }
 0x615   :  { %v6950_v58 = vpop.f32.mrb[214].mxu1 }
 0x616   :  { %6973 = vmatmul.mubr.msk.f32.gmra.mrb[106].mxu0 %vm3617_vm6, %v6944_v21  ;;  %v4290_v6 = vpop.f32.mrb[215].mxu1  ;;  %v4843_v21 = vld [vmem:[#allocation9] sm:$0xff] }
 0x617   :  { %7734 = vmatpush3.bf16.msra.mxu0 %v7731_v45  ;;  %6975 = vmatprep.mubr.msk.f32.mxu0 %vm3617_vm6, %v4280_v56  ;;  %v4920_v45 = vld [vmem:[#allocation10 + $0x10] sm:$0xff]  ;;  %v4923_v56 = vld [vmem:[#allocation10 + $0x28] sm:$0xff] }
 0x618   :  { %7736 = vmatprep.subr.bf16.mxu0 %v7735_v57 }
 0x61a   :  { %6976 = vmatmul.mubr.msk.f32.gmra.mrb[108].mxu0 %vm3617_vm6, %v6947_v53  ;;  %v4921_v53 = vld [vmem:[#allocation10 + $0x18] sm:$0xff] }
 0x61b   :  { %7738 = vmatpush3.bf16.msra.mxu0 %v7735_v57  ;;  %6978 = vmatprep.mubr.msk.f32.mxu0 %vm3617_vm6, %v4290_v6  ;;  %v7787_v35 = vpack.c.bf16 %v4921_v53, %v4920_v45  ;;  %v7790_v57 = vpack.c.bf16 %v4923_v56, %v4922_v52  ;;  %v5006_v6 = vld [vmem:[#allocation10 + $0x60] sm:$0xff]  ;;  %v5487_v53 = vld [vmem:[#allocation12 + $0x30] sm:$0xff] }
 0x61c   :  { %7740 = vmatprep.subr.bf16.mxu0 %v7739_v9  ;;  %v5489_v56 = vld [vmem:[#allocation12 + $0x40] sm:$0xff] }
 0x61e   :  { %6979 = vmatmul.mubr.msk.f32.gmra.mrb[110].mxu0 %vm3617_vm6, %v6950_v58  ;;  %v4924_v58 = vld [vmem:[#allocation10 + $0x30] sm:$0xff] }
 0x61f   :  { %7742 = vmatpush3.bf16.msra.mxu0 %v7739_v9  ;;  %v7793_v4 = vpack.c.bf16 %v4925_v38, %v4924_v58  ;;  %v5007_v9 = vld [vmem:[#allocation10 + $0x68] sm:$0xff]  ;;  %v5491_v38 = vld [vmem:[#allocation12 + $0x50] sm:$0xff] }
 0x620   :  { %7033 = vmatprep.subr.mxu0 %v6048_v61 }
 0x621   :  { %v7007_v41 = vpop.f32.mrb[216].mxu1 }
 0x622   :  { %v4545_v62 = vpop.f32.mrb[217].mxu1 }
 0x623   :  { %7034 = vmatpush3.msra.mxu0 %v6048_v61  ;;  %7035 = vmatprep.mubr.msk.f32.mxu0 %vm3617_vm6, %v4545_v62  ;;  %v7778_v61 = vpack.c.bf16 %v5007_v9, %v5006_v6  ;;  %v5009_v62 = vld [vmem:[#allocation10 + $0x78] sm:$0xff]  ;;  %v5493_v9 = vld [vmem:[#allocation12 + $0x60] sm:$0xff] }
 0x624   :  { %7036 = vmatmul.mubr.msk.f32.vlgmr.msra.gmra.mrb[104].mxu0 %vm3617_vm6, %v7007_v41  ;;  %7771 = vmatprep.subr.bf16.mxu0 %v8209_v0  ;;  %v5008_v41 = vld [vmem:[#allocation10 + $0x70] sm:$0xff] }
 0x625   :  { %v7010_v13 = vpop.f32.mrb[218].mxu1  ;;  %7773 = vmatpush3.bf16.msra.mxu0 %v7772_v31  ;;  %v7808_v31 = vpack.c.bf16 %v5237_v23, %v5236_v28  ;;  %v5587_v28 = vld [vmem:[#allocation13 + $0x48] sm:$0xff] }
 0x626   :  { %v4555_v2 = vpop.f32.mrb[219].mxu1  ;;  %7774 = vmatprep.subr.bf16.mxu0 %v8209_v0 }
 0x627   :  { %7038 = vmatprep.mubr.msk.f32.mxu0 %vm3617_vm6, %v4555_v2 }
 0x628   :  { %7039 = vmatmul.mubr.msk.f32.gmra.mrb[106].mxu0 %vm3617_vm6, %v7010_v13  ;;  %v7781_v13 = vpack.c.bf16 %v5009_v62, %v5008_v41  ;;  %v5495_v62 = vld [vmem:[#allocation12 + $0x70] sm:$0xff] }
 0x629   :  { %v7013_v3 = vpop.f32.mrb[220].mxu1  ;;  %7776 = vmatpush3.bf16.msra.mxu0 %v7775_v42  ;;  %v7811_v42 = vpack.c.bf16 %v5239_v33, %v5238_v30 }
 0x62a   :  { %v4565_v8 = vpop.f32.mrb[221].mxu1  ;;  %7777 = vmatprep.subr.bf16.mxu0 %v8209_v0 }
 0x62b   :  { %7041 = vmatprep.mubr.msk.f32.mxu0 %vm3617_vm6, %v4565_v8  ;;  %v5390_v8 = vld [vmem:[#allocation10 + $0xc0] sm:$0xff] }
 0x62c   :  { %7042 = vmatmul.mubr.msk.f32.gmra.mrb[108].mxu0 %vm3617_vm6, %v7013_v3 }
 0x62d   :  { %v7016_v18 = vpop.f32.mrb[222].mxu1  ;;  %7779 = vmatpush3.bf16.msra.mxu0 %v7778_v61  ;;  %v5494_v61 = vld [vmem:[#allocation12 + $0x68] sm:$0xff] }
 0x62e   :  { %v4575_v16 = vpop.f32.mrb[223].mxu1  ;;  %7780 = vmatprep.subr.bf16.mxu0 %v8209_v0  ;;  %v7850_v41 = vpack.c.bf16 %v5494_v61, %v5493_v9 }
 0x62f   :  { %7044 = vmatprep.mubr.msk.f32.mxu0 %vm3617_vm6, %v4575_v16  ;;  %v5315_v16 = vld [vmem:[#allocation9 + $0x18] sm:$0xff] }
 0x630   :  { %7045 = vmatmul.mubr.msk.f32.gmra.mrb[110].mxu0 %vm3617_vm6, %v7016_v18  ;;  %v5391_v18 = vld [vmem:[#allocation10 + $0xc8] sm:$0xff] }
 0x631   :  { %7107 = vmatprep.mubr.msk.f32.mxu0 %vm8211_vm7, %v8212_v12  ;;  %7782 = vmatpush3.bf16.msra.mxu0 %v7781_v13  ;;  %v7820_v19 = vpack.c.bf16 %v5391_v18, %v5390_v8  ;;  %v5578_v13 = vld [vmem:[#allocation13] sm:$0xff]  ;;  %v5581_v18 = vld [vmem:[#allocation13 + $0x18] sm:$0xff] }
 0x632   :  { %7795 = vmatprep.subr.bf16.mxu0 %v8209_v0 }
 0x6f7   :  { %v7037_v34 = vpop.f32.mrb[104].mxu0 }
 0x6f8   :  { %v4684_v44 = vpop.f32.mrb[105].mxu0 }
 0x6f9   :  { %v7743_v7 = vpack.c.bf16 %v7037_v34, %v4684_v44  ;;  %v5392_v44 = vld [vmem:[#allocation10 + $0xd0] sm:$0xff] }
 0x6fb   :  { %v7040_v11 = vpop.f32.mrb[106].mxu0  ;;  %7744 = vmatprep.subr.bf16.mxu1 %v7743_v7 }
 0x6fc   :  { %v4694_v43 = vpop.f32.mrb[107].mxu0  ;;  %7746 = vmatpush3.bf16.msra.mxu1 %v7743_v7  ;;  %v5393_v7 = vld [vmem:[#allocation10 + $0xd8] sm:$0xff] }
 0x6fd   :  { %v7747_v14 = vpack.c.bf16 %v7040_v11, %v4694_v43  ;;  %v5232_v43 = vld [vmem:[#allocation10 + $0x80] sm:$0xff] }
 0x6ff   :  { %v7043_v15 = vpop.f32.mrb[108].mxu0  ;;  %7748 = vmatprep.subr.bf16.mxu1 %v7747_v14 }
 0x700   :  { %v4704_v49 = vpop.f32.mrb[109].mxu0  ;;  %7750 = vmatpush3.bf16.msra.mxu1 %v7747_v14  ;;  %v5233_v14 = vld [vmem:[#allocation10 + $0x88] sm:$0xff] }
 0x701   :  { %v7751_v20 = vpack.c.bf16 %v7043_v15, %v4704_v49  ;;  %v7823_v15 = vpack.c.bf16 %v5393_v7, %v5392_v44  ;;  %v5394_v49 = vld [vmem:[#allocation10 + $0xe0] sm:$0xff]  ;;  %v5584_v7 = vld [vmem:[#allocation13 + $0x30] sm:$0xff] }
 0x703   :  { %v7046_v17 = vpop.f32.mrb[110].mxu0  ;;  %7752 = vmatprep.subr.bf16.mxu1 %v7751_v20 }
 0x704   :  { %v4714_v59 = vpop.f32.mrb[111].mxu0  ;;  %7754 = vmatpush3.bf16.msra.mxu1 %v7751_v20  ;;  %v5395_v20 = vld [vmem:[#allocation10 + $0xe8] sm:$0xff] }
 0x705   :  { %v7755_v63 = vpack.c.bf16 %v7046_v17, %v4714_v59  ;;  %v5157_v17 = vld [vmem:[#allocation9 + $0x10] sm:$0xff]  ;;  %v7802_v59 = vpack.c.bf16 %v5233_v14, %v5232_v43 }
 0x707   :  { %7756 = vmatprep.subr.bf16.mxu1 %v7755_v63 }
 0x708   :  { %7758 = vmatpush3.bf16.msra.mxu1 %v7755_v63  ;;  %v5234_v63 = vld [vmem:[#allocation10 + $0x90] sm:$0xff] }
 0x709   :  { %7759 = vmatprep.subr.bf16.mxu1 %v8209_v0 }
 0x70b   :  { %7064 = vmatmul.mubr.msk.f32.vlgmr.msra.gmra.mrb[224].mxu1 %vm3149_vm5, %v4732_v22  ;;  %v5235_v22 = vld [vmem:[#allocation10 + $0x98] sm:$0xff] }
 0x70c   :  { %7066 = vmatprep.mubr.msk.f32.mxu1 %vm3149_vm5, %v4733_v24  ;;  %v7826_v24 = vpack.c.bf16 %v5395_v20, %v5394_v49 }
 0x70f   :  { %7067 = vmatmul.mubr.msk.f32.gmra.mrb[226].mxu1 %vm3149_vm5, %v4734_v5  ;;  %v7805_v5 = vpack.c.bf16 %v5235_v22, %v5234_v63 }
 0x710   :  { %7077 = vmatprep.mubr.msk.f32.mxu1 %vm8211_vm7, %v8212_v12 }
 0x7de   :  { %v7065_v27 = vpop.f32.mrb[224].mxu1 }
 0x7df   :  { %v4826_v36 = vadd.f32 %v7065_v27, %v6057_v32  ;;  %v4820_v54 = vpop.f32.mrb[225].mxu1  ;;  %v5397_v27 = vld [vmem:[#allocation10 + $0xf8] sm:$0xff] }
 0x7e0   :  { %v4821_v25 = vadd.f32 %v6057_v32, %v4820_v54 }
 0x7e1   :  { %v4840_v55 = vmul.f32 %v4826_v36, %v4826_v36 }
 0x7e2   :  { %v4839_v60 = vmul.f32 %v4821_v25, %v4821_v25  ;;  %v7068_v37 = vpop.f32.mrb[226].mxu1 }
 0x7e3   :  { %v4836_v40 = vadd.f32 %v7068_v37, %v6057_v32  ;;  %v4830_v29 = vpop.f32.mrb[227].mxu1 }
 0x7e4   :  { %v9475_v1 = vpack.c.bf16 %v4840_v55, %v4839_v60  ;;  %v4831_v10 = vadd.f32 %v6057_v32, %v4830_v29  ;;  %v5396_v32 = vld [vmem:[#allocation10 + $0xf0] sm:$0xff] }
 0x7e5   :  { %v4842_v46 = vmul.f32 %v4836_v40, %v4836_v40  ;;  %v7829_v36 = vpack.c.bf16 %v5397_v27, %v5396_v32  ;;  %v6073_v27 = vld [vmem:[%s9576_s15] ss:$0 sm:$0xff] }
 0x7e6   :  { %v4841_v39 = vmul.f32 %v4831_v10, %v4831_v10  ;;  %7761 = vmatpush3.bf16.msra.mxu1 %v9475_v1  ;;  %v5482_v10 = vld [vmem:[#allocation12 + $0x8] sm:$0xff] }
 0x7e7   :  { %7762 = vmatprep.subr.bf16.mxu1 %v8209_v0 }
 0x7e8   :  { %v9479_v47 = vpack.c.bf16 %v4842_v46, %v4841_v39  ;;  %v5483_v39 = vld [vmem:[#allocation12 + $0x10] sm:$0xff] }
 0x7ea   :  { %7764 = vmatpush3.bf16.msra.mxu1 %v9479_v47 }
 0x7eb   :  { %7765 = vmatprep.subr.bf16.mxu1 %v8209_v0 }
 0x7ed   :  { %7078 = vmatmul.mubr.msk.f32.vlgmr.msra.gmra.mrb[228].mxu1 %vm4844_vm8, %v4843_v21 }
 0x7ee   :  { %7767 = vmatpush3.bf16.msra.mxu1 %v9475_v1  ;;  %7088 = vmatprep.mubr.msk.f32.mxu1 %vm8211_vm7, %v8212_v12 }
 0x7ef   :  { %7768 = vmatprep.subr.bf16.mxu1 %v8209_v0 }
 0x7f2   :  { %7770 = vmatpush3.bf16.msra.mxu1 %v9479_v47 }
 0x7f3   :  { %7783 = vmatprep.subr.bf16.mxu1 %v8209_v0 }
 0x7f5   :  { %7089 = vmatmul.mubr.msk.f32.vlgmr.msra.gmra.mrb[230].mxu1 %vm4844_vm8, %v4927_v26  ;;  %v5485_v26 = vld [vmem:[#allocation12 + $0x20] sm:$0xff] }
 0x7f6   :  { %7785 = vmatpush3.bf16.msra.mxu1 %v7784_v51  ;;  %7126 = vmatprep.mubr.msk.f32.mxu1 %vm8211_vm7, %v8212_v12  ;;  %v5486_v51 = vld [vmem:[#allocation12 + $0x28] sm:$0xff] }
 0x7f7   :  { %7786 = vmatprep.subr.bf16.mxu1 %v8209_v0  ;;  %v7838_v45 = vpack.c.bf16 %v5486_v51, %v5485_v26 }
 0x7fa   :  { %7788 = vmatpush3.bf16.msra.mxu1 %v7787_v35  ;;  %v5488_v35 = vld [vmem:[#allocation12 + $0x38] sm:$0xff] }
 0x7fb   :  { %7789 = vmatprep.subr.bf16.mxu1 %v8209_v0  ;;  %v7841_v52 = vpack.c.bf16 %v5488_v35, %v5487_v53 }
 0x7fe   :  { %7791 = vmatpush3.bf16.msra.mxu1 %v7790_v57  ;;  %v5490_v57 = vld [vmem:[#allocation12 + $0x48] sm:$0xff] }
 0x7ff   :  { %7792 = vmatprep.subr.bf16.mxu1 %v8209_v0  ;;  %v7844_v58 = vpack.c.bf16 %v5490_v57, %v5489_v56 }
 0x802   :  { %7794 = vmatpush3.bf16.msra.mxu1 %v7793_v4  ;;  %v5492_v4 = vld [vmem:[#allocation12 + $0x58] sm:$0xff] }
 0x803   :  { %7813 = vmatprep.subr.bf16.mxu1 %v8209_v0  ;;  %v7847_v6 = vpack.c.bf16 %v5492_v4, %v5491_v38 }
 0x8c0   :  { %v4914_v2 = vpop.f32.mrb[228].mxu1 }
 0x8c1   :  { %7127 = vmatmul.mubr.msk.f32.vlgmr.msra.gmra.mrb[232].mxu1 %vm3149_vm5, %v4914_v2  ;;  %v7079_v3 = vpop.f32.mrb[229].mxu1  ;;  %v5579_v2 = vld [vmem:[#allocation13 + $0x8] sm:$0xff] }
 0x8c2   :  { %7815 = vmatpush3.bf16.msra.mxu1 %v9475_v1  ;;  %7167 = vmatprep.mubr.msk.f32.mxu1 %vm8211_vm7, %v8212_v12  ;;  %v5580_v3 = vld [vmem:[#allocation13 + $0x10] sm:$0xff]  ;;  %v7853_v8 = vpack.c.bf16 %v5579_v2, %v5578_v13 }
 0x8c3   :  { %7816 = vmatprep.subr.bf16.mxu1 %v8209_v0 }
 0x8c6   :  { %7818 = vmatpush3.bf16.msra.mxu1 %v9479_v47 }
 0x8c7   :  { %7819 = vmatprep.subr.bf16.mxu1 %v8209_v0 }
 0x8c8   :  { %v4997_v34 = vpop.f32.mrb[230].mxu1 }
 0x8c9   :  { %7108 = vmatmul.mubr.msk.f32.vlgmr.msra.gmra.mrb[112].mxu0 %vm3149_vm5, %v4997_v34  ;;  %7168 = vmatmul.mubr.msk.f32.vlgmr.msra.gmra.mrb[234].mxu1 %vm4844_vm8, %v5315_v16  ;;  %v7090_v11 = vpop.f32.mrb[231].mxu1  ;;  %v7856_v16 = vpack.c.bf16 %v5581_v18, %v5580_v3  ;;  %v5583_v34 = vld [vmem:[#allocation13 + $0x28] sm:$0xff] }
 0x8ca   :  { %7797 = vmatpush3.bf16.msra.mxu0 %v9475_v1  ;;  %7137 = vmatprep.mubr.msk.f32.mxu0 %vm8211_vm7, %v8212_v12  ;;  %v5481_v1 = vld [vmem:[#allocation12] sm:$0xff]  ;;  %v5585_v11 = vld [vmem:[#allocation13 + $0x38] sm:$0xff] }
 0x8cb   :  { %7798 = vmatprep.subr.bf16.mxu0 %v8209_v0  ;;  %7821 = vmatpush3.bf16.msra.mxu1 %v7820_v19  ;;  %v7832_v46 = vpack.c.bf16 %v5482_v10, %v5481_v1  ;;  %v5582_v19 = vld [vmem:[#allocation13 + $0x20] sm:$0xff]  ;;  %v7862_v43 = vpack.c.bf16 %v5585_v11, %v5584_v7 }
 0x8cc   :  { %7822 = vmatprep.subr.bf16.mxu1 %v8209_v0  ;;  %7186 = vmatprep.mubr.msk.f32.mxu1 %vm8211_vm7, %v8212_v12  ;;  %v7859_v44 = vpack.c.bf16 %v5583_v34, %v5582_v19 }
 0x8ce   :  { %7800 = vmatpush3.bf16.msra.mxu0 %v9479_v47  ;;  %v5484_v47 = vld [vmem:[#allocation12 + $0x18] sm:$0xff] }
 0x8cf   :  { %7801 = vmatprep.subr.bf16.mxu0 %v8209_v0  ;;  %7824 = vmatpush3.bf16.msra.mxu1 %v7823_v15  ;;  %v7835_v50 = vpack.c.bf16 %v5484_v47, %v5483_v39 }
 0x8d0   :  { %7825 = vmatprep.subr.bf16.mxu1 %v8209_v0 }
 0x8d1   :  { %7138 = vmatmul.mubr.msk.f32.vlgmr.msra.gmra.mrb[114].mxu0 %vm4844_vm8, %v5157_v17 }
 0x8d2   :  { %7803 = vmatpush3.bf16.msra.mxu0 %v7802_v59  ;;  %7156 = vmatprep.mubr.msk.f32.mxu0 %vm8211_vm7, %v8212_v12  ;;  %v6070_v59 = vld [vmem:[%s9572_s11] ss:$0 sm:$0xff] }
 0x8d3   :  { %7804 = vmatprep.subr.bf16.mxu0 %v8209_v0  ;;  %7827 = vmatpush3.bf16.msra.mxu1 %v7826_v24 }
 0x8d4   :  { %7828 = vmatprep.subr.bf16.mxu1 %v8209_v0 }
 0x8d6   :  { %7806 = vmatpush3.bf16.msra.mxu0 %v7805_v5  ;;  %v5586_v5 = vld [vmem:[#allocation13 + $0x40] sm:$0xff] }
 0x8d7   :  { %7807 = vmatprep.subr.bf16.mxu0 %v8209_v0  ;;  %7830 = vmatpush3.bf16.msra.mxu1 %v7829_v36  ;;  %v7865_v23 = vpack.c.bf16 %v5587_v28, %v5586_v5 }
 0x8d8   :  { %7852 = vmatprep.subr.bf16.mxu1 %v8209_v0 }
 0x8da   :  { %7809 = vmatpush3.bf16.msra.mxu0 %v7808_v31  ;;  %v6071_v31 = vld [vmem:[%s9574_s13] ss:$0 sm:$0xff] }
 0x8db   :  { %7810 = vmatprep.subr.bf16.mxu0 %v8209_v0 }
 0x8de   :  { %7812 = vmatpush3.bf16.msra.mxu0 %v7811_v42 }
 0x8df   :  { %7831 = vmatprep.subr.bf16.mxu0 %v8209_v0 }
 0x994   :  { %v5152_v54 = vpop.f32.mrb[232].mxu1 }
 0x995   :  { %v7128_v25 = vpop.f32.mrb[233].mxu1 }
 0x99c   :  { %v5079_v55 = vpop.f32.mrb[112].mxu0  ;;  %v5385_v60 = vpop.f32.mrb[234].mxu1 }
 0x99d   :  { %v7109_v37 = vpop.f32.mrb[113].mxu0  ;;  %v9527_v40 = vadd.f32 %v5152_v54, %v5079_v55  ;;  %7187 = vmatmul.mubr.msk.f32.vlgmr.msra.gmra.mrb[236].mxu1 %vm3149_vm5, %v5385_v60  ;;  %v7169_v29 = vpop.f32.mrb[235].mxu1 }
 0x99e   :  { %7244 = vmatprep.mubr.msk.f32.mxu1 %vm8211_vm7, %v8212_v12  ;;  %7854 = vmatpush3.bf16.msra.mxu1 %v7853_v8 }
 0x99f   :  { %7855 = vmatprep.subr.bf16.mxu1 %v8209_v0 }
 0x9a2   :  { %7857 = vmatpush3.bf16.msra.mxu1 %v7856_v16 }
 0x9a3   :  { %7858 = vmatprep.subr.bf16.mxu1 %v8209_v0 }
 0x9a4   :  { %v5227_v21 = vpop.f32.mrb[114].mxu0 }
 0x9a5   :  { %7157 = vmatmul.mubr.msk.f32.vlgmr.msra.gmra.mrb[116].mxu0 %vm3149_vm5, %v5227_v21  ;;  %v7139_v48 = vpop.f32.mrb[115].mxu0 }
 0x9a6   :  { %7833 = vmatpush3.bf16.msra.mxu0 %v7832_v46  ;;  %7219 = vmatprep.mubr.msk.f32.mxu0 %vm8211_vm7, %v8212_v12 }
 0x9a7   :  { %7834 = vmatprep.subr.bf16.mxu0 %v8209_v0  ;;  %7860 = vmatpush3.bf16.msra.mxu1 %v7859_v44 }
 0x9a8   :  { %7861 = vmatprep.subr.bf16.mxu1 %v8209_v0 }
 0x9aa   :  { %7836 = vmatpush3.bf16.msra.mxu0 %v7835_v50 }
 0x9ab   :  { %7837 = vmatprep.subr.bf16.mxu0 %v8209_v0  ;;  %7863 = vmatpush3.bf16.msra.mxu1 %v7862_v43 }
 0x9ac   :  { %7864 = vmatprep.subr.bf16.mxu1 %v8209_v0 }
 0x9ae   :  { %7839 = vmatpush3.bf16.msra.mxu0 %v7838_v45 }
 0x9af   :  { %7840 = vmatprep.subr.bf16.mxu0 %v8209_v0  ;;  %7866 = vmatpush3.bf16.msra.mxu1 %v7865_v23 }
 0x9b0   :  { %7242 = vmatprep.subr.mxu1 %v8212_v12 }
 0x9b2   :  { %7842 = vmatpush3.bf16.msra.mxu0 %v7841_v52 }
 0x9b3   :  { %7843 = vmatprep.subr.bf16.mxu0 %v8209_v0 }
 0x9b6   :  { %7845 = vmatpush3.bf16.msra.mxu0 %v7844_v58 }
 0x9b7   :  { %7846 = vmatprep.subr.bf16.mxu0 %v8209_v0 }
 0x9ba   :  { %7848 = vmatpush3.bf16.msra.mxu0 %v7847_v6 }
 0x9bb   :  { %7849 = vmatprep.subr.bf16.mxu0 %v8209_v0  ;;  %v5588_v0 = vld [vmem:[#allocation13 + $0x50] sm:$0xf] }
 0x9bc   :  { %7243 = vmatpush3.msk.msra.mxu1 %vm884_vm1, %v5588_v0 }
 0x9be   :  { %7851 = vmatpush3.bf16.msra.mxu0 %v7850_v41 }
 0x9bf   :  { %7217 = vmatprep.subr.mxu0 %v8212_v12 }
 0x9c2   :  { %7218 = vmatpush3.msra.mxu0 %v5495_v62 }
 0xa70   :  { %v5467_v14 = vpop.f32.mrb[236].mxu1 }
 0xa71   :  { %v7188_v15 = vpop.f32.mrb[237].mxu1 }
 0xa78   :  { %v5309_v49 = vpop.f32.mrb[116].mxu0 }
 0xa79   :  { %v5313_v20 = vadd.f32 %v5309_v49, %v9527_v40  ;;  %v7158_v17 = vpop.f32.mrb[117].mxu0 }
 0xa7b   :  { %v5471_v63 = vadd.f32 %v5467_v14, %v5313_v20 }
 0xa7d   :  { %v5479_v22 = vadd.f32 %v6070_v59, %v5471_v63 }
 0xa7f   :  { %v5480_v24 = vmax.f32 %v5479_v22, 0.0 }
 0xa81   :  { %7220 = vmatmul.mubr.msk.f32.vlgmr.msra.gmra.mrb[118].mxu0 %vm5503_vm9, %v5480_v24 }
 0xb54   :  { %v5573_v30 = vpop.f32.mrb[118].mxu0 }
 0xb55   :  { %v5574_v33 = vadd.f32 %v6071_v31, %v5573_v30  ;;  %v7221_v42 = vpop.f32.mrb[119].mxu0 }
 0xb57   :  { %v5577_v32 = vmax.f32 %v5574_v33, 0.0 }
 0xb59   :  { %7245 = vmatmul.mubr.msk.f32.vlgmr.msra.gmra.mrb[238].mxu1 %vm5596_vm10, %v5577_v32 }
 0xc2c   :  { %v5669_v36 = vpop.f32.mrb[238].mxu1 }
 0xc2d   :  { %v5670_v54 = vadd.f32 %v6073_v27, %v5669_v36  ;;  %v7246_v12 = vpop.f32.mrb[239].mxu1 }
 0xc2f   :  { %5673 = vst [vmem:[%s9584_s20] sm:$0xff] %v5670_v54 }
 0xc30   :  { %5678 = vsyncpa [#allocation3], 1 }
 0xc31   :  { %5679 = vsyncpa [#allocation5], 1 }
 0xc32   :  { %5680 = vsyncpa [#allocation8], 1 }
 0xc33   :  { %5681 = vsyncpa [#allocation11], 1 }
 0xc34   :  { %5682 = vsyncpa [#allocation14], 1 }

</bundles_post_ra>
